<compile_context>
chip_gen: v5e
topology: v5e:2x2
jax: 0.10.0
libtpu: 0.0.40
codegen_flags: <defaults>
</compile_context>

<pallas_src>
import functools

import jax
import jax.numpy as jnp
from jax.experimental import pallas as pl
from jax.experimental.pallas import tpu as pltpu

EPS = 1e-5
LANE = 128


def _round_up(x, m):
    return ((x + m - 1) // m) * m


def _critic_kernel(n_blocks, inv_b, x_ref, w_ref, vec_ref, o_ref):
    """Fused Critic forward.

    x_ref  : (B, HP)              f32   zero-padded state
    w_ref  : (n_blocks+1, HP, HP) bf16  stacked weights; last = head (col 0 valid)
    vec_ref: (n_blocks+1, 3, HP)  f32   rows: bias, gamma, beta (head uses row 0)
    o_ref  : (B, HP)              f32   column 0 is the critic value
    """
    h = x_ref[...]                                      # (B, HP) f32
    for i in range(n_blocks):
        w = w_ref[i]                                    # (HP, HP) bf16
        vecs = vec_ref[i]                               # (3, HP)  f32 (one load)
        bias = vecs[0:1, :]
        gamma = vecs[1:2, :]
        beta = vecs[2:3, :]

        # Linear (bf16 MXU, f32 accumulation) + ReLU.
        z = jnp.dot(h.astype(jnp.bfloat16), w,
                    preferred_element_type=jnp.float32) + bias
        z = jnp.maximum(z, 0.0)

        # Single-pass training-mode BatchNorm1d (biased variance), f32.
        mean = jnp.sum(z, axis=0, keepdims=True) * inv_b        # (1, HP)
        ex2 = jnp.sum(z * z, axis=0, keepdims=True) * inv_b     # (1, HP)
        var = ex2 - mean * mean
        scale = jax.lax.rsqrt(var + EPS) * gamma                # (1, HP)
        offset = beta - mean * scale                            # (1, HP)
        h = z * scale + offset                                  # (B, HP)

    # Lane-dense padded head: (B, HP) @ (HP, HP), only column 0 is real.
    head_vecs = vec_ref[n_blocks]
    head_b = head_vecs[0:1, :]
    out = jnp.dot(h.astype(jnp.bfloat16), w_ref[n_blocks],
                  preferred_element_type=jnp.float32) + head_b
    o_ref[...] = out.astype(o_ref.dtype)


def critic_forward(state_padded, w_stack, vec_stack):
    """Run the fused Critic kernel.

    state_padded: (B, HP) f32 (zero-padded state)
    w_stack:      (n_blocks+1, HP, HP) bf16
    vec_stack:    (n_blocks+1, 3, HP)  f32
    Returns the padded (B, HP) output; the critic value is column 0.
    """
    B, HP = state_padded.shape
    n_blocks = w_stack.shape[0] - 1
    kernel = functools.partial(_critic_kernel, n_blocks, 1.0 / float(B))

    vmem = pl.BlockSpec(memory_space=pltpu.MemorySpace.VMEM)
    flops = 2 * B * HP * HP * (n_blocks + 1) + 10 * B * HP * n_blocks
    bytes_accessed = (state_padded.size * 4 + w_stack.size * 2
                      + vec_stack.size * 4 + B * HP * 4)

    return pl.pallas_call(
        kernel,
        out_shape=jax.ShapeDtypeStruct((B, HP), jnp.float32),
        in_specs=[vmem, vmem, vmem],
        out_specs=vmem,
        compiler_params=pltpu.CompilerParams(
            vmem_limit_bytes=32 * 1024 * 1024,
        ),
        cost_estimate=pl.CostEstimate(
            flops=flops,
            transcendentals=n_blocks * HP,
            bytes_accessed=bytes_accessed),
    )(state_padded, w_stack, vec_stack)


def init_critic_params(key, state_dim, hidden_size, hidden_layers):
    """PyTorch-style init: U(-1/sqrt(fan_in), 1/sqrt(fan_in)) for Linear
    weights/biases; gamma=1, beta=0 for BatchNorm.  Natural (unpadded) layout."""
    layers = []
    dims = [(state_dim, hidden_size)] + [(hidden_size, hidden_size)] * hidden_layers
    for fin, fout in dims:
        key, kw, kb = jax.random.split(key, 3)
        bound = 1.0 / jnp.sqrt(float(fin))
        w = jax.random.uniform(kw, (fin, fout), jnp.float32, -bound, bound)
        b = jax.random.uniform(kb, (1, fout), jnp.float32, -bound, bound)
        g = jnp.ones((1, fout), jnp.float32)
        be = jnp.zeros((1, fout), jnp.float32)
        layers.append((w, b, g, be))

    key, kw, kb = jax.random.split(key, 3)
    bound = 1.0 / jnp.sqrt(float(hidden_size))
    w_out = jax.random.uniform(kw, (hidden_size, 1), jnp.float32, -bound, bound)
    b_out = jax.random.uniform(kb, (1, 1), jnp.float32, -bound, bound)
    return layers, w_out, b_out


def prepare_kernel_params(layers, w_out, b_out, state_dim, hidden_size):
    """Zero-pad everything to a uniform HP x HP tile and stack.

    Zero-padding is exact: pad input features multiply zero weight rows, pad
    output features get bias=0 -> ReLU(0)=0 -> BN gives beta=0 -> stay zero.
    """
    HP = max(_round_up(state_dim, LANE), _round_up(hidden_size, LANE), LANE)

    ws, vs = [], []
    for (w, b, g, be) in layers:
        fin, fout = w.shape
        wp = jnp.zeros((HP, HP), jnp.float32).at[:fin, :fout].set(w)
        bp = jnp.zeros((1, HP), jnp.float32).at[:, :fout].set(b)
        gp = jnp.ones((1, HP), jnp.float32).at[:, :fout].set(g)
        bep = jnp.zeros((1, HP), jnp.float32).at[:, :fout].set(be)
        ws.append(wp)
        vs.append(jnp.concatenate([bp, gp, bep], axis=0))

    # Head: (H, 1) -> (HP, HP), only column 0 valid; bias goes in vec row 0.
    wp = jnp.zeros((HP, HP), jnp.float32).at[:hidden_size, :1].set(w_out)
    bp = jnp.zeros((1, HP), jnp.float32).at[:, :1].set(b_out)
    ws.append(wp)
    vs.append(jnp.concatenate(
        [bp, jnp.ones((1, HP), jnp.float32), jnp.zeros((1, HP), jnp.float32)],
        axis=0))

    w_stack = jnp.stack(ws, axis=0).astype(jnp.bfloat16)    # (n_blocks+1, HP, HP)
    vec_stack = jnp.stack(vs, axis=0).astype(jnp.float32)   # (n_blocks+1, 3, HP)
    return w_stack, vec_stack, HP


def pad_state(state, HP):
    B, D = state.shape
    return jnp.zeros((B, HP), jnp.float32).at[:, :D].set(state.astype(jnp.float32))


def critic_reference(state, layers, w_out, b_out, mirror_kernel=True):
    """Plain-JAX reference.

    mirror_kernel=True mirrors the kernel's math (bf16 MXU matmuls with f32
    accumulation, single-pass BN variance) for a tight comparison.
    mirror_kernel=False is the pure-f32, two-pass PyTorch math.
    """
    h = state.astype(jnp.float32)
    B = state.shape[0]
    inv_b = 1.0 / float(B)

    def dot(a, w):
        if mirror_kernel:
            return jnp.dot(a.astype(jnp.bfloat16), w.astype(jnp.bfloat16),
                           preferred_element_type=jnp.float32)
        return a @ w

    for (w, b, g, be) in layers:
        z = dot(h, w) + b
        z = jnp.maximum(z, 0.0)
        if mirror_kernel:
            mean = jnp.sum(z, axis=0, keepdims=True) * inv_b
            ex2 = jnp.sum(z * z, axis=0, keepdims=True) * inv_b
            var = ex2 - mean * mean
            scale = jax.lax.rsqrt(var + EPS) * g
            h = z * scale + (be - mean * scale)
        else:
            mean = jnp.mean(z, axis=0, keepdims=True)
            c = z - mean
            var = jnp.mean(c * c, axis=0, keepdims=True)
            h = c * (jax.lax.rsqrt(var + EPS) * g) + be
    return dot(h, w_out) + b_out


if __name__ == "__main__":
    # BN needs the full batch in one kernel call; 128 rows also fill MXU rows.
    batch = 128
    state_dim = 32
    hidden_size = 150      # hyper_ps['c_hidden_size'] -- kept exact, zero-padded
    hidden_layers = 3      # hyper_ps['c_hidden_layers']

    key = jax.random.PRNGKey(0)
    k_params, k_state = jax.random.split(key)

    layers, w_out, b_out = init_critic_params(
        k_params, state_dim, hidden_size, hidden_layers)
    w_stack, vec_stack, HP = prepare_kernel_params(
        layers, w_out, b_out, state_dim, hidden_size)

    state = jax.random.normal(k_state, (batch, state_dim), jnp.float32)
    state_p = pad_state(state, HP)

    out_padded = critic_forward(state_p, w_stack, vec_stack)
    out_padded = jax.block_until_ready(out_padded)
    assert out_padded.shape == (batch, HP)

    # Pad lanes of the head output must stay (essentially) zero.
    assert float(jnp.max(jnp.abs(out_padded[:, 1:]))) <= 1e-6

    value = out_padded[:, :1]   # consumers read column 0 of the padded slab

    # Tight check against a reference that mirrors the kernel's math.
    ref_mirror = critic_reference(state, layers, w_out, b_out, mirror_kernel=True)
    max_diff = float(jnp.max(jnp.abs(value - ref_mirror)))
    assert jnp.allclose(value, ref_mirror, atol=2e-3, rtol=2e-3), max_diff

    # Informational: deviation from the pure-f32, two-pass PyTorch math
    # (bf16 matmuls + single-pass variance loosen this, as expected).
    ref_f32 = critic_reference(state, layers, w_out, b_out, mirror_kernel=False)
    _max_f32_diff = float(jnp.max(jnp.abs(value - ref_f32)))

    print("KERNEL_OK")
</pallas_src>

<mosaic_0001>
module attributes {stable_mosaic.version = 11 : i64} {
  func.func @_critic_kernel(%arg0: memref<128x256xf32, #tpu.memory_space<vmem>>, %arg1: memref<5x256x256xbf16, #tpu.memory_space<vmem>>, %arg2: memref<5x3x256xf32, #tpu.memory_space<vmem>>, %arg3: memref<128x256xf32, #tpu.memory_space<vmem>>) attributes {dimension_semantics = [], scalar_prefetch = 0 : i64, scratch_operands = 0 : i64, tpu.core_type = #tpu.core_type<tc>} {
    %c0 = arith.constant 0 : index
    %c0_0 = arith.constant 0 : index
    %0 = vector.load %arg0[%c0, %c0_0] : memref<128x256xf32, #tpu.memory_space<vmem>>, vector<128x256xf32>
    %c0_1 = arith.constant 0 : index
    %c0_2 = arith.constant 0 : index
    %c0_3 = arith.constant 0 : index
    %1 = vector.load %arg1[%c0_1, %c0_2, %c0_3] : memref<5x256x256xbf16, #tpu.memory_space<vmem>>, vector<1x256x256xbf16>
    %2 = vector.shape_cast %1 : vector<1x256x256xbf16> to vector<256x256xbf16>
    %c0_4 = arith.constant 0 : index
    %c0_5 = arith.constant 0 : index
    %c0_6 = arith.constant 0 : index
    %3 = vector.load %arg2[%c0_4, %c0_5, %c0_6] : memref<5x3x256xf32, #tpu.memory_space<vmem>>, vector<1x3x256xf32>
    %4 = vector.shape_cast %3 : vector<1x3x256xf32> to vector<3x256xf32>
    %5 = vector.extract_strided_slice %4 {offsets = [0, 0], sizes = [1, 256], strides = [1, 1]} : vector<3x256xf32> to vector<1x256xf32>
    %6 = vector.extract_strided_slice %4 {offsets = [1, 0], sizes = [1, 256], strides = [1, 1]} : vector<3x256xf32> to vector<1x256xf32>
    %7 = vector.extract_strided_slice %4 {offsets = [2, 0], sizes = [1, 256], strides = [1, 1]} : vector<3x256xf32> to vector<1x256xf32>
    %8 = arith.truncf %0 : vector<128x256xf32> to vector<128x256xbf16>
    %cst = arith.constant dense<0.000000e+00> : vector<128x256xf32>
    %9 = tpu.matmul %8, %2, %cst {dimension_numbers = #tpu.dot_dimension_numbers<[1], [0], [0], [1], [0, 0, 1, 1], [], []>} : vector<128x256xbf16>, vector<256x256xbf16>, vector<128x256xf32> -> vector<128x256xf32>
    %10 = vector.broadcast %5 : vector<1x256xf32> to vector<128x256xf32>
    %11 = arith.addf %9, %10 : vector<128x256xf32>
    %cst_7 = arith.constant 0.000000e+00 : f32
    %12 = vector.broadcast %cst_7 : f32 to vector<128x256xf32>
    %13 = arith.maximumf %11, %12 : vector<128x256xf32>
    %cst_8 = arith.constant dense<0.000000e+00> : vector<256xf32>
    %14 = vector.multi_reduction <add>, %13, %cst_8 [0] : vector<128x256xf32> to vector<256xf32>
    %15 = vector.shape_cast %14 : vector<256xf32> to vector<1x256xf32>
    %cst_9 = arith.constant 7.812500e-03 : f32
    %16 = vector.broadcast %cst_9 : f32 to vector<1x256xf32>
    %17 = arith.mulf %15, %16 : vector<1x256xf32>
    %18 = arith.mulf %13, %13 : vector<128x256xf32>
    %cst_10 = arith.constant dense<0.000000e+00> : vector<256xf32>
    %19 = vector.multi_reduction <add>, %18, %cst_10 [0] : vector<128x256xf32> to vector<256xf32>
    %20 = vector.shape_cast %19 : vector<256xf32> to vector<1x256xf32>
    %cst_11 = arith.constant 7.812500e-03 : f32
    %21 = vector.broadcast %cst_11 : f32 to vector<1x256xf32>
    %22 = arith.mulf %20, %21 : vector<1x256xf32>
    %23 = arith.mulf %17, %17 : vector<1x256xf32>
    %24 = arith.subf %22, %23 : vector<1x256xf32>
    %cst_12 = arith.constant 9.99999974E-6 : f32
    %25 = vector.broadcast %cst_12 : f32 to vector<1x256xf32>
    %26 = arith.addf %24, %25 : vector<1x256xf32>
    %27 = math.rsqrt %26 : vector<1x256xf32>
    %28 = arith.mulf %27, %6 : vector<1x256xf32>
    %29 = arith.mulf %17, %28 : vector<1x256xf32>
    %30 = arith.subf %7, %29 : vector<1x256xf32>
    %31 = vector.broadcast %28 : vector<1x256xf32> to vector<128x256xf32>
    %32 = arith.mulf %13, %31 : vector<128x256xf32>
    %33 = vector.broadcast %30 : vector<1x256xf32> to vector<128x256xf32>
    %34 = arith.addf %32, %33 : vector<128x256xf32>
    %c1 = arith.constant 1 : index
    %c0_13 = arith.constant 0 : index
    %c0_14 = arith.constant 0 : index
    %35 = vector.load %arg1[%c1, %c0_13, %c0_14] : memref<5x256x256xbf16, #tpu.memory_space<vmem>>, vector<1x256x256xbf16>
    %36 = vector.shape_cast %35 : vector<1x256x256xbf16> to vector<256x256xbf16>
    %c1_15 = arith.constant 1 : index
    %c0_16 = arith.constant 0 : index
    %c0_17 = arith.constant 0 : index
    %37 = vector.load %arg2[%c1_15, %c0_16, %c0_17] : memref<5x3x256xf32, #tpu.memory_space<vmem>>, vector<1x3x256xf32>
    %38 = vector.shape_cast %37 : vector<1x3x256xf32> to vector<3x256xf32>
    %39 = vector.extract_strided_slice %38 {offsets = [0, 0], sizes = [1, 256], strides = [1, 1]} : vector<3x256xf32> to vector<1x256xf32>
    %40 = vector.extract_strided_slice %38 {offsets = [1, 0], sizes = [1, 256], strides = [1, 1]} : vector<3x256xf32> to vector<1x256xf32>
    %41 = vector.extract_strided_slice %38 {offsets = [2, 0], sizes = [1, 256], strides = [1, 1]} : vector<3x256xf32> to vector<1x256xf32>
    %42 = arith.truncf %34 : vector<128x256xf32> to vector<128x256xbf16>
    %cst_18 = arith.constant dense<0.000000e+00> : vector<128x256xf32>
    %43 = tpu.matmul %42, %36, %cst_18 {dimension_numbers = #tpu.dot_dimension_numbers<[1], [0], [0], [1], [0, 0, 1, 1], [], []>} : vector<128x256xbf16>, vector<256x256xbf16>, vector<128x256xf32> -> vector<128x256xf32>
    %44 = vector.broadcast %39 : vector<1x256xf32> to vector<128x256xf32>
    %45 = arith.addf %43, %44 : vector<128x256xf32>
    %cst_19 = arith.constant 0.000000e+00 : f32
    %46 = vector.broadcast %cst_19 : f32 to vector<128x256xf32>
    %47 = arith.maximumf %45, %46 : vector<128x256xf32>
    %cst_20 = arith.constant dense<0.000000e+00> : vector<256xf32>
    %48 = vector.multi_reduction <add>, %47, %cst_20 [0] : vector<128x256xf32> to vector<256xf32>
    %49 = vector.shape_cast %48 : vector<256xf32> to vector<1x256xf32>
    %cst_21 = arith.constant 7.812500e-03 : f32
    %50 = vector.broadcast %cst_21 : f32 to vector<1x256xf32>
    %51 = arith.mulf %49, %50 : vector<1x256xf32>
    %52 = arith.mulf %47, %47 : vector<128x256xf32>
    %cst_22 = arith.constant dense<0.000000e+00> : vector<256xf32>
    %53 = vector.multi_reduction <add>, %52, %cst_22 [0] : vector<128x256xf32> to vector<256xf32>
    %54 = vector.shape_cast %53 : vector<256xf32> to vector<1x256xf32>
    %cst_23 = arith.constant 7.812500e-03 : f32
    %55 = vector.broadcast %cst_23 : f32 to vector<1x256xf32>
    %56 = arith.mulf %54, %55 : vector<1x256xf32>
    %57 = arith.mulf %51, %51 : vector<1x256xf32>
    %58 = arith.subf %56, %57 : vector<1x256xf32>
    %cst_24 = arith.constant 9.99999974E-6 : f32
    %59 = vector.broadcast %cst_24 : f32 to vector<1x256xf32>
    %60 = arith.addf %58, %59 : vector<1x256xf32>
    %61 = math.rsqrt %60 : vector<1x256xf32>
    %62 = arith.mulf %61, %40 : vector<1x256xf32>
    %63 = arith.mulf %51, %62 : vector<1x256xf32>
    %64 = arith.subf %41, %63 : vector<1x256xf32>
    %65 = vector.broadcast %62 : vector<1x256xf32> to vector<128x256xf32>
    %66 = arith.mulf %47, %65 : vector<128x256xf32>
    %67 = vector.broadcast %64 : vector<1x256xf32> to vector<128x256xf32>
    %68 = arith.addf %66, %67 : vector<128x256xf32>
    %c2 = arith.constant 2 : index
    %c0_25 = arith.constant 0 : index
    %c0_26 = arith.constant 0 : index
    %69 = vector.load %arg1[%c2, %c0_25, %c0_26] : memref<5x256x256xbf16, #tpu.memory_space<vmem>>, vector<1x256x256xbf16>
    %70 = vector.shape_cast %69 : vector<1x256x256xbf16> to vector<256x256xbf16>
    %c2_27 = arith.constant 2 : index
    %c0_28 = arith.constant 0 : index
    %c0_29 = arith.constant 0 : index
    %71 = vector.load %arg2[%c2_27, %c0_28, %c0_29] : memref<5x3x256xf32, #tpu.memory_space<vmem>>, vector<1x3x256xf32>
    %72 = vector.shape_cast %71 : vector<1x3x256xf32> to vector<3x256xf32>
    %73 = vector.extract_strided_slice %72 {offsets = [0, 0], sizes = [1, 256], strides = [1, 1]} : vector<3x256xf32> to vector<1x256xf32>
    %74 = vector.extract_strided_slice %72 {offsets = [1, 0], sizes = [1, 256], strides = [1, 1]} : vector<3x256xf32> to vector<1x256xf32>
    %75 = vector.extract_strided_slice %72 {offsets = [2, 0], sizes = [1, 256], strides = [1, 1]} : vector<3x256xf32> to vector<1x256xf32>
    %76 = arith.truncf %68 : vector<128x256xf32> to vector<128x256xbf16>
    %cst_30 = arith.constant dense<0.000000e+00> : vector<128x256xf32>
    %77 = tpu.matmul %76, %70, %cst_30 {dimension_numbers = #tpu.dot_dimension_numbers<[1], [0], [0], [1], [0, 0, 1, 1], [], []>} : vector<128x256xbf16>, vector<256x256xbf16>, vector<128x256xf32> -> vector<128x256xf32>
    %78 = vector.broadcast %73 : vector<1x256xf32> to vector<128x256xf32>
    %79 = arith.addf %77, %78 : vector<128x256xf32>
    %cst_31 = arith.constant 0.000000e+00 : f32
    %80 = vector.broadcast %cst_31 : f32 to vector<128x256xf32>
    %81 = arith.maximumf %79, %80 : vector<128x256xf32>
    %cst_32 = arith.constant dense<0.000000e+00> : vector<256xf32>
    %82 = vector.multi_reduction <add>, %81, %cst_32 [0] : vector<128x256xf32> to vector<256xf32>
    %83 = vector.shape_cast %82 : vector<256xf32> to vector<1x256xf32>
    %cst_33 = arith.constant 7.812500e-03 : f32
    %84 = vector.broadcast %cst_33 : f32 to vector<1x256xf32>
    %85 = arith.mulf %83, %84 : vector<1x256xf32>
    %86 = arith.mulf %81, %81 : vector<128x256xf32>
    %cst_34 = arith.constant dense<0.000000e+00> : vector<256xf32>
    %87 = vector.multi_reduction <add>, %86, %cst_34 [0] : vector<128x256xf32> to vector<256xf32>
    %88 = vector.shape_cast %87 : vector<256xf32> to vector<1x256xf32>
    %cst_35 = arith.constant 7.812500e-03 : f32
    %89 = vector.broadcast %cst_35 : f32 to vector<1x256xf32>
    %90 = arith.mulf %88, %89 : vector<1x256xf32>
    %91 = arith.mulf %85, %85 : vector<1x256xf32>
    %92 = arith.subf %90, %91 : vector<1x256xf32>
    %cst_36 = arith.constant 9.99999974E-6 : f32
    %93 = vector.broadcast %cst_36 : f32 to vector<1x256xf32>
    %94 = arith.addf %92, %93 : vector<1x256xf32>
    %95 = math.rsqrt %94 : vector<1x256xf32>
    %96 = arith.mulf %95, %74 : vector<1x256xf32>
    %97 = arith.mulf %85, %96 : vector<1x256xf32>
    %98 = arith.subf %75, %97 : vector<1x256xf32>
    %99 = vector.broadcast %96 : vector<1x256xf32> to vector<128x256xf32>
    %100 = arith.mulf %81, %99 : vector<128x256xf32>
    %101 = vector.broadcast %98 : vector<1x256xf32> to vector<128x256xf32>
    %102 = arith.addf %100, %101 : vector<128x256xf32>
    %c3 = arith.constant 3 : index
    %c0_37 = arith.constant 0 : index
    %c0_38 = arith.constant 0 : index
    %103 = vector.load %arg1[%c3, %c0_37, %c0_38] : memref<5x256x256xbf16, #tpu.memory_space<vmem>>, vector<1x256x256xbf16>
    %104 = vector.shape_cast %103 : vector<1x256x256xbf16> to vector<256x256xbf16>
    %c3_39 = arith.constant 3 : index
    %c0_40 = arith.constant 0 : index
    %c0_41 = arith.constant 0 : index
    %105 = vector.load %arg2[%c3_39, %c0_40, %c0_41] : memref<5x3x256xf32, #tpu.memory_space<vmem>>, vector<1x3x256xf32>
    %106 = vector.shape_cast %105 : vector<1x3x256xf32> to vector<3x256xf32>
    %107 = vector.extract_strided_slice %106 {offsets = [0, 0], sizes = [1, 256], strides = [1, 1]} : vector<3x256xf32> to vector<1x256xf32>
    %108 = vector.extract_strided_slice %106 {offsets = [1, 0], sizes = [1, 256], strides = [1, 1]} : vector<3x256xf32> to vector<1x256xf32>
    %109 = vector.extract_strided_slice %106 {offsets = [2, 0], sizes = [1, 256], strides = [1, 1]} : vector<3x256xf32> to vector<1x256xf32>
    %110 = arith.truncf %102 : vector<128x256xf32> to vector<128x256xbf16>
    %cst_42 = arith.constant dense<0.000000e+00> : vector<128x256xf32>
    %111 = tpu.matmul %110, %104, %cst_42 {dimension_numbers = #tpu.dot_dimension_numbers<[1], [0], [0], [1], [0, 0, 1, 1], [], []>} : vector<128x256xbf16>, vector<256x256xbf16>, vector<128x256xf32> -> vector<128x256xf32>
    %112 = vector.broadcast %107 : vector<1x256xf32> to vector<128x256xf32>
    %113 = arith.addf %111, %112 : vector<128x256xf32>
    %cst_43 = arith.constant 0.000000e+00 : f32
    %114 = vector.broadcast %cst_43 : f32 to vector<128x256xf32>
    %115 = arith.maximumf %113, %114 : vector<128x256xf32>
    %cst_44 = arith.constant dense<0.000000e+00> : vector<256xf32>
    %116 = vector.multi_reduction <add>, %115, %cst_44 [0] : vector<128x256xf32> to vector<256xf32>
    %117 = vector.shape_cast %116 : vector<256xf32> to vector<1x256xf32>
    %cst_45 = arith.constant 7.812500e-03 : f32
    %118 = vector.broadcast %cst_45 : f32 to vector<1x256xf32>
    %119 = arith.mulf %117, %118 : vector<1x256xf32>
    %120 = arith.mulf %115, %115 : vector<128x256xf32>
    %cst_46 = arith.constant dense<0.000000e+00> : vector<256xf32>
    %121 = vector.multi_reduction <add>, %120, %cst_46 [0] : vector<128x256xf32> to vector<256xf32>
    %122 = vector.shape_cast %121 : vector<256xf32> to vector<1x256xf32>
    %cst_47 = arith.constant 7.812500e-03 : f32
    %123 = vector.broadcast %cst_47 : f32 to vector<1x256xf32>
    %124 = arith.mulf %122, %123 : vector<1x256xf32>
    %125 = arith.mulf %119, %119 : vector<1x256xf32>
    %126 = arith.subf %124, %125 : vector<1x256xf32>
    %cst_48 = arith.constant 9.99999974E-6 : f32
    %127 = vector.broadcast %cst_48 : f32 to vector<1x256xf32>
    %128 = arith.addf %126, %127 : vector<1x256xf32>
    %129 = math.rsqrt %128 : vector<1x256xf32>
    %130 = arith.mulf %129, %108 : vector<1x256xf32>
    %131 = arith.mulf %119, %130 : vector<1x256xf32>
    %132 = arith.subf %109, %131 : vector<1x256xf32>
    %133 = vector.broadcast %130 : vector<1x256xf32> to vector<128x256xf32>
    %134 = arith.mulf %115, %133 : vector<128x256xf32>
    %135 = vector.broadcast %132 : vector<1x256xf32> to vector<128x256xf32>
    %136 = arith.addf %134, %135 : vector<128x256xf32>
    %c4 = arith.constant 4 : index
    %c0_49 = arith.constant 0 : index
    %c0_50 = arith.constant 0 : index
    %137 = vector.load %arg2[%c4, %c0_49, %c0_50] : memref<5x3x256xf32, #tpu.memory_space<vmem>>, vector<1x3x256xf32>
    %138 = vector.shape_cast %137 : vector<1x3x256xf32> to vector<3x256xf32>
    %139 = vector.extract_strided_slice %138 {offsets = [0, 0], sizes = [1, 256], strides = [1, 1]} : vector<3x256xf32> to vector<1x256xf32>
    %140 = arith.truncf %136 : vector<128x256xf32> to vector<128x256xbf16>
    %c4_51 = arith.constant 4 : index
    %c0_52 = arith.constant 0 : index
    %c0_53 = arith.constant 0 : index
    %141 = vector.load %arg1[%c4_51, %c0_52, %c0_53] : memref<5x256x256xbf16, #tpu.memory_space<vmem>>, vector<1x256x256xbf16>
    %142 = vector.shape_cast %141 : vector<1x256x256xbf16> to vector<256x256xbf16>
    %cst_54 = arith.constant dense<0.000000e+00> : vector<128x256xf32>
    %143 = tpu.matmul %140, %142, %cst_54 {dimension_numbers = #tpu.dot_dimension_numbers<[1], [0], [0], [1], [0, 0, 1, 1], [], []>} : vector<128x256xbf16>, vector<256x256xbf16>, vector<128x256xf32> -> vector<128x256xf32>
    %144 = vector.broadcast %139 : vector<1x256xf32> to vector<128x256xf32>
    %145 = arith.addf %143, %144 : vector<128x256xf32>
    %c0_55 = arith.constant 0 : index
    %c0_56 = arith.constant 0 : index
    %146 = vector.load %arg3[%c0_55, %c0_56] : memref<128x256xf32, #tpu.memory_space<vmem>>, vector<128x256xf32>
    tpu.vector_store %arg3[%c0_55, %c0_56], %145 {strides = array<i32>} : memref<128x256xf32, #tpu.memory_space<vmem>>, vector<128x256xf32>,
    return
  }
}

</mosaic_0001>

<bundles_post_ra>
// kernel: tpu_custom_call.1
= control target key start
LH: loop header
LB: loop body
LE: loop exit
PB: predicated region body
PF: predicated region fallthrough
CT: control target
= control target key end

     0   :  { %8 = vsyncpa [#allocation3], 0  ;;  %s6158_s0 = inlined_call_operand.hbm [shape: f32[128,256], index: 0, kind: input, shape index: {}]   ;;  %s6159_s1 = inlined_call_operand.hbm [shape: bf16[5,256,256], index: 1, kind: input, shape index: {}]   ;;  %s6160_s2 = inlined_call_operand.hbm [shape: f32[5,3,256], index: 2, kind: input, shape index: {}]   ;;  %s6161_s3 = inlined_call_operand.hbm [shape: f32[128,256], index: 3, kind: output, shape index: {}]  }
   0x1   :  { %9 = vsyncpa [#allocation6], 0  ;;  %s28_s14 = sshll.u32 %s6159_s1, 4  ;;  %s29_s14 = int_to_ptr.hbm [resolvable:$true] %s28_s14 }
   0x2   :  { %10 = vsyncpa [#allocation4], 0  ;;  %s4205_s15 = smov [#allocation5]   ;;  %s15_s19 = sshll.u32 %s6158_s0, 4  ;;  %s16_s19 = int_to_ptr.hbm [resolvable:$true] %s15_s19 }
   0x3   :  { %s30_s16 = sshll.u32 %s4205_s15, 4  ;;  %s4206_s20 = smov 128   ;;  %s31_s16 = int_to_ptr.vmem [resolvable:$true] %s30_s16 }
   0x4   :  { %s4207_s21 = smov 8   ;;  %s4208_s22 = smov [#allocation2]  }
   0x5   :  { %36 = dma.hbm_to_vmem [thread:$0]  %s29_s14, 20480, %s31_s16, [#allocation6], %s4206_s20, %s4206_s20, %s4207_s21  }
   0x6   :  { %s17_s23 = sshll.u32 %s4208_s22, 4  ;;  %s4209_s24 = smov 256   ;;  %s18_s23 = int_to_ptr.vmem [resolvable:$true] %s17_s23 }
   0x7   :  { %s4210_s25 = smov 16   ;;  %s41_s27 = sshll.u32 %s6160_s2, 4  ;;  %s42_s27 = int_to_ptr.hbm [resolvable:$true] %s41_s27 }
   0x8   :  { %23 = dma.hbm_to_vmem [thread:$0]  %s16_s19, 4096, %s18_s23, [#allocation3], %s4209_s24, %s4209_s24, %s4210_s25  }
   0x9   :  { %s4211_s28 = smov [#allocation7]  }
   0xa   :  { %s43_s0 = sshll.u32 %s4211_s28, 4  ;;  %s44_s0 = int_to_ptr.vmem [resolvable:$true] %s43_s0 }
   0xb   :  { %49 = dma.hbm_to_vmem [thread:$0]  %s42_s27, 640, %s44_s0, [#allocation6], %s4206_s20, %s4206_s20, %s4207_s21  }
   0xc   :  { %4199 = dma.done.wait [#allocation3], 4096  }
   0xd   :  { %4200 = vsyncadd [#allocation3], 4294963200 }
   0xe   :  { %4201 = dma.done.wait [#allocation6], 21120  }
   0xf   :  { %4202 = vsyncadd [#allocation6], 4294946176  ;;  %v3337_v0 = vld [vmem:[#allocation5 + $0x70] sm:$0xf]  ;;  %v3934_v1 = vld [vmem:[#allocation5 + $0x74] sm:$0xf0] }
  0x10   :  { %v3933_v2 = vld [vmem:[#allocation5 + $0x74] sm:$0xf]  ;;  %v3338_v3 = vor.u32 %v3934_v1, %v3337_v0  ;;  %v3339_v4 = vld [vmem:[#allocation5 + $0x78] sm:$0xf0]  ;;  %v3401_v9 = vld [vmem:[#allocation5 + $0xf0] sm:$0xf] }
  0x11   :  { %v3949_v5 = vld [vmem:[#allocation5 + $0xf4] sm:$0xf]  ;;  %v3403_v6 = vld [vmem:[#allocation5 + $0xf8] sm:$0xf0]  ;;  %v3342_v7 = vor.u32 %v3933_v2, %v3339_v4  ;;  %v3950_v10 = vld [vmem:[#allocation5 + $0xf4] sm:$0xf0] }
  0x12   :  { %v3406_v8 = vor.u32 %v3949_v5, %v3403_v6  ;;  %v3329_v11 = vld [vmem:[#allocation5 + $0x60] sm:$0xf]  ;;  %310 = vmatpush.bf16.msra.mxu0 %v3338_v3  ;;  %v3402_v12 = vor.u32 %v3950_v10, %v3401_v9  ;;  %v3932_v13 = vld [vmem:[#allocation5 + $0x64] sm:$0xf0]  ;;  %v3931_v14 = vld [vmem:[#allocation5 + $0x64] sm:$0xf] }
  0x13   :  { %v3331_v15 = vld [vmem:[#allocation5 + $0x68] sm:$0xf0]  ;;  %408 = vmatpush.bf16.msra.mxu2 %v3342_v7  ;;  %v3330_v16 = vor.u32 %v3932_v13, %v3329_v11  ;;  %v3947_v18 = vld [vmem:[#allocation5 + $0xe4] sm:$0xf]  ;;  %v3393_v20 = vld [vmem:[#allocation5 + $0xe0] sm:$0xf] }
  0x14   :  { %457 = vmatpush.bf16.msra.mxu3 %v3406_v8  ;;  %v3334_v17 = vor.u32 %v3931_v14, %v3331_v15  ;;  %v3395_v19 = vld [vmem:[#allocation5 + $0xe8] sm:$0xf0]  ;;  %359 = vmatpush.bf16.msra.mxu1 %v3402_v12  ;;  %v3948_v22 = vld [vmem:[#allocation5 + $0xe4] sm:$0xf0]  ;;  %v3321_v23 = vld [vmem:[#allocation5 + $0x50] sm:$0xf] }
  0x15   :  { %v3398_v21 = vor.u32 %v3947_v18, %v3395_v19  ;;  %v3930_v24 = vld [vmem:[#allocation5 + $0x54] sm:$0xf0]  ;;  %v3394_v25 = vor.u32 %v3948_v22, %v3393_v20  ;;  %v3929_v26 = vld [vmem:[#allocation5 + $0x54] sm:$0xf]  ;;  %v3323_v27 = vld [vmem:[#allocation5 + $0x58] sm:$0xf0] }
  0x16   :  { %v3945_v28 = vld [vmem:[#allocation5 + $0xd4] sm:$0xf]  ;;  %311 = vmatpush.bf16.msra.mxu0 %v3330_v16  ;;  %v3322_v29 = vor.u32 %v3930_v24, %v3321_v23  ;;  %v3387_v30 = vld [vmem:[#allocation5 + $0xd8] sm:$0xf0]  ;;  %v3385_v31 = vld [vmem:[#allocation5 + $0xd0] sm:$0xf]  ;;  %v3326_v33 = vor.u32 %v3929_v26, %v3323_v27 }
  0x17   :  { %v3946_v32 = vld [vmem:[#allocation5 + $0xd4] sm:$0xf0]  ;;  %409 = vmatpush.bf16.msra.mxu2 %v3334_v17  ;;  %v3390_v34 = vor.u32 %v3945_v28, %v3387_v30  ;;  %v3313_v35 = vld [vmem:[#allocation5 + $0x40] sm:$0xf]  ;;  %v3928_v36 = vld [vmem:[#allocation5 + $0x44] sm:$0xf0] }
  0x18   :  { %458 = vmatpush.bf16.msra.mxu3 %v3398_v21  ;;  %v3927_v37 = vld [vmem:[#allocation5 + $0x44] sm:$0xf]  ;;  %360 = vmatpush.bf16.msra.mxu1 %v3394_v25  ;;  %v3386_v38 = vor.u32 %v3946_v32, %v3385_v31  ;;  %v3315_v39 = vld [vmem:[#allocation5 + $0x48] sm:$0xf0]  ;;  %v3377_v42 = vld [vmem:[#allocation5 + $0xc0] sm:$0xf]  ;;  %v3314_v44 = vor.u32 %v3928_v36, %v3313_v35 }
  0x19   :  { %v3943_v40 = vld [vmem:[#allocation5 + $0xc4] sm:$0xf]  ;;  %v3379_v41 = vld [vmem:[#allocation5 + $0xc8] sm:$0xf0]  ;;  %v3944_v43 = vld [vmem:[#allocation5 + $0xc4] sm:$0xf0]  ;;  %v3318_v45 = vor.u32 %v3927_v37, %v3315_v39 }
  0x1a   :  { %312 = vmatpush.bf16.msra.mxu0 %v3322_v29  ;;  %v3382_v46 = vor.u32 %v3943_v40, %v3379_v41  ;;  %v3305_v47 = vld [vmem:[#allocation5 + $0x30] sm:$0xf]  ;;  %v3926_v48 = vld [vmem:[#allocation5 + $0x34] sm:$0xf0]  ;;  %v3925_v49 = vld [vmem:[#allocation5 + $0x34] sm:$0xf]  ;;  %v3378_v50 = vor.u32 %v3944_v43, %v3377_v42 }
  0x1b   :  { %410 = vmatpush.bf16.msra.mxu2 %v3326_v33  ;;  %v3307_v51 = vld [vmem:[#allocation5 + $0x38] sm:$0xf0]  ;;  %v3941_v52 = vld [vmem:[#allocation5 + $0xb4] sm:$0xf]  ;;  %v3369_v54 = vld [vmem:[#allocation5 + $0xb0] sm:$0xf]  ;;  %v3306_v56 = vor.u32 %v3926_v48, %v3305_v47 }
  0x1c   :  { %459 = vmatpush.bf16.msra.mxu3 %v3390_v34  ;;  %361 = vmatpush.bf16.msra.mxu1 %v3386_v38  ;;  %v3371_v53 = vld [vmem:[#allocation5 + $0xb8] sm:$0xf0]  ;;  %v3942_v55 = vld [vmem:[#allocation5 + $0xb4] sm:$0xf0]  ;;  %v3310_v57 = vor.u32 %v3925_v49, %v3307_v51  ;;  %v3297_v59 = vld [vmem:[#allocation5 + $0x20] sm:$0xf] }
  0x1d   :  { %v3374_v58 = vor.u32 %v3941_v52, %v3371_v53  ;;  %v3924_v60 = vld [vmem:[#allocation5 + $0x24] sm:$0xf0]  ;;  %v3923_v61 = vld [vmem:[#allocation5 + $0x24] sm:$0xf]  ;;  %v3370_v62 = vor.u32 %v3942_v55, %v3369_v54  ;;  %v3299_v63 = vld [vmem:[#allocation5 + $0x28] sm:$0xf0] }
  0x1e   :  { %313 = vmatpush.bf16.msra.mxu0 %v3314_v44  ;;  %v3939_v0 = vld [vmem:[#allocation5 + $0xa4] sm:$0xf]  ;;  %v3363_v1 = vld [vmem:[#allocation5 + $0xa8] sm:$0xf0]  ;;  %v3361_v2 = vld [vmem:[#allocation5 + $0xa0] sm:$0xf]  ;;  %v3298_v4 = vor.u32 %v3924_v60, %v3297_v59  ;;  %v3302_v5 = vor.u32 %v3923_v61, %v3299_v63 }
  0x1f   :  { %411 = vmatpush.bf16.msra.mxu2 %v3318_v45  ;;  %v3940_v3 = vld [vmem:[#allocation5 + $0xa4] sm:$0xf0]  ;;  %v3366_v6 = vor.u32 %v3939_v0, %v3363_v1  ;;  %v3289_v7 = vld [vmem:[#allocation5 + $0x10] sm:$0xf]  ;;  %v3922_v8 = vld [vmem:[#allocation5 + $0x14] sm:$0xf0] }
  0x20   :  { %460 = vmatpush.bf16.msra.mxu3 %v3382_v46  ;;  %362 = vmatpush.bf16.msra.mxu1 %v3378_v50  ;;  %v3921_v9 = vld [vmem:[#allocation5 + $0x14] sm:$0xf]  ;;  %v3362_v10 = vor.u32 %v3940_v3, %v3361_v2  ;;  %v3291_v11 = vld [vmem:[#allocation5 + $0x18] sm:$0xf0]  ;;  %v3353_v14 = vld [vmem:[#allocation5 + $0x90] sm:$0xf]  ;;  %v3290_v16 = vor.u32 %v3922_v8, %v3289_v7 }
  0x21   :  { %v3937_v12 = vld [vmem:[#allocation5 + $0x94] sm:$0xf]  ;;  %v3355_v13 = vld [vmem:[#allocation5 + $0x98] sm:$0xf0]  ;;  %v3938_v15 = vld [vmem:[#allocation5 + $0x94] sm:$0xf0]  ;;  %v3294_v17 = vor.u32 %v3921_v9, %v3291_v11 }
  0x22   :  { %314 = vmatpush.bf16.msra.mxu0 %v3306_v56  ;;  %v3358_v18 = vor.u32 %v3937_v12, %v3355_v13  ;;  %v3281_v19 = vld [vmem:[#allocation5] sm:$0xf]  ;;  %v3920_v20 = vld [vmem:[#allocation5 + $0x4] sm:$0xf0]  ;;  %v3919_v21 = vld [vmem:[#allocation5 + $0x4] sm:$0xf]  ;;  %v3354_v22 = vor.u32 %v3938_v15, %v3353_v14 }
  0x23   :  { %412 = vmatpush.bf16.msra.mxu2 %v3310_v57  ;;  %v3283_v23 = vld [vmem:[#allocation5 + $0x8] sm:$0xf0]  ;;  %v3935_v24 = vld [vmem:[#allocation5 + $0x84] sm:$0xf]  ;;  %v3345_v26 = vld [vmem:[#allocation5 + $0x80] sm:$0xf]  ;;  %v3282_v28 = vor.u32 %v3920_v20, %v3281_v19 }
  0x24   :  { %461 = vmatpush.bf16.msra.mxu3 %v3374_v58  ;;  %363 = vmatpush.bf16.msra.mxu1 %v3370_v62  ;;  %v3347_v25 = vld [vmem:[#allocation5 + $0x88] sm:$0xf0]  ;;  %v3936_v27 = vld [vmem:[#allocation5 + $0x84] sm:$0xf0]  ;;  %v62_v29 = vld [vmem:[#allocation2] sm:$0xff]  ;;  %v3286_v31 = vor.u32 %v3919_v21, %v3283_v23  ;;  %vm695_vm6 = vcmask 1043456  }
  0x25   :  { %v64_v30 = vld [vmem:[#allocation2 + $0x10] sm:$0xff]  ;;  %v3350_v32 = vor.u32 %v3935_v24, %v3347_v25  ;;  %v63_v33 = vld [vmem:[#allocation2 + $0x8] sm:$0xff]  ;;  %v65_v34 = vld [vmem:[#allocation2 + $0x18] sm:$0xff]  ;;  %v3346_v35 = vor.u32 %v3936_v27, %v3345_v26  ;;  %s4212_s2 = smov [#allocation8]   ;;  %s3265_s5 = sshll.u32 %s6161_s3, 4  ;;  %s3266_s5 = int_to_ptr.hbm [resolvable:$true] %s3265_s5 }
  0x26   :  { %315 = vmatpush.bf16.msra.mxu0 %v3298_v4  ;;  %v127_v36 = vpack.c.bf16 %v64_v30, %v62_v29  ;;  %v128_v37 = vpack.c.bf16 %v65_v34, %v63_v33  ;;  %v66_v38 = vld [vmem:[#allocation2 + $0x20] sm:$0xff]  ;;  %v68_v39 = vld [vmem:[#allocation2 + $0x30] sm:$0xff]  ;;  %v67_v40 = vld [vmem:[#allocation2 + $0x28] sm:$0xff]  ;;  %s3263_s29 = sshll.u32 %s4212_s2, 4  ;;  %s3264_s29 = int_to_ptr.vmem [resolvable:$true] %s3263_s29 }
  0x27   :  { %413 = vmatpush.bf16.msra.mxu2 %v3302_v5  ;;  %v69_v41 = vld [vmem:[#allocation2 + $0x38] sm:$0xff]  ;;  %v129_v42 = vpack.c.bf16 %v68_v39, %v66_v38  ;;  %v70_v44 = vld [vmem:[#allocation2 + $0x40] sm:$0xff]  ;;  %v72_v45 = vld [vmem:[#allocation2 + $0x50] sm:$0xff] }
  0x28   :  { %462 = vmatpush.bf16.msra.mxu3 %v3366_v6  ;;  %364 = vmatpush.bf16.msra.mxu1 %v3362_v10  ;;  %v130_v43 = vpack.c.bf16 %v69_v41, %v67_v40  ;;  %v71_v46 = vld [vmem:[#allocation2 + $0x48] sm:$0xff]  ;;  %v73_v47 = vld [vmem:[#allocation2 + $0x58] sm:$0xff]  ;;  %v131_v48 = vpack.c.bf16 %v72_v45, %v70_v44  ;;  %v74_v50 = vld [vmem:[#allocation2 + $0x60] sm:$0xff] }
  0x29   :  { %v132_v49 = vpack.c.bf16 %v73_v47, %v71_v46  ;;  %v76_v51 = vld [vmem:[#allocation2 + $0x70] sm:$0xff]  ;;  %v75_v52 = vld [vmem:[#allocation2 + $0x68] sm:$0xff]  ;;  %v77_v53 = vld [vmem:[#allocation2 + $0x78] sm:$0xff] }
  0x2a   :  { %316 = vmatpush.bf16.msra.mxu0 %v3290_v16  ;;  %v133_v54 = vpack.c.bf16 %v76_v51, %v74_v50  ;;  %v134_v55 = vpack.c.bf16 %v77_v53, %v75_v52  ;;  %v78_v56 = vld [vmem:[#allocation2 + $0x80] sm:$0xff]  ;;  %v80_v57 = vld [vmem:[#allocation2 + $0x90] sm:$0xff]  ;;  %v79_v58 = vld [vmem:[#allocation2 + $0x88] sm:$0xff] }
  0x2b   :  { %414 = vmatpush.bf16.msra.mxu2 %v3294_v17  ;;  %v81_v59 = vld [vmem:[#allocation2 + $0x98] sm:$0xff]  ;;  %v135_v60 = vpack.c.bf16 %v80_v57, %v78_v56  ;;  %v82_v62 = vld [vmem:[#allocation2 + $0xa0] sm:$0xff]  ;;  %v84_v63 = vld [vmem:[#allocation2 + $0xb0] sm:$0xff] }
  0x2c   :  { %463 = vmatpush.bf16.msra.mxu3 %v3358_v18  ;;  %365 = vmatpush.bf16.msra.mxu1 %v3354_v22  ;;  %v136_v61 = vpack.c.bf16 %v81_v59, %v79_v58  ;;  %v83_v0 = vld [vmem:[#allocation2 + $0xa8] sm:$0xff]  ;;  %v85_v1 = vld [vmem:[#allocation2 + $0xb8] sm:$0xff]  ;;  %v137_v2 = vpack.c.bf16 %v84_v63, %v82_v62  ;;  %v86_v4 = vld [vmem:[#allocation2 + $0xc0] sm:$0xff] }
  0x2d   :  { %v138_v3 = vpack.c.bf16 %v85_v1, %v83_v0  ;;  %v88_v5 = vld [vmem:[#allocation2 + $0xd0] sm:$0xff]  ;;  %v87_v6 = vld [vmem:[#allocation2 + $0xc8] sm:$0xff]  ;;  %v89_v7 = vld [vmem:[#allocation2 + $0xd8] sm:$0xff] }
  0x2e   :  { %317 = vmatpush.bf16.msra.mxu0 %v3282_v28  ;;  %v139_v8 = vpack.c.bf16 %v88_v5, %v86_v4  ;;  %v140_v9 = vpack.c.bf16 %v89_v7, %v87_v6  ;;  %v90_v10 = vld [vmem:[#allocation2 + $0xe0] sm:$0xff]  ;;  %v92_v11 = vld [vmem:[#allocation2 + $0xf0] sm:$0xff]  ;;  %v91_v12 = vld [vmem:[#allocation2 + $0xe8] sm:$0xff] }
  0x2f   :  { %415 = vmatpush.bf16.msra.mxu2 %v3286_v31  ;;  %v93_v13 = vld [vmem:[#allocation2 + $0xf8] sm:$0xff]  ;;  %v141_v14 = vpack.c.bf16 %v92_v11, %v90_v10  ;;  %v4245_v16 = vld [vmem:[#allocation7] sm:$0x77]  ;;  %v3965_v53 = vld [vmem:[#allocation5 + $0x174] sm:$0xf] }
  0x30   :  { %464 = vmatpush.bf16.msra.mxu3 %v3350_v32  ;;  %366 = vmatpush.bf16.msra.mxu1 %v3346_v35  ;;  %v142_v15 = vpack.c.bf16 %v93_v13, %v91_v12  ;;  %v144_v17 = vperm.slane %v4245_v16, 0  ;;  %v145_v20 = vperm.slane %v4245_v16, 4  ;;  %v3981_v56 = vld [vmem:[#allocation5 + $0x1f4] sm:$0xf]  ;;  %v3531_v57 = vld [vmem:[#allocation5 + $0x1f8] sm:$0xf0] }
  0x31   :  { %318 = vmatmul.bf16.vlgmr.msra.gmra.mxu0 %v127_v36  ;;  %v3465_v0 = vld [vmem:[#allocation5 + $0x170] sm:$0xf]  ;;  %v3966_v1 = vld [vmem:[#allocation5 + $0x174] sm:$0xf0]  ;;  %v3963_v10 = vld [vmem:[#allocation5 + $0x164] sm:$0xf] }
  0x32   :  { %416 = vmatmul.bf16.vlgmr.msra.gmra.mxu2 %v127_v36  ;;  %v4248_v18 = vperm.slane %v144_v17, 0  ;;  %v4254_v24 = vperm.slane %v145_v20, 0  ;;  %v3982_v4 = vld [vmem:[#allocation5 + $0x1f4] sm:$0xf0]  ;;  %v3459_v11 = vld [vmem:[#allocation5 + $0x168] sm:$0xf0] }
  0x33   :  { %465 = vmatmul.bf16.vlgmr.msra.gmra.mxu3 %v128_v37  ;;  %367 = vmatmul.bf16.vlgmr.msra.gmra.mxu1 %v128_v37  ;;  %v3462_v12 = vor.u32 %v3963_v10, %v3459_v11  ;;  %v3979_v13 = vld [vmem:[#allocation5 + $0x1e4] sm:$0xf] }
  0x41   :  { %323 = vmatmul.bf16.gmra.mxu0 %v129_v42 }
  0x42   :  { %421 = vmatmul.bf16.gmra.mxu2 %v129_v42 }
  0x43   :  { %470 = vmatmul.bf16.gmra.mxu3 %v130_v43  ;;  %372 = vmatmul.bf16.gmra.mxu1 %v130_v43 }
  0x51   :  { %328 = vmatmul.bf16.gmra.mxu0 %v131_v48 }
  0x52   :  { %426 = vmatmul.bf16.gmra.mxu2 %v131_v48 }
  0x53   :  { %475 = vmatmul.bf16.gmra.mxu3 %v132_v49  ;;  %377 = vmatmul.bf16.gmra.mxu1 %v132_v49 }
  0x61   :  { %333 = vmatmul.bf16.gmra.mxu0 %v133_v54 }
  0x62   :  { %431 = vmatmul.bf16.gmra.mxu2 %v133_v54  ;;  %v3467_v54 = vld [vmem:[#allocation5 + $0x178] sm:$0xf0] }
  0x63   :  { %480 = vmatmul.bf16.gmra.mxu3 %v134_v55  ;;  %382 = vmatmul.bf16.gmra.mxu1 %v134_v55  ;;  %v3470_v55 = vor.u32 %v3965_v53, %v3467_v54 }
  0x65   :  { %1089 = vmatpush.bf16.msrb.mxu2 %v3470_v55 }
  0x69   :  { %1090 = vmatpush.bf16.msrb.mxu2 %v3462_v12 }
  0x71   :  { %338 = vmatmul.bf16.gmra.mxu0 %v135_v60 }
  0x72   :  { %436 = vmatmul.bf16.gmra.mxu2 %v135_v60  ;;  %v3534_v60 = vor.u32 %v3981_v56, %v3531_v57 }
  0x73   :  { %485 = vmatmul.bf16.gmra.mxu3 %v136_v61  ;;  %387 = vmatmul.bf16.gmra.mxu1 %v136_v61 }
  0x74   :  { %1138 = vmatpush.bf16.msrb.mxu3 %v3534_v60 }
  0x81   :  { %343 = vmatmul.bf16.gmra.mxu0 %v137_v2 }
  0x82   :  { %441 = vmatmul.bf16.gmra.mxu2 %v137_v2  ;;  %v3466_v2 = vor.u32 %v3966_v1, %v3465_v0  ;;  %v3449_v0 = vld [vmem:[#allocation5 + $0x150] sm:$0xf]  ;;  %v3962_v1 = vld [vmem:[#allocation5 + $0x154] sm:$0xf0] }
  0x83   :  { %490 = vmatmul.bf16.gmra.mxu3 %v138_v3  ;;  %392 = vmatmul.bf16.gmra.mxu1 %v138_v3  ;;  %v3529_v3 = vld [vmem:[#allocation5 + $0x1f0] sm:$0xf] }
  0x84   :  { %v3530_v6 = vor.u32 %v3982_v4, %v3529_v3  ;;  %991 = vmatpush.bf16.msrb.mxu0 %v3466_v2  ;;  %v3450_v3 = vor.u32 %v3962_v1, %v3449_v0  ;;  %v3513_v4 = vld [vmem:[#allocation5 + $0x1d0] sm:$0xf] }
  0x86   :  { %1040 = vmatpush.bf16.msrb.mxu1 %v3530_v6  ;;  %v3978_v6 = vld [vmem:[#allocation5 + $0x1d4] sm:$0xf0] }
  0x87   :  { %v3514_v11 = vor.u32 %v3978_v6, %v3513_v4 }
  0x91   :  { %348 = vmatmul.bf16.gmra.mxu0 %v139_v8 }
  0x92   :  { %446 = vmatmul.bf16.gmra.mxu2 %v139_v8 }
  0x93   :  { %495 = vmatmul.bf16.gmra.mxu3 %v140_v9  ;;  %397 = vmatmul.bf16.gmra.mxu1 %v140_v9 }
  0xa1   :  { %353 = vmatmul.bf16.gmra.mxu0 %v141_v14 }
  0xa2   :  { %451 = vmatmul.bf16.gmra.mxu2 %v141_v14  ;;  %v3523_v14 = vld [vmem:[#allocation5 + $0x1e8] sm:$0xf0] }
  0xa3   :  { %500 = vmatmul.bf16.gmra.mxu3 %v142_v15  ;;  %402 = vmatmul.bf16.gmra.mxu1 %v142_v15  ;;  %v3526_v17 = vor.u32 %v3979_v13, %v3523_v14 }
  0xa5   :  { %1139 = vmatpush.bf16.msrb.mxu3 %v3526_v17 }
  0xae   :  { %v319_v19 = vpop.f32.mrf.mxu0 }
  0xaf   :  { %v320_v21 = vadd.f32 %v319_v19, %v4248_v18 }
  0xb0   :  { %v368_v22 = vpop.f32.mrf.mxu1 }
  0xb1   :  { %v4252_v23 = vadd.f32 %v368_v22, %v320_v21  ;;  %v3457_v22 = vld [vmem:[#allocation5 + $0x160] sm:$0xf] }
  0xb3   :  { %v4340_v12 = vmax.f32 %v4252_v23, 0.0 }
  0xb5   :  { %v417_v25 = vpop.f32.mrf.mxu2 }
  0xb6   :  { %v466_v26 = vpop.f32.mrf.mxu3  ;;  %v418_v27 = vadd.f32 %v417_v25, %v4254_v24  ;;  %v4257_v28 = vpop.f32.mrf.mxu0  ;;  %v3964_v25 = vld [vmem:[#allocation5 + $0x164] sm:$0xf0] }
  0xb7   :  { %v322_v54 = vadd.f32 %v4257_v28, %v4248_v18 }
  0xb8   :  { %v4259_v29 = vadd.f32 %v466_v26, %v418_v27  ;;  %v4261_v30 = vpop.f32.mrf.mxu1  ;;  %v3458_v26 = vor.u32 %v3964_v25, %v3457_v22  ;;  %v3521_v27 = vld [vmem:[#allocation5 + $0x1e0] sm:$0xf] }
  0xb9   :  { %v371_v2 = vadd.f32 %v4261_v30, %v322_v54 }
  0xba   :  { %992 = vmatpush.bf16.msrb.mxu0 %v3458_v26  ;;  %v4356_v23 = vmax.f32 %v4259_v29, 0.0 }
  0xbb   :  { %v4342_v13 = vmax.f32 %v371_v2, 0.0 }
  0xbd   :  { %v4263_v31 = vpop.f32.mrf.mxu2 }
  0xbe   :  { %v4265_v32 = vpop.f32.mrf.mxu3  ;;  %v324_v33 = vpop.f32.mrf.mxu0  ;;  %v420_v55 = vadd.f32 %v4263_v31, %v4254_v24  ;;  %993 = vmatpush.bf16.msrb.mxu0 %v3450_v3 }
  0xbf   :  { %v325_v34 = vadd.f32 %v324_v33, %v4248_v18  ;;  %v3980_v33 = vld [vmem:[#allocation5 + $0x1e4] sm:$0xf0] }
  0xc0   :  { %v373_v35 = vpop.f32.mrf.mxu1  ;;  %v469_v28 = vadd.f32 %v4265_v32, %v420_v55 }
  0xc1   :  { %v4268_v36 = vadd.f32 %v373_v35, %v325_v34  ;;  %v3522_v35 = vor.u32 %v3980_v33, %v3521_v27  ;;  %v3443_v27 = vld [vmem:[#allocation5 + $0x148] sm:$0xf0] }
  0xc2   :  { %v4346_v14 = vmax.f32 %v469_v28, 0.0 }
  0xc3   :  { %1041 = vmatpush.bf16.msrb.mxu1 %v3522_v35  ;;  %v4359_v25 = vmax.f32 %v4268_v36, 0.0 }
  0xc4   :  { %v585_v36 = vmul.f32 %v4346_v14, %v4346_v14  ;;  %v559_v3 = vadd.f32 %v4346_v14, %v4356_v23 }
  0xc5   :  { %v422_v37 = vpop.f32.mrf.mxu2 }
  0xc6   :  { %v471_v38 = vpop.f32.mrf.mxu3  ;;  %v423_v39 = vadd.f32 %v422_v37, %v4254_v24  ;;  %v4271_v40 = vpop.f32.mrf.mxu0 }
  0xc7   :  { %v327_v31 = vadd.f32 %v4271_v40, %v4248_v18  ;;  %1042 = vmatpush.bf16.msrb.mxu1 %v3514_v11  ;;  %v582_v40 = vmul.f32 %v4340_v12, %v4340_v12 }
  0xc8   :  { %v4273_v41 = vadd.f32 %v471_v38, %v423_v39  ;;  %v4275_v42 = vpop.f32.mrf.mxu1 }
  0xc9   :  { %v376_v17 = vadd.f32 %v4275_v42, %v327_v31  ;;  %v584_v42 = vmul.f32 %v4342_v13, %v4342_v13 }
  0xcb   :  { %v614_v0 = vadd.f32 %v584_v42, %v582_v40  ;;  %v3960_v42 = vld [vmem:[#allocation5 + $0x144] sm:$0xf0] }
  0xcd   :  { %v4277_v43 = vpop.f32.mrf.mxu2 }
  0xce   :  { %v4279_v44 = vpop.f32.mrf.mxu3  ;;  %v329_v45 = vpop.f32.mrf.mxu0  ;;  %v425_v30 = vadd.f32 %v4277_v43, %v4254_v24  ;;  %v3959_v43 = vld [vmem:[#allocation5 + $0x144] sm:$0xf] }
  0xcf   :  { %v330_v46 = vadd.f32 %v329_v45, %v4248_v18  ;;  %v3961_v45 = vld [vmem:[#allocation5 + $0x154] sm:$0xf] }
  0xd0   :  { %v378_v47 = vpop.f32.mrf.mxu1  ;;  %v474_v33 = vadd.f32 %v4279_v44, %v425_v30  ;;  %v538_v44 = vadd.f32 %v4342_v13, %v4340_v12 }
  0xd1   :  { %v4282_v48 = vadd.f32 %v378_v47, %v330_v46  ;;  %v3451_v46 = vld [vmem:[#allocation5 + $0x158] sm:$0xf0] }
  0xd2   :  { %v3454_v47 = vor.u32 %v3961_v45, %v3451_v46  ;;  %v3446_v45 = vor.u32 %v3959_v43, %v3443_v27  ;;  %v3975_v46 = vld [vmem:[#allocation5 + $0x1c4] sm:$0xf]  ;;  %v4387_v1 = vmax.f32 %v474_v33, 0.0  ;;  %v539_v4 = vadd.f32 %v538_v44, %v4359_v25  ;;  %v3441_v27 = vld [vmem:[#allocation5 + $0x140] sm:$0xf] }
  0xd3   :  { %v4394_v6 = vmax.f32 %v4282_v48, 0.0 }
  0xd4   :  { %1091 = vmatpush.bf16.msrb.mxu2 %v3454_v47  ;;  %v3507_v47 = vld [vmem:[#allocation5 + $0x1c8] sm:$0xf0] }
  0xd5   :  { %v427_v49 = vpop.f32.mrf.mxu2 }
  0xd6   :  { %v476_v50 = vpop.f32.mrf.mxu3  ;;  %v428_v51 = vadd.f32 %v427_v49, %v4254_v24  ;;  %v4285_v52 = vpop.f32.mrf.mxu0  ;;  %v3977_v49 = vld [vmem:[#allocation5 + $0x1d4] sm:$0xf] }
  0xd7   :  { %v332_v35 = vadd.f32 %v4285_v52, %v4248_v18  ;;  %v586_v52 = vmul.f32 %v4359_v25, %v4359_v25 }
  0xd8   :  { %v4287_v58 = vadd.f32 %v476_v50, %v428_v51  ;;  %v4289_v59 = vpop.f32.mrf.mxu1  ;;  %v3515_v50 = vld [vmem:[#allocation5 + $0x1d8] sm:$0xf0]  ;;  %1092 = vmatpush.bf16.msrb.mxu2 %v3446_v45  ;;  %v3442_v45 = vor.u32 %v3960_v42, %v3441_v27 }
  0xd9   :  { %v3518_v53 = vor.u32 %v3977_v49, %v3515_v50  ;;  %v3510_v49 = vor.u32 %v3975_v46, %v3507_v47  ;;  %v4373_v50 = vmax.f32 %v4273_v41, 0.0  ;;  %v583_v41 = vmul.f32 %v4356_v23, %v4356_v23 }
  0xda   :  { %v381_v2 = vadd.f32 %v4289_v59, %v332_v35  ;;  %v4409_v48 = vmax.f32 %v4287_v58, 0.0  ;;  %v590_v58 = vmul.f32 %v4394_v6, %v4394_v6  ;;  %994 = vmatpush.bf16.msrb.mxu0 %v3442_v45 }
  0xdb   :  { %1140 = vmatpush.bf16.msrb.mxu3 %v3518_v53  ;;  %v4375_v53 = vmax.f32 %v376_v17, 0.0  ;;  %v587_v11 = vmul.f32 %v4373_v50, %v4373_v50  ;;  %v615_v17 = vadd.f32 %v614_v0, %v586_v52  ;;  %v560_v33 = vadd.f32 %v559_v3, %v4373_v50 }
  0xdc   :  { %v4416_v35 = vmax.f32 %v381_v2, 0.0 }
  0xdd   :  { %v4291_v61 = vpop.f32.mrf.mxu2  ;;  %v588_v28 = vmul.f32 %v4375_v53, %v4375_v53  ;;  %v540_v46 = vadd.f32 %v539_v4, %v4375_v53 }
  0xde   :  { %v4293_v62 = vpop.f32.mrf.mxu3  ;;  %v4295_v63 = vpop.f32.mrf.mxu0  ;;  %v430_v54 = vadd.f32 %v4291_v61, %v4254_v24  ;;  %v592_v2 = vmul.f32 %v4416_v35, %v4416_v35 }
  0xdf   :  { %v335_v55 = vadd.f32 %v4295_v63, %v4248_v18  ;;  %1141 = vmatpush.bf16.msrb.mxu3 %v3510_v49  ;;  %v635_v63 = vadd.f32 %v585_v36, %v583_v41  ;;  %v616_v36 = vadd.f32 %v615_v17, %v588_v28 }
  0xe0   :  { %v4297_v5 = vpop.f32.mrf.mxu1 }
  0xe1   :  { %v384_v40 = vadd.f32 %v4297_v5, %v335_v55  ;;  %v636_v49 = vadd.f32 %v635_v63, %v587_v11  ;;  %v591_v55 = vmul.f32 %v4409_v48, %v4409_v48 }
  0xe5   :  { %v4299_v7 = vpop.f32.mrf.mxu2 }
  0xe6   :  { %v4301_v8 = vpop.f32.mrf.mxu3  ;;  %v4303_v9 = vpop.f32.mrf.mxu0  ;;  %v433_v61 = vadd.f32 %v4299_v7, %v4254_v24  ;;  %v479_v7 = vadd.f32 %v4293_v62, %v430_v54  ;;  %v561_v54 = vadd.f32 %v560_v33, %v4387_v1 }
  0xe7   :  { %v337_v59 = vadd.f32 %v4303_v9, %v4248_v18  ;;  %v589_v9 = vmul.f32 %v4387_v1, %v4387_v1 }
  0xe8   :  { %v4305_v15 = vpop.f32.mrf.mxu1  ;;  %v482_v62 = vadd.f32 %v4301_v8, %v433_v61  ;;  %v4430_v41 = vmax.f32 %v479_v7, 0.0  ;;  %v4432_v8 = vmax.f32 %v384_v40, 0.0  ;;  %v562_v63 = vadd.f32 %v561_v54, %v4409_v48 }
  0xe9   :  { %v386_v44 = vadd.f32 %v4305_v15, %v337_v59  ;;  %v637_v0 = vadd.f32 %v636_v49, %v589_v9 }
  0xea   :  { %v4439_v3 = vmax.f32 %v482_v62, 0.0  ;;  %v563_v33 = vadd.f32 %v562_v63, %v4430_v41 }
  0xeb   :  { %v4445_v11 = vmax.f32 %v386_v44, 0.0 }
  0xec   :  { %v595_v45 = vmul.f32 %v4439_v3, %v4439_v3 }
  0xed   :  { %v4307_v19 = vpop.f32.mrf.mxu2 }
  0xee   :  { %v4309_v20 = vpop.f32.mrf.mxu3  ;;  %v4311_v21 = vpop.f32.mrf.mxu0  ;;  %v435_v52 = vadd.f32 %v4307_v19, %v4254_v24  ;;  %v617_v19 = vadd.f32 %v616_v36, %v590_v58 }
  0xef   :  { %v340_v5 = vadd.f32 %v4311_v21, %v4248_v18  ;;  %v541_v21 = vadd.f32 %v540_v46, %v4394_v6 }
  0xf0   :  { %v4313_v34 = vpop.f32.mrf.mxu1  ;;  %v484_v28 = vadd.f32 %v4309_v20, %v435_v52  ;;  %v618_v42 = vadd.f32 %v617_v19, %v592_v2  ;;  %v564_v52 = vadd.f32 %v563_v33, %v4439_v3 }
  0xf1   :  { %v389_v4 = vadd.f32 %v4313_v34, %v340_v5  ;;  %v542_v40 = vadd.f32 %v541_v21, %v4416_v35  ;;  %v593_v34 = vmul.f32 %v4430_v41, %v4430_v41  ;;  %v596_v5 = vmul.f32 %v4445_v11, %v4445_v11 }
  0xf2   :  { %v4469_v49 = vmax.f32 %v484_v28, 0.0 }
  0xf3   :  { %v543_v9 = vadd.f32 %v542_v40, %v4432_v8  ;;  %v4464_v46 = vmax.f32 %v389_v4, 0.0 }
  0xf5   :  { %v4315_v37 = vpop.f32.mrf.mxu2 }
  0xf6   :  { %v4317_v38 = vpop.f32.mrf.mxu3  ;;  %v4319_v39 = vpop.f32.mrf.mxu0  ;;  %v438_v61 = vadd.f32 %v4315_v37, %v4254_v24  ;;  %v594_v37 = vmul.f32 %v4432_v8, %v4432_v8 }
  0xf7   :  { %v342_v15 = vadd.f32 %v4319_v39, %v4248_v18  ;;  %v638_v39 = vadd.f32 %v637_v0, %v591_v55  ;;  %v544_v55 = vadd.f32 %v543_v9, %v4445_v11 }
  0xf8   :  { %v4321_v51 = vpop.f32.mrf.mxu1  ;;  %v487_v58 = vadd.f32 %v4317_v38, %v438_v61  ;;  %v619_v44 = vadd.f32 %v618_v42, %v594_v37 }
  0xf9   :  { %v391_v20 = vadd.f32 %v4321_v51, %v342_v15 }
  0xfa   :  { %v620_v19 = vadd.f32 %v619_v44, %v596_v5 }
  0xfb   :  { %v4477_v38 = vmax.f32 %v391_v20, 0.0 }
  0xfd   :  { %v4327_v56 = vpop.f32.mrf.mxu2 }
  0xfe   :  { %v4329_v57 = vpop.f32.mrf.mxu3  ;;  %v4331_v60 = vpop.f32.mrf.mxu0  ;;  %v440_v54 = vadd.f32 %v4327_v56, %v4254_v24  ;;  %v565_v56 = vadd.f32 %v564_v52, %v4469_v49 }
  0xff   :  { %v345_v59 = vadd.f32 %v4331_v60, %v4248_v18 }
 0x100   :  { %v4334_v10 = vpop.f32.mrf.mxu1 }
 0x101   :  { %v394_v51 = vadd.f32 %v4334_v10, %v345_v59  ;;  %v598_v10 = vmul.f32 %v4464_v46, %v4464_v46  ;;  %v545_v59 = vadd.f32 %v544_v55, %v4464_v46 }
 0x103   :  { %v4488_v4 = vmax.f32 %v394_v51, 0.0  ;;  %v621_v42 = vadd.f32 %v620_v19, %v598_v10 }
 0x105   :  { %v4349_v22 = vpop.f32.mrf.mxu2  ;;  %v602_v9 = vmul.f32 %v4488_v4, %v4488_v4 }
 0x106   :  { %v4351_v32 = vpop.f32.mrf.mxu3  ;;  %v4361_v26 = vpop.f32.mrf.mxu0  ;;  %v443_v15 = vadd.f32 %v4349_v22, %v4254_v24  ;;  %v600_v22 = vmul.f32 %v4477_v38, %v4477_v38 }
 0x107   :  { %v347_v60 = vadd.f32 %v4361_v26, %v4248_v18  ;;  %v639_v26 = vadd.f32 %v638_v39, %v593_v34  ;;  %v489_v39 = vadd.f32 %v4329_v57, %v440_v54 }
 0x108   :  { %v4368_v29 = vpop.f32.mrf.mxu1  ;;  %v492_v20 = vadd.f32 %v4351_v32, %v443_v15 }
 0x109   :  { %v396_v0 = vadd.f32 %v4368_v29, %v347_v60  ;;  %v640_v2 = vadd.f32 %v639_v26, %v595_v45  ;;  %v597_v29 = vmul.f32 %v4469_v49, %v4469_v49  ;;  %v4510_v5 = vmax.f32 %v489_v39, 0.0 }
 0x10a   :  { %v622_v26 = vadd.f32 %v621_v42, %v600_v22  ;;  %v4520_v55 = vmax.f32 %v492_v20, 0.0 }
 0x10b   :  { %v4498_v37 = vmax.f32 %v396_v0, 0.0 }
 0x10d   :  { %v4404_v31 = vpop.f32.mrf.mxu2 }
 0x10e   :  { %v4406_v30 = vpop.f32.mrf.mxu3  ;;  %v349_v43 = vpop.f32.mrf.mxu0  ;;  %v445_v40 = vadd.f32 %v4404_v31, %v4254_v24  ;;  %v546_v31 = vadd.f32 %v545_v59, %v4477_v38 }
 0x10f   :  { %v350_v36 = vadd.f32 %v349_v43, %v4248_v18  ;;  %v4483_v43 = vmax.f32 %v487_v58, 0.0 }
 0x110   :  { %v398_v47 = vpop.f32.mrf.mxu1  ;;  %v494_v51 = vadd.f32 %v4406_v30, %v445_v40  ;;  %v547_v32 = vadd.f32 %v546_v31, %v4488_v4 }
 0x111   :  { %v399_v61 = vadd.f32 %v398_v47, %v350_v36  ;;  %v599_v33 = vmul.f32 %v4483_v43, %v4483_v43  ;;  %v566_v52 = vadd.f32 %v565_v56, %v4483_v43 }
 0x112   :  { %v548_v30 = vadd.f32 %v547_v32, %v4498_v37 }
 0x113   :  { %v4508_v45 = vmax.f32 %v399_v61, 0.0  ;;  %v601_v61 = vmul.f32 %v4510_v5, %v4510_v5  ;;  %v567_v22 = vadd.f32 %v566_v52, %v4510_v5 }
 0x115   :  { %v447_v17 = vpop.f32.mrf.mxu2  ;;  %v549_v39 = vadd.f32 %v548_v30, %v4508_v45 }
 0x116   :  { %v4450_v7 = vpop.f32.mrf.mxu3  ;;  %v351_v27 = vpop.f32.mrf.mxu0  ;;  %v448_v57 = vadd.f32 %v447_v17, %v4254_v24  ;;  %v604_v17 = vmul.f32 %v4498_v37, %v4498_v37 }
 0x117   :  { %v352_v21 = vadd.f32 %v351_v27, %v4248_v18 }
 0x118   :  { %v400_v62 = vpop.f32.mrf.mxu1  ;;  %v497_v0 = vadd.f32 %v4450_v7, %v448_v57 }
 0x119   :  { %v401_v27 = vadd.f32 %v400_v62, %v352_v21  ;;  %v641_v62 = vadd.f32 %v640_v2, %v597_v29  ;;  %v623_v21 = vadd.f32 %v622_v26, %v602_v9  ;;  %v606_v2 = vmul.f32 %v4508_v45, %v4508_v45 }
 0x11a   :  { %v568_v9 = vadd.f32 %v567_v22, %v4520_v55 }
 0x11b   :  { %v4517_v44 = vmax.f32 %v401_v27, 0.0  ;;  %v642_v54 = vadd.f32 %v641_v62, %v599_v33  ;;  %v624_v7 = vadd.f32 %v623_v21, %v604_v17  ;;  %v603_v27 = vmul.f32 %v4520_v55, %v4520_v55 }
 0x11d   :  { %v449_v63 = vpop.f32.mrf.mxu2  ;;  %v608_v40 = vmul.f32 %v4517_v44, %v4517_v44  ;;  %v625_v33 = vadd.f32 %v624_v7, %v606_v2  ;;  %v550_v20 = vadd.f32 %v549_v39, %v4517_v44  ;;  %v643_v31 = vadd.f32 %v642_v54, %v601_v61 }
 0x11e   :  { %v498_v28 = vpop.f32.mrf.mxu3  ;;  %v354_v34 = vpop.f32.mrf.mxu0  ;;  %v450_v36 = vadd.f32 %v449_v63, %v4254_v24  ;;  %v4530_v63 = vmax.f32 %v494_v51, 0.0 }
 0x11f   :  { %v355_v47 = vadd.f32 %v354_v34, %v4248_v18  ;;  %v626_v62 = vadd.f32 %v625_v33, %v608_v40  ;;  %v644_v26 = vadd.f32 %v643_v31, %v603_v27 }
 0x120   :  { %v403_v60 = vpop.f32.mrf.mxu1  ;;  %v499_v56 = vadd.f32 %v498_v28, %v450_v36  ;;  %v569_v32 = vadd.f32 %v568_v9, %v4530_v63 }
 0x121   :  { %v404_v58 = vadd.f32 %v403_v60, %v355_v47  ;;  %v4540_v47 = vmax.f32 %v497_v0, 0.0 }
 0x123   :  { %v4526_v10 = vmax.f32 %v404_v58, 0.0  ;;  %v4548_v58 = vmax.f32 %v499_v56, 0.0  ;;  %v607_v17 = vmul.f32 %v4540_v47, %v4540_v47 }
 0x125   :  { %v452_v15 = vpop.f32.mrf.mxu2  ;;  %v610_v57 = vmul.f32 %v4526_v10, %v4526_v10  ;;  %v551_v51 = vadd.f32 %v550_v20, %v4526_v10 }
 0x126   :  { %v501_v19 = vpop.f32.mrf.mxu3  ;;  %v453_v29 = vadd.f32 %v452_v15, %v4254_v24  ;;  %v356_v59 = vpop.f32.mrf.mxu0  ;;  %v570_v15 = vadd.f32 %v569_v32, %v4540_v47 }
 0x127   :  { %v357_v34 = vadd.f32 %v356_v59, %v4248_v18  ;;  %v605_v18 = vmul.f32 %v4530_v63, %v4530_v63  ;;  %v627_v54 = vadd.f32 %v626_v62, %v610_v57 }
 0x128   :  { %v502_v42 = vadd.f32 %v501_v19, %v453_v29  ;;  %v405_v28 = vpop.f32.mrf.mxu1  ;;  %v609_v19 = vmul.f32 %v4548_v58, %v4548_v58  ;;  %v571_v39 = vadd.f32 %v570_v15, %v4548_v58 }
 0x129   :  { %v406_v60 = vadd.f32 %v405_v28, %v357_v34  ;;  %v645_v2 = vadd.f32 %v644_v26, %v605_v18 }
 0x12a   :  { %v4556_v52 = vmax.f32 %v502_v42, 0.0 }
 0x12b   :  { %v4551_v36 = vmax.f32 %v406_v60, 0.0  ;;  %v646_v7 = vadd.f32 %v645_v2, %v607_v17  ;;  %v3976_v2 = vld [vmem:[#allocation5 + $0x1c4] sm:$0xf0] }
 0x12c   :  { %v611_v40 = vmul.f32 %v4556_v52, %v4556_v52  ;;  %v572_v28 = vadd.f32 %v571_v39, %v4556_v52 }
 0x12d   :  { %v552_v0 = vadd.f32 %v551_v51, %v4551_v36  ;;  %v612_v21 = vmul.f32 %v4551_v36, %v4551_v36  ;;  %v454_v30 = vpop.f32.mrf.mxu2  ;;  %v647_v42 = vadd.f32 %v646_v7, %v609_v19 }
 0x12e   :  { %v455_v61 = vadd.f32 %v454_v30, %v4254_v24  ;;  %v503_v59 = vpop.f32.mrf.mxu3  ;;  %v3505_v30 = vld [vmem:[#allocation5 + $0x1c0] sm:$0xf] }
 0x12f   :  { %v553_v56 = vrot.slane %v552_v0, 4  ;;  %v628_v29 = vadd.f32 %v627_v54, %v612_v21  ;;  %v648_v24 = vadd.f32 %v647_v42, %v611_v40  ;;  %v3506_v15 = vor.u32 %v3976_v2, %v3505_v30 }
 0x130   :  { %v504_v34 = vadd.f32 %v503_v59, %v455_v61 }
 0x131   :  { %v554_v22 = vadd.f32 %v553_v56, %v552_v0  ;;  %v629_v27 = vrot.slane %v628_v29, 4  ;;  %1043 = vmatpush.bf16.msrb.mxu1 %v3506_v15 }
 0x132   :  { %v4569_v33 = vmax.f32 %v504_v34, 0.0  ;;  %v3957_v34 = vld [vmem:[#allocation5 + $0x134] sm:$0xf] }
 0x133   :  { %v555_v20 = vrot.slane %v554_v22, 2  ;;  %v630_v57 = vadd.f32 %v629_v27, %v628_v29 }
 0x134   :  { %v573_v60 = vadd.f32 %v572_v28, %v4569_v33  ;;  %v613_v31 = vmul.f32 %v4569_v33, %v4569_v33 }
 0x135   :  { %v556_v9 = vadd.f32 %v555_v20, %v554_v22  ;;  %v631_v18 = vrot.slane %v630_v57, 2  ;;  %v3435_v22 = vld [vmem:[#allocation5 + $0x138] sm:$0xf0]  ;;  %v3973_v20 = vld [vmem:[#allocation5 + $0x1b4] sm:$0xf] }
 0x136   :  { %v574_v62 = vrot.slane %v573_v60, 4  ;;  %v649_v51 = vadd.f32 %v648_v24, %v613_v31  ;;  %v3438_v28 = vor.u32 %v3957_v34, %v3435_v22  ;;  %v3433_v31 = vld [vmem:[#allocation5 + $0x130] sm:$0xf] }
 0x137   :  { %v557_v26 = vrot.slane %v556_v9, 1  ;;  %v632_v32 = vadd.f32 %v631_v18, %v630_v57  ;;  %v3499_v57 = vld [vmem:[#allocation5 + $0x1b8] sm:$0xf0]  ;;  %v3497_v18 = vld [vmem:[#allocation5 + $0x1b0] sm:$0xf] }
 0x138   :  { %v575_v17 = vadd.f32 %v574_v62, %v573_v60  ;;  %v650_v54 = vrot.slane %v649_v51, 4  ;;  %v3502_v60 = vor.u32 %v3973_v20, %v3499_v57  ;;  %1093 = vmatpush.bf16.msrb.mxu2 %v3438_v28  ;;  %v3953_v28 = vld [vmem:[#allocation5 + $0x114] sm:$0xf]  ;;  %v3419_v20 = vld [vmem:[#allocation5 + $0x118] sm:$0xf0] }
 0x139   :  { %v558_v0 = vadd.f32 %v557_v26, %v556_v9  ;;  %v633_v21 = vrot.slane %v632_v32, 1  ;;  %v3958_v9 = vld [vmem:[#allocation5 + $0x134] sm:$0xf0]  ;;  %v3969_v57 = vld [vmem:[#allocation5 + $0x194] sm:$0xf] }
 0x13a   :  { %v576_v19 = vrot.slane %v575_v17, 2  ;;  %v651_v61 = vadd.f32 %v650_v54, %v649_v51  ;;  %v3434_v26 = vor.u32 %v3958_v9, %v3433_v31  ;;  %1142 = vmatpush.bf16.msrb.mxu3 %v3502_v60  ;;  %v3422_v60 = vor.u32 %v3953_v28, %v3419_v20  ;;  %v3483_v31 = vld [vmem:[#allocation5 + $0x198] sm:$0xf0]  ;;  %v3417_v9 = vld [vmem:[#allocation5 + $0x110] sm:$0xf] }
 0x13b   :  { %v4574_v56 = vmul.f32 0.0078125, %v558_v0  ;;  %v634_v29 = vadd.f32 %v633_v21, %v632_v32  ;;  %v3974_v32 = vld [vmem:[#allocation5 + $0x1b4] sm:$0xf0]  ;;  %v3955_v0 = vld [vmem:[#allocation5 + $0x124] sm:$0xf] }
 0x13c   :  { %v577_v59 = vadd.f32 %v576_v19, %v575_v17  ;;  %v652_v7 = vrot.slane %v651_v61, 2  ;;  %v3498_v54 = vor.u32 %v3974_v32, %v3497_v18  ;;  %v3427_v21 = vld [vmem:[#allocation5 + $0x128] sm:$0xf0]  ;;  %995 = vmatpush.bf16.msrb.mxu0 %v3434_v26  ;;  %v3971_v19 = vld [vmem:[#allocation5 + $0x1a4] sm:$0xf] }
 0x13d   :  { %v656_v39 = vmul.f32 0.0078125, %v634_v29  ;;  %v658_v40 = vmul.f32 %v4574_v56, %v4574_v56  ;;  %v3430_v15 = vor.u32 %v3955_v0, %v3427_v21  ;;  %v3954_v18 = vld [vmem:[#allocation5 + $0x114] sm:$0xf0]  ;;  %v3481_v26 = vld [vmem:[#allocation5 + $0x190] sm:$0xf] }
 0x13e   :  { %v578_v27 = vrot.slane %v577_v59, 1  ;;  %v653_v42 = vadd.f32 %v652_v7, %v651_v61  ;;  %v3491_v61 = vld [vmem:[#allocation5 + $0x1a8] sm:$0xf0]  ;;  %1044 = vmatpush.bf16.msrb.mxu1 %v3498_v54  ;;  %v3956_v7 = vld [vmem:[#allocation5 + $0x124] sm:$0xf0] }
 0x13f   :  { %v660_v24 = vsub.f32 %v656_v39, %v658_v40  ;;  %v3494_v29 = vor.u32 %v3971_v19, %v3491_v61  ;;  %v3489_v39 = vld [vmem:[#allocation5 + $0x1a0] sm:$0xf]  ;;  %1094 = vmatpush.bf16.msrb.mxu2 %v3430_v15  ;;  %v3970_v32 = vld [vmem:[#allocation5 + $0x194] sm:$0xf0]  ;;  %v3411_v15 = vld [vmem:[#allocation5 + $0x108] sm:$0xf0] }
 0x140   :  { %v579_v62 = vadd.f32 %v578_v27, %v577_v59  ;;  %v654_v51 = vrot.slane %v653_v42, 1  ;;  %v3425_v59 = vld [vmem:[#allocation5 + $0x120] sm:$0xf]  ;;  %v3972_v27 = vld [vmem:[#allocation5 + $0x1a4] sm:$0xf0]  ;;  %v3482_v0 = vor.u32 %v3970_v32, %v3481_v26 }
 0x141   :  { %v4578_v17 = vadd.f32 1e-05, %v660_v24  ;;  %v3426_v22 = vor.u32 %v3956_v7, %v3425_v59  ;;  %1143 = vmatpush.bf16.msrb.mxu3 %v3494_v29  ;;  %v3967_v19 = vld [vmem:[#allocation5 + $0x184] sm:$0xf]  ;;  %v3475_v29 = vld [vmem:[#allocation5 + $0x188] sm:$0xf0] }
 0x142   :  { %v4580_v30 = vmul.f32 0.0078125, %v579_v62  ;;  %v655_v2 = vadd.f32 %v654_v51, %v653_v42  ;;  %v3490_v42 = vor.u32 %v3972_v27, %v3489_v39  ;;  %v3486_v62 = vor.u32 %v3969_v57, %v3483_v31  ;;  %v3409_v59 = vld [vmem:[#allocation5 + $0x100] sm:$0xf]  ;;  %v3952_v7 = vld [vmem:[#allocation5 + $0x104] sm:$0xf0] }
 0x143   :  { %4087 = vrsqrt.f32 %v4578_v17  ;;  %996 = vmatpush.bf16.msrb.mxu0 %v3426_v22  ;;  %v3418_v51 = vor.u32 %v3954_v18, %v3417_v9  ;;  %1095 = vmatpush.bf16.msrb.mxu2 %v3422_v60  ;;  %v3473_v22 = vld [vmem:[#allocation5 + $0x180] sm:$0xf]  ;;  %v3968_v27 = vld [vmem:[#allocation5 + $0x184] sm:$0xf0]  ;;  %v684_v60 = vperm.slane %v4245_v16, 1  ;;  %vm670_vm1 = vweird.f32 %v4578_v17 }
 0x144   :  { %v657_v40 = vmul.f32 0.0078125, %v655_v2  ;;  %v659_v34 = vmul.f32 %v4580_v30, %v4580_v30  ;;  %1045 = vmatpush.bf16.msrb.mxu1 %v3490_v42  ;;  %v3951_v2 = vld [vmem:[#allocation5 + $0x104] sm:$0xf]  ;;  %v3474_v28 = vor.u32 %v3968_v27, %v3473_v22 }
 0x145   :  { %1144 = vmatpush.bf16.msrb.mxu3 %v3486_v62  ;;  %v3414_v39 = vor.u32 %v3951_v2, %v3411_v15  ;;  %v685_v2 = vperm.slane %v4245_v16, 5 }
 0x146   :  { %v661_v24 = vsub.f32 %v657_v40, %v659_v34  ;;  %v3478_v40 = vor.u32 %v3967_v19, %v3475_v29  ;;  %v3410_v34 = vor.u32 %v3952_v7, %v3409_v59 }
 0x147   :  { %997 = vmatpush.bf16.msrb.mxu0 %v3418_v51  ;;  %1096 = vmatpush.bf16.msrb.mxu2 %v3414_v39 }
 0x148   :  { %v663_v54 = vadd.f32 1e-05, %v661_v24  ;;  %1046 = vmatpush.bf16.msrb.mxu1 %v3482_v0 }
 0x149   :  { %v4088_v21 = vpop.eup %4087  ;;  %1145 = vmatpush.bf16.msrb.mxu3 %v3478_v40 }
 0x14a   :  { %v665_v61 = vmul.f32 %v4088_v21, %v4578_v17  ;;  %4089 = vrsqrt.f32 %v663_v54  ;;  %vm671_vm0 = vweird.f32 %v4088_v21  ;;  %vm680_vm4 = vweird.f32 %v663_v54 }
 0x14b   :  { %998 = vmatpush.bf16.msrb.mxu0 %v3410_v34  ;;  %vm672_vm2 = vmor %vm670_vm1, %vm671_vm0 }
 0x14c   :  { %v666_v42 = vmul.f32 %v4088_v21, %v665_v61  ;;  %1047 = vmatpush.bf16.msrb.mxu1 %v3474_v28 }
 0x14e   :  { %v667_v20 = vmul.f32 0.5, %v666_v42 }
 0x150   :  { %v4090_v57 = vpop.eup %4089  ;;  %v668_v24 = vsub.f32 1.5, %v667_v20 }
 0x151   :  { %v675_v31 = vmul.f32 %v4090_v57, %v663_v54  ;;  %vm681_vm3 = vweird.f32 %v4090_v57 }
 0x152   :  { %v669_v9 = vmul.f32 %v4088_v21, %v668_v24  ;;  %vm682_vm5 = vmor %vm680_vm4, %vm681_vm3 }
 0x153   :  { %v676_v18 = vmul.f32 %v4090_v57, %v675_v31 }
 0x154   :  { %v673_v62 = vsel %vm672_vm2, %v4088_v21, %v669_v9 }
 0x155   :  { %v688_v51 = vmul.f32 %v684_v60, %v673_v62  ;;  %v677_v26 = vmul.f32 0.5, %v676_v18 }
 0x157   :  { %v4588_v32 = vperm.slane %v688_v51, 0  ;;  %v678_v0 = vsub.f32 1.5, %v677_v26  ;;  %v690_v39 = vmul.f32 %v688_v51, %v4574_v56 }
 0x159   :  { %v4593_v15 = vmul.f32 %v4588_v32, %v4551_v36  ;;  %v679_v19 = vmul.f32 %v4090_v57, %v678_v0  ;;  %v728_v21 = vmul.f32 %v4588_v32, %v4517_v44  ;;  %v730_v29 = vmul.f32 %v4588_v32, %v4526_v10 }
 0x15a   :  { %v702_v56 = vmul.f32 %v4588_v32, %v4340_v12  ;;  %v704_v42 = vmul.f32 %v4588_v32, %v4342_v13  ;;  %v706_v60 = vmul.f32 %v4588_v32, %v4359_v25  ;;  %v718_v31 = vmul.f32 %v4588_v32, %v4464_v46 }
 0x15b   :  { %v683_v61 = vsel %vm682_vm5, %v4090_v57, %v679_v19  ;;  %v722_v9 = vmul.f32 %v4588_v32, %v4488_v4  ;;  %v724_v18 = vmul.f32 %v4588_v32, %v4498_v37 }
 0x15c   :  { %v689_v17 = vmul.f32 %v685_v2, %v683_v61 }
 0x15e   :  { %v691_v59 = vmul.f32 %v689_v17, %v4580_v30  ;;  %v4600_v7 = vperm.slane %v689_v17, 0 }
 0x160   :  { %v694_v36 = vrot.slane %v691_v59, 4  ;;  %v733_v54 = vmul.f32 %v4600_v7, %v4569_v33  ;;  %v729_v44 = vmul.f32 %v4600_v7, %v4548_v58  ;;  %v731_v10 = vmul.f32 %v4600_v7, %v4556_v52 }
 0x161   :  { %v703_v58 = vmul.f32 %v4600_v7, %v4356_v23  ;;  %v705_v52 = vmul.f32 %v4600_v7, %v4346_v14  ;;  %v720_v23 = vmul.f32 %v4588_v32, %v4477_v38  ;;  %v719_v14 = vmul.f32 %v4600_v7, %v4483_v43 }
 0x162   :  { %v696_v40 = vsel %vm695_vm6, %v690_v39, %v694_v36  ;;  %v721_v25 = vmul.f32 %v4600_v7, %v4510_v5  ;;  %v723_v46 = vmul.f32 %v4600_v7, %v4520_v55  ;;  %v726_v38 = vmul.f32 %v4588_v32, %v4508_v45 }
 0x163   :  { %v697_v34 = vrot.slane %v696_v40, 6  ;;  %v725_v37 = vmul.f32 %v4600_v7, %v4530_v63  ;;  %v727_v55 = vmul.f32 %v4600_v7, %v4540_v47 }
 0x165   :  { %v699_v30 = vsub.f32 %v4245_v16, %v697_v34  ;;  %v708_v34 = vmul.f32 %v4588_v32, %v4375_v53 }
 0x167   :  { %v735_v22 = vperm.slane %v699_v30, 2  ;;  %v736_v27 = vperm.slane %v699_v30, 6 }
 0x169   :  { %v4615_v33 = vperm.slane %v735_v22, 2  ;;  %v4617_v28 = vperm.slane %v736_v27, 2 }
 0x16b   :  { %v741_v16 = vadd.f32 %v4615_v33, %v702_v56  ;;  %v743_v20 = vadd.f32 %v4615_v33, %v704_v42  ;;  %v742_v57 = vadd.f32 %v4617_v28, %v703_v58  ;;  %v744_v12 = vadd.f32 %v4617_v28, %v705_v52 }
 0x16c   :  { %v757_v62 = vadd.f32 %v4615_v33, %v718_v31  ;;  %v759_v43 = vadd.f32 %v4615_v33, %v720_v23  ;;  %v758_v4 = vadd.f32 %v4617_v28, %v719_v14  ;;  %v760_v51 = vadd.f32 %v4617_v28, %v721_v25 }
 0x16d   :  { %v808_v24 = vpack.c.bf16 %v743_v20, %v741_v16  ;;  %v809_v13 = vpack.c.bf16 %v744_v12, %v742_v57  ;;  %v761_v26 = vadd.f32 %v4615_v33, %v722_v9  ;;  %v763_v5 = vadd.f32 %v4615_v33, %v724_v18 }
 0x16e   :  { %v816_v0 = vpack.c.bf16 %v759_v43, %v757_v62  ;;  %v762_v45 = vadd.f32 %v4617_v28, %v723_v46  ;;  %v764_v2 = vadd.f32 %v4617_v28, %v725_v37  ;;  %v765_v19 = vadd.f32 %v4615_v33, %v726_v38 }
 0x16f   :  { %999 = vmatmul.bf16.vlgmr.msrb.gmra.mxu0 %v808_v24  ;;  %1048 = vmatmul.bf16.vlgmr.msrb.gmra.mxu1 %v809_v13  ;;  %v817_v61 = vpack.c.bf16 %v760_v51, %v758_v4  ;;  %v818_v17 = vpack.c.bf16 %v763_v5, %v761_v26  ;;  %v767_v63 = vadd.f32 %v4615_v33, %v728_v21 }
 0x170   :  { %1097 = vmatmul.bf16.vlgmr.msrb.gmra.mxu2 %v808_v24  ;;  %1146 = vmatmul.bf16.vlgmr.msrb.gmra.mxu3 %v809_v13  ;;  %v766_v59 = vadd.f32 %v4617_v28, %v727_v55  ;;  %v819_v39 = vpack.c.bf16 %v764_v2, %v762_v45  ;;  %v768_v36 = vadd.f32 %v4617_v28, %v729_v44 }
 0x171   :  { %v769_v40 = vadd.f32 %v4615_v33, %v730_v29  ;;  %v771_v47 = vadd.f32 %v4615_v33, %v4593_v15  ;;  %v820_v30 = vpack.c.bf16 %v767_v63, %v765_v19  ;;  %v770_v22 = vadd.f32 %v4617_v28, %v731_v10 }
 0x172   :  { %v772_v27 = vadd.f32 %v4617_v28, %v733_v54  ;;  %v707_v21 = vmul.f32 %v4600_v7, %v4373_v50  ;;  %v709_v56 = vmul.f32 %v4600_v7, %v4387_v1  ;;  %v821_v44 = vpack.c.bf16 %v768_v36, %v766_v59 }
 0x173   :  { %v822_v42 = vpack.c.bf16 %v771_v47, %v769_v40  ;;  %v745_v58 = vadd.f32 %v4615_v33, %v706_v60  ;;  %v747_v15 = vadd.f32 %v4615_v33, %v708_v34  ;;  %v710_v50 = vmul.f32 %v4588_v32, %v4394_v6 }
 0x174   :  { %v823_v29 = vpack.c.bf16 %v772_v27, %v770_v22  ;;  %v746_v53 = vadd.f32 %v4617_v28, %v707_v21  ;;  %v748_v52 = vadd.f32 %v4617_v28, %v709_v56  ;;  %v712_v1 = vmul.f32 %v4588_v32, %v4416_v35 }
 0x175   :  { %v810_v10 = vpack.c.bf16 %v747_v15, %v745_v58  ;;  %v711_v54 = vmul.f32 %v4600_v7, %v4409_v48  ;;  %v713_v20 = vmul.f32 %v4600_v7, %v4430_v41  ;;  %v749_v57 = vadd.f32 %v4615_v33, %v710_v50  ;;  %v3997_v58 = vld [vmem:[#allocation5 + $0x274] sm:$0xf]  ;;  %v3595_v15 = vld [vmem:[#allocation5 + $0x278] sm:$0xf0] }
 0x176   :  { %v811_v16 = vpack.c.bf16 %v748_v52, %v746_v53  ;;  %v751_v12 = vadd.f32 %v4615_v33, %v712_v1  ;;  %v714_v6 = vmul.f32 %v4588_v32, %v4432_v8  ;;  %v716_v48 = vmul.f32 %v4588_v32, %v4445_v11  ;;  %v4700_v8 = vld [vmem:[#allocation7 + $0x8] sm:$0x77]  ;;  %v4013_v53 = vld [vmem:[#allocation5 + $0x2f4] sm:$0xf] }
 0x177   :  { %v750_v24 = vadd.f32 %v4617_v28, %v711_v54  ;;  %v752_v13 = vadd.f32 %v4617_v28, %v713_v20  ;;  %v715_v35 = vmul.f32 %v4600_v7, %v4439_v3  ;;  %v717_v41 = vmul.f32 %v4600_v7, %v4469_v49 }
 0x178   :  { %v812_v60 = vpack.c.bf16 %v751_v12, %v749_v57  ;;  %v753_v23 = vadd.f32 %v4615_v33, %v714_v6  ;;  %v755_v14 = vadd.f32 %v4615_v33, %v716_v48  ;;  %v825_v3 = vperm.slane %v4700_v8, 0  ;;  %v3593_v12 = vld [vmem:[#allocation5 + $0x270] sm:$0xf] }
 0x179   :  { %v813_v31 = vpack.c.bf16 %v752_v13, %v750_v24  ;;  %v754_v9 = vadd.f32 %v4617_v28, %v715_v35  ;;  %v756_v18 = vadd.f32 %v4617_v28, %v717_v41  ;;  %v826_v7 = vperm.slane %v4700_v8, 4  ;;  %v3998_v24 = vld [vmem:[#allocation5 + $0x274] sm:$0xf0]  ;;  %v3657_v13 = vld [vmem:[#allocation5 + $0x2f0] sm:$0xf] }
 0x17a   :  { %v814_v25 = vpack.c.bf16 %v755_v14, %v753_v23  ;;  %v4703_v11 = vperm.slane %v825_v3, 0  ;;  %v3995_v14 = vld [vmem:[#allocation5 + $0x264] sm:$0xf] }
 0x17b   :  { %v815_v46 = vpack.c.bf16 %v756_v18, %v754_v9  ;;  %v4709_v38 = vperm.slane %v826_v7, 0  ;;  %v3587_v9 = vld [vmem:[#allocation5 + $0x268] sm:$0xf0]  ;;  %v4011_v18 = vld [vmem:[#allocation5 + $0x2e4] sm:$0xf] }
 0x17f   :  { %1004 = vmatmul.bf16.gmra.mxu0 %v810_v10  ;;  %1053 = vmatmul.bf16.gmra.mxu1 %v811_v16 }
 0x180   :  { %1102 = vmatmul.bf16.gmra.mxu2 %v810_v10  ;;  %1151 = vmatmul.bf16.gmra.mxu3 %v811_v16  ;;  %v3598_v10 = vor.u32 %v3997_v58, %v3595_v15  ;;  %v3659_v16 = vld [vmem:[#allocation5 + $0x2f8] sm:$0xf0] }
 0x181   :  { %v3662_v50 = vor.u32 %v4013_v53, %v3659_v16 }
 0x182   :  { %1769 = vmatpush.bf16.msra.mxu2 %v3598_v10 }
 0x183   :  { %1818 = vmatpush.bf16.msra.mxu3 %v3662_v50 }
 0x18f   :  { %1009 = vmatmul.bf16.gmra.mxu0 %v812_v60  ;;  %1058 = vmatmul.bf16.gmra.mxu1 %v813_v31 }
 0x190   :  { %1107 = vmatmul.bf16.gmra.mxu2 %v812_v60  ;;  %1156 = vmatmul.bf16.gmra.mxu3 %v813_v31  ;;  %v3594_v60 = vor.u32 %v3998_v24, %v3593_v12  ;;  %v4014_v31 = vld [vmem:[#allocation5 + $0x2f4] sm:$0xf0]  ;;  %v3577_v24 = vld [vmem:[#allocation5 + $0x250] sm:$0xf] }
 0x191   :  { %v3658_v6 = vor.u32 %v4014_v31, %v3657_v13  ;;  %v3994_v13 = vld [vmem:[#allocation5 + $0x254] sm:$0xf0] }
 0x192   :  { %1671 = vmatpush.bf16.msra.mxu0 %v3594_v60  ;;  %v3641_v60 = vld [vmem:[#allocation5 + $0x2d0] sm:$0xf] }
 0x193   :  { %1720 = vmatpush.bf16.msra.mxu1 %v3658_v6  ;;  %v3578_v6 = vor.u32 %v3994_v13, %v3577_v24 }
 0x19f   :  { %1014 = vmatmul.bf16.gmra.mxu0 %v814_v25  ;;  %1063 = vmatmul.bf16.gmra.mxu1 %v815_v46 }
 0x1a0   :  { %1112 = vmatmul.bf16.gmra.mxu2 %v814_v25  ;;  %1161 = vmatmul.bf16.gmra.mxu3 %v815_v46  ;;  %v3590_v25 = vor.u32 %v3995_v14, %v3587_v9  ;;  %v3651_v46 = vld [vmem:[#allocation5 + $0x2e8] sm:$0xf0]  ;;  %v4010_v14 = vld [vmem:[#allocation5 + $0x2d4] sm:$0xf0] }
 0x1a1   :  { %v3654_v3 = vor.u32 %v4011_v18, %v3651_v46  ;;  %v3642_v9 = vor.u32 %v4010_v14, %v3641_v60 }
 0x1a2   :  { %1770 = vmatpush.bf16.msra.mxu2 %v3590_v25 }
 0x1a3   :  { %1819 = vmatpush.bf16.msra.mxu3 %v3654_v3 }
 0x1af   :  { %1019 = vmatmul.bf16.gmra.mxu0 %v816_v0  ;;  %1068 = vmatmul.bf16.gmra.mxu1 %v817_v61 }
 0x1b0   :  { %1117 = vmatmul.bf16.gmra.mxu2 %v816_v0  ;;  %1166 = vmatmul.bf16.gmra.mxu3 %v817_v61 }
 0x1bf   :  { %1024 = vmatmul.bf16.gmra.mxu0 %v818_v17  ;;  %1073 = vmatmul.bf16.gmra.mxu1 %v819_v39 }
 0x1c0   :  { %1122 = vmatmul.bf16.gmra.mxu2 %v818_v17  ;;  %1171 = vmatmul.bf16.gmra.mxu3 %v819_v39 }
 0x1cf   :  { %1029 = vmatmul.bf16.gmra.mxu0 %v820_v30  ;;  %1078 = vmatmul.bf16.gmra.mxu1 %v821_v44 }
 0x1d0   :  { %1127 = vmatmul.bf16.gmra.mxu2 %v820_v30  ;;  %1176 = vmatmul.bf16.gmra.mxu3 %v821_v44 }
 0x1df   :  { %1034 = vmatmul.bf16.gmra.mxu0 %v822_v42  ;;  %1083 = vmatmul.bf16.gmra.mxu1 %v823_v29 }
 0x1e0   :  { %1132 = vmatmul.bf16.gmra.mxu2 %v822_v42  ;;  %1181 = vmatmul.bf16.gmra.mxu3 %v823_v29 }
 0x1ec   :  { %v1000_v49 = vpop.f32.mrf.mxu0  ;;  %v1049_v32 = vpop.f32.mrf.mxu1 }
 0x1ed   :  { %v1001_v33 = vadd.f32 %v1000_v49, %v4703_v11 }
 0x1ef   :  { %v4707_v28 = vadd.f32 %v1049_v32, %v1001_v33 }
 0x1f1   :  { %v4799_v46 = vmax.f32 %v4707_v28, 0.0 }
 0x1f3   :  { %v1098_v62 = vpop.f32.mrf.mxu2  ;;  %v1147_v43 = vpop.f32.mrf.mxu3 }
 0x1f4   :  { %v1099_v4 = vadd.f32 %v1098_v62, %v4709_v38  ;;  %v4712_v37 = vpop.f32.mrf.mxu0  ;;  %v4714_v51 = vpop.f32.mrf.mxu1  ;;  %v3585_v62 = vld [vmem:[#allocation5 + $0x260] sm:$0xf] }
 0x1f5   :  { %v1003_v15 = vadd.f32 %v4712_v37, %v4703_v11 }
 0x1f6   :  { %v4716_v26 = vadd.f32 %v1147_v43, %v1099_v4  ;;  %v3996_v43 = vld [vmem:[#allocation5 + $0x264] sm:$0xf0]  ;;  %v3649_v4 = vld [vmem:[#allocation5 + $0x2e0] sm:$0xf] }
 0x1f7   :  { %v1052_v31 = vadd.f32 %v4714_v51, %v1003_v15 }
 0x1f9   :  { %v4796_v25 = vmax.f32 %v1052_v31, 0.0 }
 0x1fb   :  { %v4718_v5 = vpop.f32.mrf.mxu2  ;;  %v4720_v55 = vpop.f32.mrf.mxu3 }
 0x1fc   :  { %v1005_v0 = vpop.f32.mrf.mxu0  ;;  %v1054_v45 = vpop.f32.mrf.mxu1  ;;  %v1101_v16 = vadd.f32 %v4718_v5, %v4709_v38 }
 0x1fd   :  { %v1006_v2 = vadd.f32 %v1005_v0, %v4703_v11  ;;  %v3586_v0 = vor.u32 %v3996_v43, %v3585_v62 }
 0x1fe   :  { %v1150_v18 = vadd.f32 %v4720_v55, %v1101_v16 }
 0x1ff   :  { %v4723_v19 = vadd.f32 %v1054_v45, %v1006_v2  ;;  %v4012_v45 = vld [vmem:[#allocation5 + $0x2e4] sm:$0xf0]  ;;  %1672 = vmatpush.bf16.msra.mxu0 %v3586_v0  ;;  %v3991_v0 = vld [vmem:[#allocation5 + $0x244] sm:$0xf] }
 0x200   :  { %v3650_v2 = vor.u32 %v4012_v45, %v3649_v4  ;;  %v4809_v55 = vmax.f32 %v1150_v18, 0.0  ;;  %v3571_v45 = vld [vmem:[#allocation5 + $0x248] sm:$0xf0] }
 0x201   :  { %v4812_v43 = vmax.f32 %v4723_v19, 0.0  ;;  %v1263_v19 = vmul.f32 %v4799_v46, %v4799_v46 }
 0x202   :  { %1721 = vmatpush.bf16.msra.mxu1 %v3650_v2  ;;  %v4007_v2 = vld [vmem:[#allocation5 + $0x2c4] sm:$0xf] }
 0x203   :  { %v1103_v61 = vpop.f32.mrf.mxu2  ;;  %v1152_v17 = vpop.f32.mrf.mxu3  ;;  %1673 = vmatpush.bf16.msra.mxu0 %v3578_v6  ;;  %v1267_v16 = vmul.f32 %v4812_v43, %v4812_v43 }
 0x204   :  { %v1104_v63 = vadd.f32 %v1103_v61, %v4709_v38  ;;  %v4726_v59 = vpop.f32.mrf.mxu0  ;;  %v4728_v39 = vpop.f32.mrf.mxu1 }
 0x205   :  { %v1008_v37 = vadd.f32 %v4726_v59, %v4703_v11  ;;  %v4807_v59 = vmax.f32 %v4716_v26, 0.0  ;;  %v1265_v26 = vmul.f32 %v4796_v25, %v4796_v25 }
 0x206   :  { %v4730_v36 = vadd.f32 %v1152_v17, %v1104_v63  ;;  %1722 = vmatpush.bf16.msra.mxu1 %v3642_v9 }
 0x207   :  { %v1057_v51 = vadd.f32 %v4728_v39, %v1008_v37  ;;  %v1295_v60 = vadd.f32 %v1265_v26, %v1263_v19  ;;  %v1240_v31 = vadd.f32 %v4809_v55, %v4807_v59 }
 0x20b   :  { %v4732_v40 = vpop.f32.mrf.mxu2  ;;  %v4734_v47 = vpop.f32.mrf.mxu3 }
 0x20c   :  { %v1010_v34 = vpop.f32.mrf.mxu0  ;;  %v1059_v30 = vpop.f32.mrf.mxu1  ;;  %v1106_v5 = vadd.f32 %v4732_v40, %v4709_v38 }
 0x20d   :  { %v1011_v22 = vadd.f32 %v1010_v34, %v4703_v11 }
 0x20e   :  { %v1155_v28 = vadd.f32 %v4734_v47, %v1106_v5 }
 0x20f   :  { %v4737_v27 = vadd.f32 %v1059_v30, %v1011_v22  ;;  %v3993_v30 = vld [vmem:[#allocation5 + $0x254] sm:$0xf]  ;;  %v3579_v22 = vld [vmem:[#allocation5 + $0x258] sm:$0xf0] }
 0x210   :  { %v4842_v24 = vmax.f32 %v1155_v28, 0.0 }
 0x213   :  { %v1108_v21 = vpop.f32.mrf.mxu2  ;;  %v1157_v56 = vpop.f32.mrf.mxu3 }
 0x214   :  { %v1109_v44 = vadd.f32 %v1108_v21, %v4709_v38  ;;  %v4740_v42 = vpop.f32.mrf.mxu0  ;;  %v4742_v29 = vpop.f32.mrf.mxu1  ;;  %v4009_v21 = vld [vmem:[#allocation5 + $0x2d4] sm:$0xf] }
 0x215   :  { %v1013_v39 = vadd.f32 %v4740_v42, %v4703_v11  ;;  %v1264_v42 = vmul.f32 %v4807_v59, %v4807_v59 }
 0x216   :  { %v4744_v52 = vadd.f32 %v1157_v56, %v1109_v44  ;;  %v3582_v56 = vor.u32 %v3993_v30, %v3579_v22  ;;  %v3643_v44 = vld [vmem:[#allocation5 + $0x2d8] sm:$0xf0]  ;;  %v3574_v30 = vor.u32 %v3991_v0, %v3571_v45  ;;  %v3635_v22 = vld [vmem:[#allocation5 + $0x2c8] sm:$0xf0]  ;;  %v1296_v0 = vadd.f32 %v1295_v60, %v1267_v16 }
 0x217   :  { %v3646_v58 = vor.u32 %v4009_v21, %v3643_v44  ;;  %v4826_v21 = vmax.f32 %v4730_v36, 0.0  ;;  %v3638_v47 = vor.u32 %v4007_v2, %v3635_v22  ;;  %v1266_v44 = vmul.f32 %v4809_v55, %v4809_v55 }
 0x218   :  { %1771 = vmatpush.bf16.msra.mxu2 %v3582_v56  ;;  %v4828_v56 = vmax.f32 %v1057_v51, 0.0  ;;  %v1219_v36 = vadd.f32 %v4796_v25, %v4799_v46  ;;  %v1062_v13 = vadd.f32 %v4742_v29, %v1013_v39  ;;  %v4864_v5 = vmax.f32 %v4744_v52, 0.0 }
 0x219   :  { %1820 = vmatpush.bf16.msra.mxu3 %v3646_v58  ;;  %v1268_v14 = vmul.f32 %v4826_v21, %v4826_v21  ;;  %v1241_v45 = vadd.f32 %v1240_v31, %v4826_v21 }
 0x21a   :  { %v1220_v6 = vadd.f32 %v1219_v36, %v4812_v43  ;;  %v1269_v37 = vmul.f32 %v4828_v56, %v4828_v56  ;;  %v4873_v2 = vmax.f32 %v1062_v13, 0.0 }
 0x21b   :  { %v4746_v1 = vpop.f32.mrf.mxu2  ;;  %v4748_v54 = vpop.f32.mrf.mxu3 }
 0x21c   :  { %v4750_v20 = vpop.f32.mrf.mxu0  ;;  %v4752_v57 = vpop.f32.mrf.mxu1  ;;  %v1111_v58 = vadd.f32 %v4746_v1, %v4709_v38  ;;  %1772 = vmatpush.bf16.msra.mxu2 %v3574_v30  ;;  %v4848_v1 = vmax.f32 %v4737_v27, 0.0  ;;  %v1316_v27 = vadd.f32 %v1266_v44, %v1264_v42  ;;  %v1221_v26 = vadd.f32 %v1220_v6, %v4828_v56 }
 0x21d   :  { %v1016_v15 = vadd.f32 %v4750_v20, %v4703_v11  ;;  %1821 = vmatpush.bf16.msra.mxu3 %v3638_v47  ;;  %v1297_v22 = vadd.f32 %v1296_v0, %v1269_v37  ;;  %v1242_v42 = vadd.f32 %v1241_v45, %v4842_v24  ;;  %v1272_v44 = vmul.f32 %v4864_v5, %v4864_v5 }
 0x21e   :  { %v1271_v52 = vmul.f32 %v4848_v1, %v4848_v1  ;;  %v1317_v30 = vadd.f32 %v1316_v27, %v1268_v14  ;;  %v1222_v36 = vadd.f32 %v1221_v26, %v4848_v1 }
 0x21f   :  { %v1065_v51 = vadd.f32 %v4752_v57, %v1016_v15  ;;  %v1243_v31 = vadd.f32 %v1242_v42, %v4864_v5 }
 0x220   :  { %v1298_v16 = vadd.f32 %v1297_v22, %v1271_v52  ;;  %v1223_v27 = vadd.f32 %v1222_v36, %v4873_v2 }
 0x221   :  { %v4889_v15 = vmax.f32 %v1065_v51, 0.0 }
 0x223   :  { %v4754_v48 = vpop.f32.mrf.mxu2  ;;  %v4756_v35 = vpop.f32.mrf.mxu3 }
 0x224   :  { %v4758_v41 = vpop.f32.mrf.mxu0  ;;  %v4760_v23 = vpop.f32.mrf.mxu1  ;;  %v1114_v20 = vadd.f32 %v4754_v48, %v4709_v38  ;;  %v1160_v48 = vadd.f32 %v4748_v54, %v1111_v58 }
 0x225   :  { %v1018_v29 = vadd.f32 %v4758_v41, %v4703_v11  ;;  %v1270_v41 = vmul.f32 %v4842_v24, %v4842_v24 }
 0x226   :  { %v1163_v54 = vadd.f32 %v4756_v35, %v1114_v20  ;;  %v4887_v58 = vmax.f32 %v1160_v48, 0.0 }
 0x227   :  { %v1067_v19 = vadd.f32 %v4760_v23, %v1018_v29  ;;  %v1318_v35 = vadd.f32 %v1317_v30, %v1270_v41  ;;  %v1224_v41 = vadd.f32 %v1223_v27, %v4889_v15 }
 0x229   :  { %v4902_v20 = vmax.f32 %v1067_v19, 0.0 }
 0x22b   :  { %v4762_v49 = vpop.f32.mrf.mxu2  ;;  %v4764_v32 = vpop.f32.mrf.mxu3 }
 0x22c   :  { %v4766_v7 = vpop.f32.mrf.mxu0  ;;  %v4768_v33 = vpop.f32.mrf.mxu1  ;;  %v1116_v47 = vadd.f32 %v4762_v49, %v4709_v38  ;;  %v4896_v49 = vmax.f32 %v1163_v54, 0.0 }
 0x22d   :  { %v1021_v57 = vadd.f32 %v4766_v7, %v4703_v11  ;;  %v1273_v7 = vmul.f32 %v4873_v2, %v4873_v2 }
 0x22e   :  { %v1165_v6 = vadd.f32 %v4764_v32, %v1116_v47  ;;  %v1244_v32 = vadd.f32 %v1243_v31, %v4887_v58  ;;  %v1276_v26 = vmul.f32 %v4896_v49, %v4896_v49 }
 0x22f   :  { %v1070_v13 = vadd.f32 %v4768_v33, %v1021_v57  ;;  %v1274_v33 = vmul.f32 %v4887_v58, %v4887_v58  ;;  %v1299_v0 = vadd.f32 %v1298_v16, %v1273_v7  ;;  %v1277_v57 = vmul.f32 %v4902_v20, %v4902_v20 }
 0x230   :  { %v4926_v30 = vmax.f32 %v1165_v6, 0.0  ;;  %v1245_v47 = vadd.f32 %v1244_v32, %v4896_v49 }
 0x231   :  { %v4921_v52 = vmax.f32 %v1070_v13, 0.0 }
 0x232   :  { %v1278_v6 = vmul.f32 %v4926_v30, %v4926_v30 }
 0x233   :  { %v4770_v61 = vpop.f32.mrf.mxu2  ;;  %v4772_v17 = vpop.f32.mrf.mxu3 }
 0x234   :  { %v4774_v63 = vpop.f32.mrf.mxu0  ;;  %v4776_v34 = vpop.f32.mrf.mxu1  ;;  %v1119_v60 = vadd.f32 %v4770_v61, %v4709_v38  ;;  %v1275_v61 = vmul.f32 %v4889_v15, %v4889_v15 }
 0x235   :  { %v1023_v23 = vadd.f32 %v4774_v63, %v4703_v11  ;;  %v1319_v63 = vadd.f32 %v1318_v35, %v1272_v44  ;;  %v1225_v44 = vadd.f32 %v1224_v41, %v4902_v20 }
 0x236   :  { %v1168_v54 = vadd.f32 %v4772_v17, %v1119_v60 }
 0x237   :  { %v1072_v45 = vadd.f32 %v4776_v34, %v1023_v23  ;;  %v1320_v19 = vadd.f32 %v1319_v63, %v1274_v33 }
 0x239   :  { %v4934_v35 = vmax.f32 %v1072_v45, 0.0  ;;  %v1321_v7 = vadd.f32 %v1320_v19, %v1276_v26 }
 0x23b   :  { %v4780_v53 = vpop.f32.mrf.mxu2  ;;  %v4782_v10 = vpop.f32.mrf.mxu3 }
 0x23c   :  { %v4786_v50 = vpop.f32.mrf.mxu0  ;;  %v4788_v12 = vpop.f32.mrf.mxu1  ;;  %v1121_v42 = vadd.f32 %v4780_v53, %v4709_v38  ;;  %v1246_v53 = vadd.f32 %v1245_v47, %v4926_v30 }
 0x23d   :  { %v1026_v14 = vadd.f32 %v4786_v50, %v4703_v11 }
 0x23e   :  { %v1170_v63 = vadd.f32 %v4782_v10, %v1121_v42 }
 0x23f   :  { %v1075_v22 = vadd.f32 %v4788_v12, %v1026_v14  ;;  %v1279_v12 = vmul.f32 %v4921_v52, %v4921_v52  ;;  %v1226_v14 = vadd.f32 %v1225_v44, %v4921_v52 }
 0x241   :  { %v4945_v13 = vmax.f32 %v1075_v22, 0.0 }
 0x243   :  { %v4802_v3 = vpop.f32.mrf.mxu2  ;;  %v4804_v62 = vpop.f32.mrf.mxu3  ;;  %v1283_v41 = vmul.f32 %v4945_v13, %v4945_v13 }
 0x244   :  { %v4814_v40 = vpop.f32.mrf.mxu0  ;;  %v4816_v4 = vpop.f32.mrf.mxu1  ;;  %v1124_v23 = vadd.f32 %v4802_v3, %v4709_v38 }
 0x245   :  { %v1028_v50 = vadd.f32 %v4814_v40, %v4703_v11  ;;  %v1300_v40 = vadd.f32 %v1299_v0, %v1275_v61  ;;  %v1281_v61 = vmul.f32 %v4934_v35, %v4934_v35 }
 0x247   :  { %v1077_v17 = vadd.f32 %v4816_v4, %v1028_v50  ;;  %v1301_v16 = vadd.f32 %v1300_v40, %v1277_v57  ;;  %v1173_v50 = vadd.f32 %v4804_v62, %v1124_v23  ;;  %v1322_v57 = vadd.f32 %v1321_v7, %v1278_v6 }
 0x249   :  { %v1302_v32 = vadd.f32 %v1301_v16, %v1279_v12  ;;  %v4978_v44 = vmax.f32 %v1173_v50, 0.0 }
 0x24b   :  { %v4859_v9 = vpop.f32.mrf.mxu2  ;;  %v4861_v18 = vpop.f32.mrf.mxu3  ;;  %v1303_v19 = vadd.f32 %v1302_v32, %v1281_v61  ;;  %v1284_v61 = vmul.f32 %v4978_v44, %v4978_v44 }
 0x24c   :  { %v1030_v28 = vpop.f32.mrf.mxu0  ;;  %v4868_v39 = vpop.f32.mrf.mxu1  ;;  %v1126_v27 = vadd.f32 %v4859_v9, %v4709_v38  ;;  %v1227_v9 = vadd.f32 %v1226_v14, %v4934_v35 }
 0x24d   :  { %v1031_v34 = vadd.f32 %v1030_v28, %v4703_v11  ;;  %v4940_v28 = vmax.f32 %v1168_v54, 0.0 }
 0x24e   :  { %v1175_v22 = vadd.f32 %v4861_v18, %v1126_v27  ;;  %v1228_v62 = vadd.f32 %v1227_v9, %v4945_v13 }
 0x24f   :  { %v1080_v60 = vadd.f32 %v4868_v39, %v1031_v34  ;;  %v1280_v45 = vmul.f32 %v4940_v28, %v4940_v28  ;;  %v1247_v47 = vadd.f32 %v1246_v53, %v4940_v28 }
 0x251   :  { %v4966_v26 = vmax.f32 %v1080_v60, 0.0  ;;  %v1323_v42 = vadd.f32 %v1322_v57, %v1280_v45 }
 0x253   :  { %v1128_v37 = vpop.f32.mrf.mxu2  ;;  %v4907_v29 = vpop.f32.mrf.mxu3  ;;  %v1287_v7 = vmul.f32 %v4966_v26, %v4966_v26 }
 0x254   :  { %v1032_v48 = vpop.f32.mrf.mxu0  ;;  %v1081_v51 = vpop.f32.mrf.mxu1  ;;  %v1129_v10 = vadd.f32 %v1128_v37, %v4709_v38 }
 0x255   :  { %v1033_v36 = vadd.f32 %v1032_v48, %v4703_v11  ;;  %v4956_v48 = vmax.f32 %v1077_v17, 0.0 }
 0x256   :  { %v1178_v17 = vadd.f32 %v4907_v29, %v1129_v10 }
 0x257   :  { %v1082_v39 = vadd.f32 %v1081_v51, %v1033_v36  ;;  %v4968_v51 = vmax.f32 %v1170_v63, 0.0  ;;  %v1285_v37 = vmul.f32 %v4956_v48, %v4956_v48  ;;  %v1304_v36 = vadd.f32 %v1303_v19, %v1283_v41 }
 0x258   :  { %v1229_v18 = vadd.f32 %v1228_v62, %v4956_v48 }
 0x259   :  { %v4975_v40 = vmax.f32 %v1082_v39, 0.0  ;;  %v1282_v60 = vmul.f32 %v4968_v51, %v4968_v51  ;;  %v1305_v29 = vadd.f32 %v1304_v36, %v1285_v37  ;;  %v4998_v39 = vmax.f32 %v1178_v17, 0.0 }
 0x25a   :  { %v1230_v63 = vadd.f32 %v1229_v18, %v4966_v26 }
 0x25b   :  { %v1130_v31 = vpop.f32.mrf.mxu2  ;;  %v1179_v4 = vpop.f32.mrf.mxu3  ;;  %v1289_v27 = vmul.f32 %v4975_v40, %v4975_v40  ;;  %v1306_v32 = vadd.f32 %v1305_v29, %v1287_v7  ;;  %v1324_v9 = vadd.f32 %v1323_v42, %v1282_v60  ;;  %v1288_v37 = vmul.f32 %v4998_v39, %v4998_v39 }
 0x25c   :  { %v1035_v3 = vpop.f32.mrf.mxu0  ;;  %v1084_v33 = vpop.f32.mrf.mxu1  ;;  %v1131_v34 = vadd.f32 %v1130_v31, %v4709_v38  ;;  %v4988_v31 = vmax.f32 %v1175_v22, 0.0  ;;  %v1231_v45 = vadd.f32 %v1230_v63, %v4975_v40 }
 0x25d   :  { %v1036_v0 = vadd.f32 %v1035_v3, %v4703_v11  ;;  %v1307_v57 = vadd.f32 %v1306_v32, %v1289_v27  ;;  %v1325_v19 = vadd.f32 %v1324_v9, %v1284_v61 }
 0x25e   :  { %v1180_v53 = vadd.f32 %v1179_v4, %v1131_v34 }
 0x25f   :  { %v1085_v54 = vadd.f32 %v1084_v33, %v1036_v0  ;;  %v1248_v33 = vadd.f32 %v1247_v47, %v4968_v51 }
 0x261   :  { %v4984_v12 = vmax.f32 %v1085_v54, 0.0  ;;  %v1249_v41 = vadd.f32 %v1248_v33, %v4978_v44  ;;  %v5006_v54 = vmax.f32 %v1180_v53, 0.0 }
 0x263   :  { %v1133_v23 = vpop.f32.mrf.mxu2  ;;  %v1182_v16 = vpop.f32.mrf.mxu3  ;;  %v1291_v50 = vmul.f32 %v4984_v12, %v4984_v12  ;;  %v1232_v22 = vadd.f32 %v1231_v45, %v4984_v12  ;;  %v1250_v62 = vadd.f32 %v1249_v41, %v4988_v31 }
 0x264   :  { %v1134_v6 = vadd.f32 %v1133_v23, %v4709_v38  ;;  %v1037_v14 = vpop.f32.mrf.mxu0  ;;  %v1086_v4 = vpop.f32.mrf.mxu1 }
 0x265   :  { %v1038_v3 = vadd.f32 %v1037_v14, %v4703_v11  ;;  %v1286_v11 = vmul.f32 %v4988_v31, %v4988_v31  ;;  %v1308_v42 = vadd.f32 %v1307_v57, %v1291_v50  ;;  %v1251_v23 = vadd.f32 %v1250_v62, %v4998_v39 }
 0x266   :  { %v1183_v0 = vadd.f32 %v1182_v16, %v1134_v6  ;;  %v1290_v16 = vmul.f32 %v5006_v54, %v5006_v54 }
 0x267   :  { %v1087_v10 = vadd.f32 %v1086_v4, %v1038_v3  ;;  %v1326_v7 = vadd.f32 %v1325_v19, %v1286_v11  ;;  %v1252_v63 = vadd.f32 %v1251_v23, %v5006_v54 }
 0x268   :  { %v5014_v47 = vmax.f32 %v1183_v0, 0.0 }
 0x269   :  { %v5009_v34 = vmax.f32 %v1087_v10, 0.0  ;;  %v1327_v29 = vadd.f32 %v1326_v7, %v1288_v37  ;;  %v3992_v7 = vld [vmem:[#allocation5 + $0x244] sm:$0xf0] }
 0x26a   :  { %v1292_v27 = vmul.f32 %v5014_v47, %v5014_v47  ;;  %v1253_v4 = vadd.f32 %v1252_v63, %v5014_v47 }
 0x26b   :  { %v1233_v17 = vadd.f32 %v1232_v22, %v5009_v34  ;;  %v1293_v36 = vmul.f32 %v5009_v34, %v5009_v34  ;;  %v1135_v18 = vpop.f32.mrf.mxu2  ;;  %v1184_v14 = vpop.f32.mrf.mxu3  ;;  %v1328_v0 = vadd.f32 %v1327_v29, %v1290_v16  ;;  %v3633_v16 = vld [vmem:[#allocation5 + $0x2c0] sm:$0xf] }
 0x26c   :  { %v1136_v60 = vadd.f32 %v1135_v18, %v4709_v38  ;;  %v3569_v18 = vld [vmem:[#allocation5 + $0x240] sm:$0xf] }
 0x26d   :  { %v1234_v53 = vrot.slane %v1233_v17, 4  ;;  %v1309_v6 = vadd.f32 %v1308_v42, %v1293_v36  ;;  %v1329_v38 = vadd.f32 %v1328_v0, %v1292_v27  ;;  %v3570_v23 = vor.u32 %v3992_v7, %v3569_v18  ;;  %v3561_v18 = vld [vmem:[#allocation5 + $0x230] sm:$0xf] }
 0x26e   :  { %v1185_v3 = vadd.f32 %v1184_v14, %v1136_v60  ;;  %v4008_v60 = vld [vmem:[#allocation5 + $0x2c4] sm:$0xf0] }
 0x26f   :  { %v1235_v33 = vadd.f32 %v1234_v53, %v1233_v17  ;;  %v1310_v61 = vrot.slane %v1309_v6, 4  ;;  %v3634_v63 = vor.u32 %v4008_v60, %v3633_v16  ;;  %1674 = vmatpush.bf16.msra.mxu0 %v3570_v23  ;;  %v3990_v16 = vld [vmem:[#allocation5 + $0x234] sm:$0xf0]  ;;  %v3625_v60 = vld [vmem:[#allocation5 + $0x2b0] sm:$0xf] }
 0x270   :  { %v5027_v32 = vmax.f32 %v1185_v3, 0.0 }
 0x271   :  { %v1236_v45 = vrot.slane %v1235_v33, 2  ;;  %v1311_v50 = vadd.f32 %v1310_v61, %v1309_v6  ;;  %1723 = vmatpush.bf16.msra.mxu1 %v3634_v63  ;;  %v3555_v63 = vld [vmem:[#allocation5 + $0x228] sm:$0xf0] }
 0x272   :  { %v1254_v10 = vadd.f32 %v1253_v4, %v5027_v32  ;;  %v1294_v9 = vmul.f32 %v5027_v32, %v5027_v32 }
 0x273   :  { %v1237_v41 = vadd.f32 %v1236_v45, %v1235_v33  ;;  %v1312_v11 = vrot.slane %v1311_v50, 2 }
 0x274   :  { %v1255_v57 = vrot.slane %v1254_v10, 4  ;;  %v1330_v22 = vadd.f32 %v1329_v38, %v1294_v9 }
 0x275   :  { %v1238_v19 = vrot.slane %v1237_v41, 1  ;;  %v1313_v62 = vadd.f32 %v1312_v11, %v1311_v50 }
 0x276   :  { %v1256_v37 = vadd.f32 %v1255_v57, %v1254_v10  ;;  %v1331_v42 = vrot.slane %v1330_v22, 4 }
 0x277   :  { %v1239_v17 = vadd.f32 %v1238_v19, %v1237_v41  ;;  %v1314_v36 = vrot.slane %v1313_v62, 1  ;;  %v3989_v19 = vld [vmem:[#allocation5 + $0x234] sm:$0xf] }
 0x278   :  { %v1257_v53 = vrot.slane %v1256_v37, 2  ;;  %v1332_v6 = vadd.f32 %v1331_v42, %v1330_v22 }
 0x279   :  { %v5032_v14 = vmul.f32 0.0078125, %v1239_v17  ;;  %v1315_v29 = vadd.f32 %v1314_v36, %v1313_v62  ;;  %v3563_v62 = vld [vmem:[#allocation5 + $0x238] sm:$0xf0] }
 0x27a   :  { %v1258_v27 = vadd.f32 %v1257_v53, %v1256_v37  ;;  %v1333_v3 = vrot.slane %v1332_v6, 2  ;;  %v4005_v37 = vld [vmem:[#allocation5 + $0x2b4] sm:$0xf]  ;;  %v3566_v17 = vor.u32 %v3989_v19, %v3563_v62  ;;  %v3627_v36 = vld [vmem:[#allocation5 + $0x2b8] sm:$0xf0] }
 0x27b   :  { %v1337_v33 = vmul.f32 0.0078125, %v1315_v29  ;;  %v1339_v61 = vmul.f32 %v5032_v14, %v5032_v14  ;;  %v3630_v23 = vor.u32 %v4005_v37, %v3627_v36  ;;  %v4006_v53 = vld [vmem:[#allocation5 + $0x2b4] sm:$0xf0]  ;;  %v3987_v29 = vld [vmem:[#allocation5 + $0x224] sm:$0xf] }
 0x27c   :  { %v1259_v0 = vrot.slane %v1258_v27, 1  ;;  %v1334_v4 = vadd.f32 %v1333_v3, %v1332_v6  ;;  %1773 = vmatpush.bf16.msra.mxu2 %v3566_v17  ;;  %v3562_v3 = vor.u32 %v3990_v16, %v3561_v18  ;;  %v3985_v19 = vld [vmem:[#allocation5 + $0x214] sm:$0xf]  ;;  %v3547_v62 = vld [vmem:[#allocation5 + $0x218] sm:$0xf0] }
 0x27d   :  { %v1341_v45 = vsub.f32 %v1337_v33, %v1339_v61  ;;  %1822 = vmatpush.bf16.msra.mxu3 %v3630_v23  ;;  %v3626_v33 = vor.u32 %v4006_v53, %v3625_v60  ;;  %v3558_v61 = vor.u32 %v3987_v29, %v3555_v63  ;;  %v4001_v37 = vld [vmem:[#allocation5 + $0x294] sm:$0xf]  ;;  %v3550_v36 = vor.u32 %v3985_v19, %v3547_v62  ;;  %v3611_v18 = vld [vmem:[#allocation5 + $0x298] sm:$0xf0]  ;;  %v3545_v23 = vld [vmem:[#allocation5 + $0x210] sm:$0xf] }
 0x27e   :  { %v1260_v50 = vadd.f32 %v1259_v0, %v1258_v27  ;;  %v1335_v38 = vrot.slane %v1334_v4, 1  ;;  %v4003_v27 = vld [vmem:[#allocation5 + $0x2a4] sm:$0xf]  ;;  %v3619_v0 = vld [vmem:[#allocation5 + $0x2a8] sm:$0xf0]  ;;  %1675 = vmatpush.bf16.msra.mxu0 %v3562_v3  ;;  %v3614_v16 = vor.u32 %v4001_v37, %v3611_v18 }
 0x27f   :  { %v5036_v10 = vadd.f32 1e-05, %v1341_v45  ;;  %1724 = vmatpush.bf16.msra.mxu1 %v3626_v33  ;;  %v3986_v60 = vld [vmem:[#allocation5 + $0x214] sm:$0xf0]  ;;  %v3609_v53 = vld [vmem:[#allocation5 + $0x290] sm:$0xf] }
 0x280   :  { %v5038_v9 = vmul.f32 0.0078125, %v1260_v50  ;;  %v1336_v41 = vadd.f32 %v1335_v38, %v1334_v4  ;;  %v3553_v4 = vld [vmem:[#allocation5 + $0x220] sm:$0xf]  ;;  %v3622_v50 = vor.u32 %v4003_v27, %v3619_v0  ;;  %v3988_v38 = vld [vmem:[#allocation5 + $0x224] sm:$0xf0]  ;;  %1774 = vmatpush.bf16.msra.mxu2 %v3558_v61  ;;  %v1365_v33 = vperm.slane %v4700_v8, 1 }
 0x281   :  { %4091 = vrsqrt.f32 %v5036_v10  ;;  %v3983_v27 = vld [vmem:[#allocation5 + $0x204] sm:$0xf]  ;;  %v3539_v3 = vld [vmem:[#allocation5 + $0x208] sm:$0xf0]  ;;  %v3546_v61 = vor.u32 %v3986_v60, %v3545_v23  ;;  %vm1351_vm8 = vweird.f32 %v5036_v10  ;;  %v3984_v19 = vld [vmem:[#allocation5 + $0x204] sm:$0xf0] }
 0x282   :  { %v1338_v11 = vmul.f32 0.0078125, %v1336_v41  ;;  %v1340_v57 = vmul.f32 %v5038_v9, %v5038_v9  ;;  %v3617_v41 = vld [vmem:[#allocation5 + $0x2a0] sm:$0xf]  ;;  %1823 = vmatpush.bf16.msra.mxu3 %v3622_v50  ;;  %v3603_v50 = vld [vmem:[#allocation5 + $0x288] sm:$0xf0] }
 0x283   :  { %v3601_v62 = vld [vmem:[#allocation5 + $0x280] sm:$0xf] }
 0x284   :  { %v1342_v22 = vsub.f32 %v1338_v11, %v1340_v57  ;;  %v4004_v11 = vld [vmem:[#allocation5 + $0x2a4] sm:$0xf0]  ;;  %v3554_v57 = vor.u32 %v3988_v38, %v3553_v4  ;;  %1775 = vmatpush.bf16.msra.mxu2 %v3550_v36 }
 0x286   :  { %v5043_v42 = vadd.f32 1e-05, %v1342_v22  ;;  %v3618_v22 = vor.u32 %v4004_v11, %v3617_v41  ;;  %1676 = vmatpush.bf16.msra.mxu0 %v3554_v57  ;;  %v3542_v41 = vor.u32 %v3983_v27, %v3539_v3  ;;  %v3537_v11 = vld [vmem:[#allocation5 + $0x200] sm:$0xf]  ;;  %1824 = vmatpush.bf16.msra.mxu3 %v3614_v16 }
 0x287   :  { %v5045_v7 = vpop.eup %4091  ;;  %v3538_v60 = vor.u32 %v3984_v19, %v3537_v11 }
 0x288   :  { %v1346_v6 = vmul.f32 %v5045_v7, %v5036_v10  ;;  %4093 = vrsqrt.f32 %v5043_v42  ;;  %vm1352_vm7 = vweird.f32 %v5045_v7  ;;  %1725 = vmatpush.bf16.msra.mxu1 %v3618_v22  ;;  %v4000_v22 = vld [vmem:[#allocation5 + $0x284] sm:$0xf0]  ;;  %1776 = vmatpush.bf16.msra.mxu2 %v3542_v41  ;;  %vm1361_vm11 = vweird.f32 %v5043_v42 }
 0x289   :  { %vm1353_vm9 = vmor %vm1351_vm8, %vm1352_vm7  ;;  %v3602_v10 = vor.u32 %v4000_v22, %v3601_v62 }
 0x28a   :  { %v1347_v45 = vmul.f32 %v5045_v7, %v1346_v6  ;;  %v4002_v6 = vld [vmem:[#allocation5 + $0x294] sm:$0xf0]  ;;  %1677 = vmatpush.bf16.msra.mxu0 %v3546_v61 }
 0x28b   :  { %v3610_v4 = vor.u32 %v4002_v6, %v3609_v53  ;;  %v1366_v6 = vperm.slane %v4700_v8, 5 }
 0x28c   :  { %v1348_v17 = vmul.f32 0.5, %v1347_v45  ;;  %v3999_v45 = vld [vmem:[#allocation5 + $0x284] sm:$0xf] }
 0x28d   :  { %v3606_v57 = vor.u32 %v3999_v45, %v3603_v50  ;;  %1726 = vmatpush.bf16.msra.mxu1 %v3610_v4 }
 0x28e   :  { %v4094_v29 = vpop.eup %4093  ;;  %v1349_v63 = vsub.f32 1.5, %v1348_v17  ;;  %1678 = vmatpush.bf16.msra.mxu0 %v3538_v60 }
 0x28f   :  { %v1356_v0 = vmul.f32 %v4094_v29, %v5043_v42  ;;  %vm1362_vm10 = vweird.f32 %v4094_v29  ;;  %1825 = vmatpush.bf16.msra.mxu3 %v3606_v57 }
 0x290   :  { %v1350_v38 = vmul.f32 %v5045_v7, %v1349_v63  ;;  %vm1363_vm12 = vmor %vm1361_vm11, %vm1362_vm10 }
 0x291   :  { %v1357_v37 = vmul.f32 %v4094_v29, %v1356_v0  ;;  %1727 = vmatpush.bf16.msra.mxu1 %v3602_v10 }
 0x292   :  { %v1354_v17 = vsel %vm1353_vm9, %v5045_v7, %v1350_v38 }
 0x293   :  { %v1369_v18 = vmul.f32 %v1365_v33, %v1354_v17  ;;  %v1358_v23 = vmul.f32 0.5, %v1357_v37 }
 0x295   :  { %v5059_v36 = vperm.slane %v1369_v18, 0  ;;  %v1359_v53 = vsub.f32 1.5, %v1358_v23 }
 0x297   :  { %v5064_v16 = vmul.f32 %v5059_v36, %v5009_v34  ;;  %v1360_v63 = vmul.f32 %v4094_v29, %v1359_v53  ;;  %v1408_v3 = vmul.f32 %v5059_v36, %v4975_v40  ;;  %v1410_v33 = vmul.f32 %v5059_v36, %v4984_v12 }
 0x298   :  { %v1371_v34 = vmul.f32 %v1369_v18, %v5032_v14  ;;  %v1382_v14 = vmul.f32 %v5059_v36, %v4799_v46  ;;  %v1384_v41 = vmul.f32 %v5059_v36, %v4796_v25  ;;  %v1386_v57 = vmul.f32 %v5059_v36, %v4812_v43 }
 0x299   :  { %v1364_v7 = vsel %vm1363_vm12, %v4094_v29, %v1360_v63  ;;  %v1398_v22 = vmul.f32 %v5059_v36, %v4921_v52  ;;  %v1402_v17 = vmul.f32 %v5059_v36, %v4945_v13  ;;  %v1404_v18 = vmul.f32 %v5059_v36, %v4956_v48 }
 0x29a   :  { %v1370_v27 = vmul.f32 %v1366_v6, %v1364_v7 }
 0x29c   :  { %v1372_v0 = vmul.f32 %v1370_v27, %v5038_v9  ;;  %v5072_v61 = vperm.slane %v1370_v27, 0 }
 0x29e   :  { %v1375_v4 = vrot.slane %v1372_v0, 4  ;;  %v1413_v42 = vmul.f32 %v5072_v61, %v5027_v32  ;;  %v1409_v50 = vmul.f32 %v5072_v61, %v5006_v54  ;;  %v1411_v40 = vmul.f32 %v5072_v61, %v5014_v47 }
 0x29f   :  { %v1383_v54 = vmul.f32 %v5072_v61, %v4807_v59  ;;  %v1385_v47 = vmul.f32 %v5072_v61, %v4809_v55  ;;  %v1400_v59 = vmul.f32 %v5059_v36, %v4934_v35  ;;  %v1399_v55 = vmul.f32 %v5072_v61, %v4940_v28 }
 0x2a0   :  { %v1376_v45 = vsel %vm695_vm6, %v1371_v34, %v1375_v4  ;;  %v1401_v43 = vmul.f32 %v5072_v61, %v4968_v51  ;;  %v1403_v52 = vmul.f32 %v5072_v61, %v4978_v44  ;;  %v1406_v35 = vmul.f32 %v5059_v36, %v4966_v26 }
 0x2a1   :  { %v1377_v29 = vrot.slane %v1376_v45, 6  ;;  %v1405_v48 = vmul.f32 %v5072_v61, %v4988_v31  ;;  %v1407_v44 = vmul.f32 %v5072_v61, %v4998_v39 }
 0x2a3   :  { %v1379_v12 = vsub.f32 %v4700_v8, %v1377_v29  ;;  %v1388_v29 = vmul.f32 %v5059_v36, %v4828_v56 }
 0x2a5   :  { %v1415_v9 = vperm.slane %v1379_v12, 2  ;;  %v1416_v38 = vperm.slane %v1379_v12, 6 }
 0x2a7   :  { %v5087_v32 = vperm.slane %v1415_v9, 2  ;;  %v5089_v11 = vperm.slane %v1416_v38, 2 }
 0x2a9   :  { %v1421_v8 = vadd.f32 %v5087_v32, %v1382_v14  ;;  %v1423_v19 = vadd.f32 %v5087_v32, %v1384_v41  ;;  %v1422_v62 = vadd.f32 %v5089_v11, %v1383_v54  ;;  %v1424_v46 = vadd.f32 %v5089_v11, %v1385_v47 }
 0x2aa   :  { %v1437_v23 = vadd.f32 %v5087_v32, %v1398_v22  ;;  %v1439_v28 = vadd.f32 %v5087_v32, %v1400_v59  ;;  %v1438_v13 = vadd.f32 %v5089_v11, %v1399_v55  ;;  %v1440_v60 = vadd.f32 %v5089_v11, %v1401_v43 }
 0x2ab   :  { %v1488_v37 = vpack.c.bf16 %v1423_v19, %v1421_v8  ;;  %v1489_v25 = vpack.c.bf16 %v1424_v46, %v1422_v62  ;;  %v1441_v10 = vadd.f32 %v5087_v32, %v1402_v17  ;;  %v1443_v51 = vadd.f32 %v5087_v32, %v1404_v18 }
 0x2ac   :  { %v1496_v53 = vpack.c.bf16 %v1439_v28, %v1437_v23  ;;  %v1442_v26 = vadd.f32 %v5089_v11, %v1403_v52  ;;  %v1444_v6 = vadd.f32 %v5089_v11, %v1405_v48  ;;  %v1445_v63 = vadd.f32 %v5087_v32, %v1406_v35 }
 0x2ad   :  { %1679 = vmatmul.bf16.vlgmr.msra.gmra.mxu0 %v1488_v37  ;;  %1728 = vmatmul.bf16.vlgmr.msra.gmra.mxu1 %v1489_v25  ;;  %v1497_v7 = vpack.c.bf16 %v1440_v60, %v1438_v13  ;;  %v1498_v27 = vpack.c.bf16 %v1443_v51, %v1441_v10  ;;  %v1447_v31 = vadd.f32 %v5087_v32, %v1408_v3 }
 0x2ae   :  { %1777 = vmatmul.bf16.vlgmr.msra.gmra.mxu2 %v1488_v37  ;;  %1826 = vmatmul.bf16.vlgmr.msra.gmra.mxu3 %v1489_v25  ;;  %v1446_v0 = vadd.f32 %v5089_v11, %v1407_v44  ;;  %v1499_v34 = vpack.c.bf16 %v1444_v6, %v1442_v26  ;;  %v1448_v4 = vadd.f32 %v5089_v11, %v1409_v50 }
 0x2af   :  { %v1449_v45 = vadd.f32 %v5087_v32, %v1410_v33  ;;  %v1451_v39 = vadd.f32 %v5087_v32, %v5064_v16  ;;  %v1500_v12 = vpack.c.bf16 %v1447_v31, %v1445_v63  ;;  %v1450_v9 = vadd.f32 %v5089_v11, %v1411_v40 }
 0x2b0   :  { %v1452_v38 = vadd.f32 %v5089_v11, %v1413_v42  ;;  %v1387_v3 = vmul.f32 %v5072_v61, %v4826_v21  ;;  %v1389_v14 = vmul.f32 %v5072_v61, %v4842_v24  ;;  %v1501_v50 = vpack.c.bf16 %v1448_v4, %v1446_v0 }
 0x2b1   :  { %v1502_v41 = vpack.c.bf16 %v1451_v39, %v1449_v45  ;;  %v1425_v54 = vadd.f32 %v5087_v32, %v1386_v57  ;;  %v1427_v16 = vadd.f32 %v5087_v32, %v1388_v29  ;;  %v1390_v21 = vmul.f32 %v5059_v36, %v4848_v1 }
 0x2b2   :  { %v1503_v33 = vpack.c.bf16 %v1452_v38, %v1450_v9  ;;  %v1426_v56 = vadd.f32 %v5089_v11, %v1387_v3  ;;  %v1428_v47 = vadd.f32 %v5089_v11, %v1389_v14  ;;  %v1392_v24 = vmul.f32 %v5059_v36, %v4873_v2 }
 0x2b3   :  { %v1490_v40 = vpack.c.bf16 %v1427_v16, %v1425_v54  ;;  %v1391_v42 = vmul.f32 %v5072_v61, %v4864_v5  ;;  %v1393_v19 = vmul.f32 %v5072_v61, %v4887_v58  ;;  %v1429_v62 = vadd.f32 %v5087_v32, %v1390_v21  ;;  %v4029_v54 = vld [vmem:[#allocation5 + $0x374] sm:$0xf]  ;;  %v3723_v16 = vld [vmem:[#allocation5 + $0x378] sm:$0xf0] }
 0x2b4   :  { %v1491_v8 = vpack.c.bf16 %v1428_v47, %v1426_v56  ;;  %v1431_v46 = vadd.f32 %v5087_v32, %v1392_v24  ;;  %v1394_v1 = vmul.f32 %v5059_v36, %v4889_v15  ;;  %v1396_v5 = vmul.f32 %v5059_v36, %v4902_v20  ;;  %v5172_v15 = vld [vmem:[#allocation7 + $0x10] sm:$0x77] }
 0x2b5   :  { %v1430_v37 = vadd.f32 %v5089_v11, %v1391_v42  ;;  %v1432_v25 = vadd.f32 %v5089_v11, %v1393_v19  ;;  %v1395_v2 = vmul.f32 %v5072_v61, %v4896_v49  ;;  %v1397_v58 = vmul.f32 %v5072_v61, %v4926_v30  ;;  %v4045_v56 = vld [vmem:[#allocation5 + $0x3f4] sm:$0xf] }
 0x2b6   :  { %v1492_v57 = vpack.c.bf16 %v1431_v46, %v1429_v62  ;;  %v1433_v59 = vadd.f32 %v5087_v32, %v1394_v1  ;;  %v1435_v55 = vadd.f32 %v5087_v32, %v1396_v5  ;;  %v1505_v49 = vperm.slane %v5172_v15, 0  ;;  %v3721_v46 = vld [vmem:[#allocation5 + $0x370] sm:$0xf] }
 0x2b7   :  { %v1493_v22 = vpack.c.bf16 %v1432_v25, %v1430_v37  ;;  %v1434_v17 = vadd.f32 %v5089_v11, %v1395_v2  ;;  %v1436_v18 = vadd.f32 %v5089_v11, %v1397_v58  ;;  %v1506_v61 = vperm.slane %v5172_v15, 4  ;;  %v4030_v37 = vld [vmem:[#allocation5 + $0x374] sm:$0xf0]  ;;  %v3785_v25 = vld [vmem:[#allocation5 + $0x3f0] sm:$0xf] }
 0x2b8   :  { %v1494_v43 = vpack.c.bf16 %v1435_v55, %v1433_v59  ;;  %v5175_v20 = vperm.slane %v1505_v49, 0  ;;  %v4027_v55 = vld [vmem:[#allocation5 + $0x364] sm:$0xf] }
 0x2b9   :  { %v1495_v52 = vpack.c.bf16 %v1436_v18, %v1434_v17  ;;  %v5181_v35 = vperm.slane %v1506_v61, 0  ;;  %v3715_v17 = vld [vmem:[#allocation5 + $0x368] sm:$0xf0]  ;;  %v4043_v18 = vld [vmem:[#allocation5 + $0x3e4] sm:$0xf] }
 0x2bd   :  { %1684 = vmatmul.bf16.gmra.mxu0 %v1490_v40  ;;  %1733 = vmatmul.bf16.gmra.mxu1 %v1491_v8 }
 0x2be   :  { %1782 = vmatmul.bf16.gmra.mxu2 %v1490_v40  ;;  %1831 = vmatmul.bf16.gmra.mxu3 %v1491_v8  ;;  %v3726_v40 = vor.u32 %v4029_v54, %v3723_v16  ;;  %v3787_v8 = vld [vmem:[#allocation5 + $0x3f8] sm:$0xf0] }
 0x2bf   :  { %v3790_v21 = vor.u32 %v4045_v56, %v3787_v8 }
 0x2c0   :  { %2449 = vmatpush.bf16.msrb.mxu2 %v3726_v40 }
 0x2c1   :  { %2498 = vmatpush.bf16.msrb.mxu3 %v3790_v21 }
 0x2cd   :  { %1689 = vmatmul.bf16.gmra.mxu0 %v1492_v57  ;;  %1738 = vmatmul.bf16.gmra.mxu1 %v1493_v22 }
 0x2ce   :  { %1787 = vmatmul.bf16.gmra.mxu2 %v1492_v57  ;;  %1836 = vmatmul.bf16.gmra.mxu3 %v1493_v22  ;;  %v3722_v57 = vor.u32 %v4030_v37, %v3721_v46  ;;  %v4046_v22 = vld [vmem:[#allocation5 + $0x3f4] sm:$0xf0]  ;;  %v3705_v37 = vld [vmem:[#allocation5 + $0x350] sm:$0xf] }
 0x2cf   :  { %v3786_v1 = vor.u32 %v4046_v22, %v3785_v25  ;;  %v4026_v25 = vld [vmem:[#allocation5 + $0x354] sm:$0xf0] }
 0x2d0   :  { %2351 = vmatpush.bf16.msrb.mxu0 %v3722_v57  ;;  %v3769_v57 = vld [vmem:[#allocation5 + $0x3d0] sm:$0xf] }
 0x2d1   :  { %2400 = vmatpush.bf16.msrb.mxu1 %v3786_v1  ;;  %v3706_v1 = vor.u32 %v4026_v25, %v3705_v37 }
 0x2dd   :  { %1694 = vmatmul.bf16.gmra.mxu0 %v1494_v43  ;;  %1743 = vmatmul.bf16.gmra.mxu1 %v1495_v52 }
 0x2de   :  { %1792 = vmatmul.bf16.gmra.mxu2 %v1494_v43  ;;  %1841 = vmatmul.bf16.gmra.mxu3 %v1495_v52  ;;  %v3718_v43 = vor.u32 %v4027_v55, %v3715_v17  ;;  %v3779_v52 = vld [vmem:[#allocation5 + $0x3e8] sm:$0xf0]  ;;  %v4042_v55 = vld [vmem:[#allocation5 + $0x3d4] sm:$0xf0] }
 0x2df   :  { %v3782_v49 = vor.u32 %v4043_v18, %v3779_v52  ;;  %v3770_v17 = vor.u32 %v4042_v55, %v3769_v57 }
 0x2e0   :  { %2450 = vmatpush.bf16.msrb.mxu2 %v3718_v43 }
 0x2e1   :  { %2499 = vmatpush.bf16.msrb.mxu3 %v3782_v49 }
 0x2ed   :  { %1699 = vmatmul.bf16.gmra.mxu0 %v1496_v53  ;;  %1748 = vmatmul.bf16.gmra.mxu1 %v1497_v7 }
 0x2ee   :  { %1797 = vmatmul.bf16.gmra.mxu2 %v1496_v53  ;;  %1846 = vmatmul.bf16.gmra.mxu3 %v1497_v7 }
 0x2fd   :  { %1704 = vmatmul.bf16.gmra.mxu0 %v1498_v27  ;;  %1753 = vmatmul.bf16.gmra.mxu1 %v1499_v34 }
 0x2fe   :  { %1802 = vmatmul.bf16.gmra.mxu2 %v1498_v27  ;;  %1851 = vmatmul.bf16.gmra.mxu3 %v1499_v34 }
 0x30d   :  { %1709 = vmatmul.bf16.gmra.mxu0 %v1500_v12  ;;  %1758 = vmatmul.bf16.gmra.mxu1 %v1501_v50 }
 0x30e   :  { %1807 = vmatmul.bf16.gmra.mxu2 %v1500_v12  ;;  %1856 = vmatmul.bf16.gmra.mxu3 %v1501_v50 }
 0x31d   :  { %1714 = vmatmul.bf16.gmra.mxu0 %v1502_v41  ;;  %1763 = vmatmul.bf16.gmra.mxu1 %v1503_v33 }
 0x31e   :  { %1812 = vmatmul.bf16.gmra.mxu2 %v1502_v41  ;;  %1861 = vmatmul.bf16.gmra.mxu3 %v1503_v33 }
 0x32a   :  { %v1680_v30 = vpop.f32.mrf.mxu0  ;;  %v1729_v36 = vpop.f32.mrf.mxu1 }
 0x32b   :  { %v1681_v32 = vadd.f32 %v1680_v30, %v5175_v20 }
 0x32d   :  { %v5179_v11 = vadd.f32 %v1729_v36, %v1681_v32 }
 0x32f   :  { %v5271_v52 = vmax.f32 %v5179_v11, 0.0 }
 0x331   :  { %v1778_v23 = vpop.f32.mrf.mxu2  ;;  %v1827_v28 = vpop.f32.mrf.mxu3 }
 0x332   :  { %v1779_v13 = vadd.f32 %v1778_v23, %v5181_v35  ;;  %v5184_v48 = vpop.f32.mrf.mxu0  ;;  %v5186_v60 = vpop.f32.mrf.mxu1  ;;  %v3713_v23 = vld [vmem:[#allocation5 + $0x360] sm:$0xf] }
 0x333   :  { %v1683_v16 = vadd.f32 %v5184_v48, %v5175_v20 }
 0x334   :  { %v5188_v10 = vadd.f32 %v1827_v28, %v1779_v13  ;;  %v4028_v28 = vld [vmem:[#allocation5 + $0x364] sm:$0xf0]  ;;  %v3777_v13 = vld [vmem:[#allocation5 + $0x3e0] sm:$0xf] }
 0x335   :  { %v1732_v22 = vadd.f32 %v5186_v60, %v1683_v16 }
 0x337   :  { %v5268_v43 = vmax.f32 %v1732_v22, 0.0 }
 0x339   :  { %v5190_v51 = vpop.f32.mrf.mxu2  ;;  %v5192_v44 = vpop.f32.mrf.mxu3 }
 0x33a   :  { %v1685_v53 = vpop.f32.mrf.mxu0  ;;  %v1734_v26 = vpop.f32.mrf.mxu1  ;;  %v1781_v8 = vadd.f32 %v5190_v51, %v5181_v35 }
 0x33b   :  { %v1686_v6 = vadd.f32 %v1685_v53, %v5175_v20  ;;  %v3714_v53 = vor.u32 %v4028_v28, %v3713_v23 }
 0x33c   :  { %v1830_v18 = vadd.f32 %v5192_v44, %v1781_v8 }
 0x33d   :  { %v5195_v63 = vadd.f32 %v1734_v26, %v1686_v6  ;;  %v4044_v26 = vld [vmem:[#allocation5 + $0x3e4] sm:$0xf0]  ;;  %2352 = vmatpush.bf16.msrb.mxu0 %v3714_v53  ;;  %v4023_v53 = vld [vmem:[#allocation5 + $0x344] sm:$0xf] }
 0x33e   :  { %v3778_v6 = vor.u32 %v4044_v26, %v3777_v13  ;;  %v5281_v44 = vmax.f32 %v1830_v18, 0.0  ;;  %v3699_v26 = vld [vmem:[#allocation5 + $0x348] sm:$0xf0] }
 0x33f   :  { %v5284_v28 = vmax.f32 %v5195_v63, 0.0  ;;  %v1943_v63 = vmul.f32 %v5271_v52, %v5271_v52 }
 0x340   :  { %2401 = vmatpush.bf16.msrb.mxu1 %v3778_v6  ;;  %v4039_v6 = vld [vmem:[#allocation5 + $0x3c4] sm:$0xf] }
 0x341   :  { %v1783_v7 = vpop.f32.mrf.mxu2  ;;  %v1832_v27 = vpop.f32.mrf.mxu3  ;;  %2353 = vmatpush.bf16.msrb.mxu0 %v3706_v1  ;;  %v1947_v8 = vmul.f32 %v5284_v28, %v5284_v28 }
 0x342   :  { %v1784_v31 = vadd.f32 %v1783_v7, %v5181_v35  ;;  %v5198_v0 = vpop.f32.mrf.mxu0  ;;  %v5200_v34 = vpop.f32.mrf.mxu1 }
 0x343   :  { %v1688_v48 = vadd.f32 %v5198_v0, %v5175_v20  ;;  %v5279_v0 = vmax.f32 %v5188_v10, 0.0  ;;  %v1945_v10 = vmul.f32 %v5268_v43, %v5268_v43 }
 0x344   :  { %v5202_v4 = vadd.f32 %v1832_v27, %v1784_v31  ;;  %2402 = vmatpush.bf16.msrb.mxu1 %v3770_v17 }
 0x345   :  { %v1737_v60 = vadd.f32 %v5200_v34, %v1688_v48  ;;  %v1975_v57 = vadd.f32 %v1945_v10, %v1943_v63  ;;  %v1920_v22 = vadd.f32 %v5281_v44, %v5279_v0 }
 0x349   :  { %v5204_v45 = vpop.f32.mrf.mxu2  ;;  %v5206_v39 = vpop.f32.mrf.mxu3 }
 0x34a   :  { %v1690_v29 = vpop.f32.mrf.mxu0  ;;  %v1739_v12 = vpop.f32.mrf.mxu1  ;;  %v1786_v51 = vadd.f32 %v5204_v45, %v5181_v35 }
 0x34b   :  { %v1691_v9 = vadd.f32 %v1690_v29, %v5175_v20 }
 0x34c   :  { %v1835_v11 = vadd.f32 %v5206_v39, %v1786_v51 }
 0x34d   :  { %v5209_v38 = vadd.f32 %v1739_v12, %v1691_v9  ;;  %v4025_v12 = vld [vmem:[#allocation5 + $0x354] sm:$0xf]  ;;  %v3707_v9 = vld [vmem:[#allocation5 + $0x358] sm:$0xf0] }
 0x34e   :  { %v5314_v37 = vmax.f32 %v1835_v11, 0.0 }
 0x351   :  { %v1788_v3 = vpop.f32.mrf.mxu2  ;;  %v1837_v14 = vpop.f32.mrf.mxu3 }
 0x352   :  { %v1789_v50 = vadd.f32 %v1788_v3, %v5181_v35  ;;  %v5212_v41 = vpop.f32.mrf.mxu0  ;;  %v5214_v33 = vpop.f32.mrf.mxu1  ;;  %v4041_v3 = vld [vmem:[#allocation5 + $0x3d4] sm:$0xf] }
 0x353   :  { %v1693_v34 = vadd.f32 %v5212_v41, %v5175_v20  ;;  %v1944_v41 = vmul.f32 %v5279_v0, %v5279_v0 }
 0x354   :  { %v5216_v47 = vadd.f32 %v1837_v14, %v1789_v50  ;;  %v3710_v14 = vor.u32 %v4025_v12, %v3707_v9  ;;  %v3771_v50 = vld [vmem:[#allocation5 + $0x3d8] sm:$0xf0]  ;;  %v3702_v12 = vor.u32 %v4023_v53, %v3699_v26  ;;  %v3763_v9 = vld [vmem:[#allocation5 + $0x3c8] sm:$0xf0]  ;;  %v1976_v53 = vadd.f32 %v1975_v57, %v1947_v8 }
 0x355   :  { %v3774_v54 = vor.u32 %v4041_v3, %v3771_v50  ;;  %v5298_v3 = vmax.f32 %v5202_v4, 0.0  ;;  %v3766_v39 = vor.u32 %v4039_v6, %v3763_v9  ;;  %v1946_v50 = vmul.f32 %v5281_v44, %v5281_v44 }
 0x356   :  { %2451 = vmatpush.bf16.msrb.mxu2 %v3710_v14  ;;  %v5300_v14 = vmax.f32 %v1737_v60, 0.0  ;;  %v1899_v4 = vadd.f32 %v5268_v43, %v5271_v52  ;;  %v1742_v25 = vadd.f32 %v5214_v33, %v1693_v34  ;;  %v5336_v51 = vmax.f32 %v5216_v47, 0.0 }
 0x357   :  { %2500 = vmatpush.bf16.msrb.mxu3 %v3774_v54  ;;  %v1948_v55 = vmul.f32 %v5298_v3, %v5298_v3  ;;  %v1921_v26 = vadd.f32 %v1920_v22, %v5298_v3 }
 0x358   :  { %v1900_v1 = vadd.f32 %v1899_v4, %v5284_v28  ;;  %v1949_v48 = vmul.f32 %v5300_v14, %v5300_v14  ;;  %v5345_v6 = vmax.f32 %v1742_v25, 0.0 }
 0x359   :  { %v5218_v24 = vpop.f32.mrf.mxu2  ;;  %v5220_v42 = vpop.f32.mrf.mxu3 }
 0x35a   :  { %v5222_v19 = vpop.f32.mrf.mxu0  ;;  %v5224_v62 = vpop.f32.mrf.mxu1  ;;  %v1791_v54 = vadd.f32 %v5218_v24, %v5181_v35  ;;  %2452 = vmatpush.bf16.msrb.mxu2 %v3702_v12  ;;  %v5320_v24 = vmax.f32 %v5209_v38, 0.0  ;;  %v1996_v38 = vadd.f32 %v1946_v50, %v1944_v41  ;;  %v1901_v10 = vadd.f32 %v1900_v1, %v5300_v14 }
 0x35b   :  { %v1696_v16 = vadd.f32 %v5222_v19, %v5175_v20  ;;  %2501 = vmatpush.bf16.msrb.mxu3 %v3766_v39  ;;  %v1977_v9 = vadd.f32 %v1976_v53, %v1949_v48  ;;  %v1922_v41 = vadd.f32 %v1921_v26, %v5314_v37  ;;  %v1952_v50 = vmul.f32 %v5336_v51, %v5336_v51 }
 0x35c   :  { %v1951_v47 = vmul.f32 %v5320_v24, %v5320_v24  ;;  %v1997_v12 = vadd.f32 %v1996_v38, %v1948_v55  ;;  %v1902_v4 = vadd.f32 %v1901_v10, %v5320_v24 }
 0x35d   :  { %v1745_v60 = vadd.f32 %v5224_v62, %v1696_v16  ;;  %v1923_v22 = vadd.f32 %v1922_v41, %v5336_v51 }
 0x35e   :  { %v1978_v8 = vadd.f32 %v1977_v9, %v1951_v47  ;;  %v1903_v38 = vadd.f32 %v1902_v4, %v5345_v6 }
 0x35f   :  { %v5361_v16 = vmax.f32 %v1745_v60, 0.0 }
 0x361   :  { %v5226_v5 = vpop.f32.mrf.mxu2  ;;  %v5228_v2 = vpop.f32.mrf.mxu3 }
 0x362   :  { %v5230_v58 = vpop.f32.mrf.mxu0  ;;  %v5232_v59 = vpop.f32.mrf.mxu1  ;;  %v1794_v19 = vadd.f32 %v5226_v5, %v5181_v35  ;;  %v1840_v5 = vadd.f32 %v5220_v42, %v1791_v54 }
 0x363   :  { %v1698_v33 = vadd.f32 %v5230_v58, %v5175_v20  ;;  %v1950_v58 = vmul.f32 %v5314_v37, %v5314_v37 }
 0x364   :  { %v1843_v42 = vadd.f32 %v5228_v2, %v1794_v19  ;;  %v5359_v54 = vmax.f32 %v1840_v5, 0.0 }
 0x365   :  { %v1747_v63 = vadd.f32 %v5232_v59, %v1698_v33  ;;  %v1998_v2 = vadd.f32 %v1997_v12, %v1950_v58  ;;  %v1904_v58 = vadd.f32 %v1903_v38, %v5361_v16 }
 0x367   :  { %v5374_v19 = vmax.f32 %v1747_v63, 0.0 }
 0x369   :  { %v5234_v30 = vpop.f32.mrf.mxu2  ;;  %v5236_v36 = vpop.f32.mrf.mxu3 }
 0x36a   :  { %v5238_v61 = vpop.f32.mrf.mxu0  ;;  %v5240_v32 = vpop.f32.mrf.mxu1  ;;  %v1796_v39 = vadd.f32 %v5234_v30, %v5181_v35  ;;  %v5368_v30 = vmax.f32 %v1843_v42, 0.0 }
 0x36b   :  { %v1701_v62 = vadd.f32 %v5238_v61, %v5175_v20  ;;  %v1953_v61 = vmul.f32 %v5345_v6, %v5345_v6 }
 0x36c   :  { %v1845_v1 = vadd.f32 %v5236_v36, %v1796_v39  ;;  %v1924_v36 = vadd.f32 %v1923_v22, %v5359_v54  ;;  %v1956_v10 = vmul.f32 %v5368_v30, %v5368_v30 }
 0x36d   :  { %v1750_v25 = vadd.f32 %v5240_v32, %v1701_v62  ;;  %v1954_v32 = vmul.f32 %v5359_v54, %v5359_v54  ;;  %v1979_v53 = vadd.f32 %v1978_v8, %v1953_v61  ;;  %v1957_v62 = vmul.f32 %v5374_v19, %v5374_v19 }
 0x36e   :  { %v5398_v12 = vmax.f32 %v1845_v1, 0.0  ;;  %v1925_v39 = vadd.f32 %v1924_v36, %v5368_v30 }
 0x36f   :  { %v5393_v47 = vmax.f32 %v1750_v25, 0.0 }
 0x370   :  { %v1958_v1 = vmul.f32 %v5398_v12, %v5398_v12 }
 0x371   :  { %v5242_v7 = vpop.f32.mrf.mxu2  ;;  %v5244_v27 = vpop.f32.mrf.mxu3 }
 0x372   :  { %v5246_v31 = vpop.f32.mrf.mxu0  ;;  %v5248_v29 = vpop.f32.mrf.mxu1  ;;  %v1799_v57 = vadd.f32 %v5242_v7, %v5181_v35  ;;  %v1955_v7 = vmul.f32 %v5361_v16, %v5361_v16 }
 0x373   :  { %v1703_v59 = vadd.f32 %v5246_v31, %v5175_v20  ;;  %v1999_v31 = vadd.f32 %v1998_v2, %v1952_v50  ;;  %v1905_v50 = vadd.f32 %v1904_v58, %v5374_v19 }
 0x374   :  { %v1848_v42 = vadd.f32 %v5244_v27, %v1799_v57 }
 0x375   :  { %v1752_v26 = vadd.f32 %v5248_v29, %v1703_v59  ;;  %v2000_v63 = vadd.f32 %v1999_v31, %v1954_v32 }
 0x377   :  { %v5406_v2 = vmax.f32 %v1752_v26, 0.0  ;;  %v2001_v61 = vadd.f32 %v2000_v63, %v1956_v10 }
 0x379   :  { %v5252_v56 = vpop.f32.mrf.mxu2  ;;  %v5254_v40 = vpop.f32.mrf.mxu3 }
 0x37a   :  { %v5258_v21 = vpop.f32.mrf.mxu0  ;;  %v5260_v46 = vpop.f32.mrf.mxu1  ;;  %v1801_v41 = vadd.f32 %v5252_v56, %v5181_v35  ;;  %v1926_v56 = vadd.f32 %v1925_v39, %v5398_v12 }
 0x37b   :  { %v1706_v55 = vadd.f32 %v5258_v21, %v5175_v20 }
 0x37c   :  { %v1850_v31 = vadd.f32 %v5254_v40, %v1801_v41 }
 0x37d   :  { %v1755_v9 = vadd.f32 %v5260_v46, %v1706_v55  ;;  %v1959_v46 = vmul.f32 %v5393_v47, %v5393_v47  ;;  %v1906_v55 = vadd.f32 %v1905_v50, %v5393_v47 }
 0x37f   :  { %v5417_v25 = vmax.f32 %v1755_v9, 0.0 }
 0x381   :  { %v5274_v49 = vpop.f32.mrf.mxu2  ;;  %v5276_v23 = vpop.f32.mrf.mxu3  ;;  %v1963_v58 = vmul.f32 %v5417_v25, %v5417_v25 }
 0x382   :  { %v5286_v45 = vpop.f32.mrf.mxu0  ;;  %v5288_v13 = vpop.f32.mrf.mxu1  ;;  %v1804_v59 = vadd.f32 %v5274_v49, %v5181_v35 }
 0x383   :  { %v1708_v21 = vadd.f32 %v5286_v45, %v5175_v20  ;;  %v1980_v45 = vadd.f32 %v1979_v53, %v1955_v7  ;;  %v1961_v7 = vmul.f32 %v5406_v2, %v5406_v2 }
 0x385   :  { %v1757_v27 = vadd.f32 %v5288_v13, %v1708_v21  ;;  %v1981_v8 = vadd.f32 %v1980_v45, %v1957_v62  ;;  %v1853_v21 = vadd.f32 %v5276_v23, %v1804_v59  ;;  %v2002_v62 = vadd.f32 %v2001_v61, %v1958_v1 }
 0x387   :  { %v1982_v36 = vadd.f32 %v1981_v8, %v1959_v46  ;;  %v5450_v50 = vmax.f32 %v1853_v21, 0.0 }
 0x389   :  { %v5331_v17 = vpop.f32.mrf.mxu2  ;;  %v5333_v18 = vpop.f32.mrf.mxu3  ;;  %v1983_v63 = vadd.f32 %v1982_v36, %v1961_v7  ;;  %v1964_v7 = vmul.f32 %v5450_v50, %v5450_v50 }
 0x38a   :  { %v1710_v11 = vpop.f32.mrf.mxu0  ;;  %v5340_v34 = vpop.f32.mrf.mxu1  ;;  %v1806_v38 = vadd.f32 %v5331_v17, %v5181_v35  ;;  %v1907_v17 = vadd.f32 %v1906_v55, %v5406_v2 }
 0x38b   :  { %v1711_v29 = vadd.f32 %v1710_v11, %v5175_v20  ;;  %v5412_v11 = vmax.f32 %v1848_v42, 0.0 }
 0x38c   :  { %v1855_v9 = vadd.f32 %v5333_v18, %v1806_v38  ;;  %v1908_v23 = vadd.f32 %v1907_v17, %v5417_v25 }
 0x38d   :  { %v1760_v57 = vadd.f32 %v5340_v34, %v1711_v29  ;;  %v1960_v26 = vmul.f32 %v5412_v11, %v5412_v11  ;;  %v1927_v39 = vadd.f32 %v1926_v56, %v5412_v11 }
 0x38f   :  { %v5438_v10 = vmax.f32 %v1760_v57, 0.0  ;;  %v2003_v41 = vadd.f32 %v2002_v62, %v1960_v26 }
 0x391   :  { %v1808_v48 = vpop.f32.mrf.mxu2  ;;  %v5379_v33 = vpop.f32.mrf.mxu3  ;;  %v1967_v61 = vmul.f32 %v5438_v10, %v5438_v10 }
 0x392   :  { %v1712_v5 = vpop.f32.mrf.mxu0  ;;  %v1761_v60 = vpop.f32.mrf.mxu1  ;;  %v1809_v40 = vadd.f32 %v1808_v48, %v5181_v35 }
 0x393   :  { %v1713_v4 = vadd.f32 %v1712_v5, %v5175_v20  ;;  %v5428_v5 = vmax.f32 %v1757_v27, 0.0 }
 0x394   :  { %v1858_v27 = vadd.f32 %v5379_v33, %v1809_v40 }
 0x395   :  { %v1762_v34 = vadd.f32 %v1761_v60, %v1713_v4  ;;  %v5440_v60 = vmax.f32 %v1850_v31, 0.0  ;;  %v1965_v48 = vmul.f32 %v5428_v5, %v5428_v5  ;;  %v1984_v4 = vadd.f32 %v1983_v63, %v1963_v58 }
 0x396   :  { %v1909_v18 = vadd.f32 %v1908_v23, %v5428_v5 }
 0x397   :  { %v5447_v45 = vmax.f32 %v1762_v34, 0.0  ;;  %v1962_v57 = vmul.f32 %v5440_v60, %v5440_v60  ;;  %v1985_v33 = vadd.f32 %v1984_v4, %v1965_v48  ;;  %v5470_v34 = vmax.f32 %v1858_v27, 0.0 }
 0x398   :  { %v1910_v31 = vadd.f32 %v1909_v18, %v5438_v10 }
 0x399   :  { %v1810_v22 = vpop.f32.mrf.mxu2  ;;  %v1859_v13 = vpop.f32.mrf.mxu3  ;;  %v1969_v38 = vmul.f32 %v5447_v45, %v5447_v45  ;;  %v1986_v36 = vadd.f32 %v1985_v33, %v1967_v61  ;;  %v2004_v17 = vadd.f32 %v2003_v41, %v1962_v57  ;;  %v1968_v48 = vmul.f32 %v5470_v34, %v5470_v34 }
 0x39a   :  { %v1715_v49 = vpop.f32.mrf.mxu0  ;;  %v1764_v32 = vpop.f32.mrf.mxu1  ;;  %v1811_v29 = vadd.f32 %v1810_v22, %v5181_v35  ;;  %v5460_v22 = vmax.f32 %v1855_v9, 0.0  ;;  %v1911_v26 = vadd.f32 %v1910_v31, %v5447_v45 }
 0x39b   :  { %v1716_v53 = vadd.f32 %v1715_v49, %v5175_v20  ;;  %v1987_v62 = vadd.f32 %v1986_v36, %v1969_v38  ;;  %v2005_v63 = vadd.f32 %v2004_v17, %v1964_v7 }
 0x39c   :  { %v1860_v56 = vadd.f32 %v1859_v13, %v1811_v29 }
 0x39d   :  { %v1765_v42 = vadd.f32 %v1764_v32, %v1716_v53  ;;  %v1928_v32 = vadd.f32 %v1927_v39, %v5440_v60 }
 0x39f   :  { %v5456_v46 = vmax.f32 %v1765_v42, 0.0  ;;  %v1929_v58 = vadd.f32 %v1928_v32, %v5450_v50  ;;  %v5478_v42 = vmax.f32 %v1860_v56, 0.0 }
 0x3a1   :  { %v1813_v59 = vpop.f32.mrf.mxu2  ;;  %v1862_v8 = vpop.f32.mrf.mxu3  ;;  %v1971_v21 = vmul.f32 %v5456_v46, %v5456_v46  ;;  %v1912_v9 = vadd.f32 %v1911_v26, %v5456_v46  ;;  %v1930_v23 = vadd.f32 %v1929_v58, %v5460_v22 }
 0x3a2   :  { %v1814_v1 = vadd.f32 %v1813_v59, %v5181_v35  ;;  %v1717_v55 = vpop.f32.mrf.mxu0  ;;  %v1766_v13 = vpop.f32.mrf.mxu1 }
 0x3a3   :  { %v1718_v49 = vadd.f32 %v1717_v55, %v5175_v20  ;;  %v1966_v20 = vmul.f32 %v5460_v22, %v5460_v22  ;;  %v1988_v41 = vadd.f32 %v1987_v62, %v1971_v21  ;;  %v1931_v59 = vadd.f32 %v1930_v23, %v5470_v34 }
 0x3a4   :  { %v1863_v53 = vadd.f32 %v1862_v8, %v1814_v1  ;;  %v1970_v8 = vmul.f32 %v5478_v42, %v5478_v42 }
 0x3a5   :  { %v1767_v40 = vadd.f32 %v1766_v13, %v1718_v49  ;;  %v2006_v61 = vadd.f32 %v2005_v63, %v1966_v20  ;;  %v1932_v31 = vadd.f32 %v1931_v59, %v5478_v42 }
 0x3a6   :  { %v5486_v39 = vmax.f32 %v1863_v53, 0.0 }
 0x3a7   :  { %v5481_v29 = vmax.f32 %v1767_v40, 0.0  ;;  %v2007_v33 = vadd.f32 %v2006_v61, %v1968_v48  ;;  %v4024_v61 = vld [vmem:[#allocation5 + $0x344] sm:$0xf0] }
 0x3a8   :  { %v1972_v38 = vmul.f32 %v5486_v39, %v5486_v39  ;;  %v1933_v13 = vadd.f32 %v1932_v31, %v5486_v39 }
 0x3a9   :  { %v1913_v27 = vadd.f32 %v1912_v9, %v5481_v29  ;;  %v1973_v4 = vmul.f32 %v5481_v29, %v5481_v29  ;;  %v1815_v18 = vpop.f32.mrf.mxu2  ;;  %v1864_v55 = vpop.f32.mrf.mxu3  ;;  %v2008_v53 = vadd.f32 %v2007_v33, %v1970_v8  ;;  %v3761_v8 = vld [vmem:[#allocation5 + $0x3c0] sm:$0xf] }
 0x3aa   :  { %v1816_v57 = vadd.f32 %v1815_v18, %v5181_v35  ;;  %v3697_v18 = vld [vmem:[#allocation5 + $0x340] sm:$0xf] }
 0x3ab   :  { %v1914_v56 = vrot.slane %v1913_v27, 4  ;;  %v1989_v1 = vadd.f32 %v1988_v41, %v1973_v4  ;;  %v2009_v35 = vadd.f32 %v2008_v53, %v1972_v38  ;;  %v3698_v59 = vor.u32 %v4024_v61, %v3697_v18  ;;  %v3689_v18 = vld [vmem:[#allocation5 + $0x330] sm:$0xf] }
 0x3ac   :  { %v1865_v49 = vadd.f32 %v1864_v55, %v1816_v57  ;;  %v4040_v57 = vld [vmem:[#allocation5 + $0x3c4] sm:$0xf0] }
 0x3ad   :  { %v1915_v32 = vadd.f32 %v1914_v56, %v1913_v27  ;;  %v1990_v7 = vrot.slane %v1989_v1, 4  ;;  %v3762_v31 = vor.u32 %v4040_v57, %v3761_v8  ;;  %2354 = vmatpush.bf16.msrb.mxu0 %v3698_v59  ;;  %v4022_v8 = vld [vmem:[#allocation5 + $0x334] sm:$0xf0]  ;;  %v3753_v57 = vld [vmem:[#allocation5 + $0x3b0] sm:$0xf] }
 0x3ae   :  { %v5499_v36 = vmax.f32 %v1865_v49, 0.0 }
 0x3af   :  { %v1916_v26 = vrot.slane %v1915_v32, 2  ;;  %v1991_v21 = vadd.f32 %v1990_v7, %v1989_v1  ;;  %2403 = vmatpush.bf16.msrb.mxu1 %v3762_v31  ;;  %v3683_v31 = vld [vmem:[#allocation5 + $0x328] sm:$0xf0] }
 0x3b0   :  { %v1934_v40 = vadd.f32 %v1933_v13, %v5499_v36  ;;  %v1974_v17 = vmul.f32 %v5499_v36, %v5499_v36 }
 0x3b1   :  { %v1917_v58 = vadd.f32 %v1916_v26, %v1915_v32  ;;  %v1992_v20 = vrot.slane %v1991_v21, 2 }
 0x3b2   :  { %v1935_v62 = vrot.slane %v1934_v40, 4  ;;  %v2010_v9 = vadd.f32 %v2009_v35, %v1974_v17 }
 0x3b3   :  { %v1918_v63 = vrot.slane %v1917_v58, 1  ;;  %v1993_v23 = vadd.f32 %v1992_v20, %v1991_v21 }
 0x3b4   :  { %v1936_v48 = vadd.f32 %v1935_v62, %v1934_v40  ;;  %v2011_v41 = vrot.slane %v2010_v9, 4 }
 0x3b5   :  { %v1919_v27 = vadd.f32 %v1918_v63, %v1917_v58  ;;  %v1994_v4 = vrot.slane %v1993_v23, 1  ;;  %v4021_v63 = vld [vmem:[#allocation5 + $0x334] sm:$0xf] }
 0x3b6   :  { %v1937_v56 = vrot.slane %v1936_v48, 2  ;;  %v2012_v1 = vadd.f32 %v2011_v41, %v2010_v9 }
 0x3b7   :  { %v5504_v55 = vmul.f32 0.0078125, %v1919_v27  ;;  %v1995_v33 = vadd.f32 %v1994_v4, %v1993_v23  ;;  %v3691_v23 = vld [vmem:[#allocation5 + $0x338] sm:$0xf0] }
 0x3b8   :  { %v1938_v38 = vadd.f32 %v1937_v56, %v1936_v48  ;;  %v2013_v49 = vrot.slane %v2012_v1, 2  ;;  %v4037_v48 = vld [vmem:[#allocation5 + $0x3b4] sm:$0xf]  ;;  %v3694_v27 = vor.u32 %v4021_v63, %v3691_v23  ;;  %v3755_v4 = vld [vmem:[#allocation5 + $0x3b8] sm:$0xf0] }
 0x3b9   :  { %v2017_v32 = vmul.f32 0.0078125, %v1995_v33  ;;  %v2019_v7 = vmul.f32 %v5504_v55, %v5504_v55  ;;  %v3758_v59 = vor.u32 %v4037_v48, %v3755_v4  ;;  %v4038_v56 = vld [vmem:[#allocation5 + $0x3b4] sm:$0xf0]  ;;  %v4019_v33 = vld [vmem:[#allocation5 + $0x324] sm:$0xf] }
 0x3ba   :  { %v1939_v53 = vrot.slane %v1938_v38, 1  ;;  %v2014_v13 = vadd.f32 %v2013_v49, %v2012_v1  ;;  %2453 = vmatpush.bf16.msrb.mxu2 %v3694_v27  ;;  %v3690_v49 = vor.u32 %v4022_v8, %v3689_v18  ;;  %v4017_v63 = vld [vmem:[#allocation5 + $0x314] sm:$0xf]  ;;  %v3675_v23 = vld [vmem:[#allocation5 + $0x318] sm:$0xf0] }
 0x3bb   :  { %v2021_v26 = vsub.f32 %v2017_v32, %v2019_v7  ;;  %2502 = vmatpush.bf16.msrb.mxu3 %v3758_v59  ;;  %v3754_v32 = vor.u32 %v4038_v56, %v3753_v57  ;;  %v3686_v7 = vor.u32 %v4019_v33, %v3683_v31  ;;  %v4033_v48 = vld [vmem:[#allocation5 + $0x394] sm:$0xf]  ;;  %v3678_v4 = vor.u32 %v4017_v63, %v3675_v23  ;;  %v3739_v18 = vld [vmem:[#allocation5 + $0x398] sm:$0xf0]  ;;  %v3673_v59 = vld [vmem:[#allocation5 + $0x310] sm:$0xf] }
 0x3bc   :  { %v1940_v21 = vadd.f32 %v1939_v53, %v1938_v38  ;;  %v2015_v35 = vrot.slane %v2014_v13, 1  ;;  %v4035_v38 = vld [vmem:[#allocation5 + $0x3a4] sm:$0xf]  ;;  %v3747_v53 = vld [vmem:[#allocation5 + $0x3a8] sm:$0xf0]  ;;  %2355 = vmatpush.bf16.msrb.mxu0 %v3690_v49  ;;  %v3742_v8 = vor.u32 %v4033_v48, %v3739_v18 }
 0x3bd   :  { %v5508_v40 = vadd.f32 1e-05, %v2021_v26  ;;  %2404 = vmatpush.bf16.msrb.mxu1 %v3754_v32  ;;  %v4018_v57 = vld [vmem:[#allocation5 + $0x314] sm:$0xf0]  ;;  %v3737_v56 = vld [vmem:[#allocation5 + $0x390] sm:$0xf] }
 0x3be   :  { %v5510_v17 = vmul.f32 0.0078125, %v1940_v21  ;;  %v2016_v58 = vadd.f32 %v2015_v35, %v2014_v13  ;;  %v3681_v13 = vld [vmem:[#allocation5 + $0x320] sm:$0xf]  ;;  %v3750_v21 = vor.u32 %v4035_v38, %v3747_v53  ;;  %v4020_v35 = vld [vmem:[#allocation5 + $0x324] sm:$0xf0]  ;;  %2454 = vmatpush.bf16.msrb.mxu2 %v3686_v7  ;;  %v2045_v32 = vperm.slane %v5172_v15, 1 }
 0x3bf   :  { %4095 = vrsqrt.f32 %v5508_v40  ;;  %v4015_v38 = vld [vmem:[#allocation5 + $0x304] sm:$0xf]  ;;  %v3667_v49 = vld [vmem:[#allocation5 + $0x308] sm:$0xf0]  ;;  %v3674_v7 = vor.u32 %v4018_v57, %v3673_v59  ;;  %vm2031_vm14 = vweird.f32 %v5508_v40  ;;  %v4016_v63 = vld [vmem:[#allocation5 + $0x304] sm:$0xf0] }
 0x3c0   :  { %v2018_v20 = vmul.f32 0.0078125, %v2016_v58  ;;  %v2020_v62 = vmul.f32 %v5510_v17, %v5510_v17  ;;  %v3745_v58 = vld [vmem:[#allocation5 + $0x3a0] sm:$0xf]  ;;  %2503 = vmatpush.bf16.msrb.mxu3 %v3750_v21  ;;  %v3731_v21 = vld [vmem:[#allocation5 + $0x388] sm:$0xf0] }
 0x3c1   :  { %v3729_v23 = vld [vmem:[#allocation5 + $0x380] sm:$0xf] }
 0x3c2   :  { %v2022_v9 = vsub.f32 %v2018_v20, %v2020_v62  ;;  %v4036_v20 = vld [vmem:[#allocation5 + $0x3a4] sm:$0xf0]  ;;  %v3682_v62 = vor.u32 %v4020_v35, %v3681_v13  ;;  %2455 = vmatpush.bf16.msrb.mxu2 %v3678_v4 }
 0x3c4   :  { %v5515_v41 = vadd.f32 1e-05, %v2022_v9  ;;  %v3746_v9 = vor.u32 %v4036_v20, %v3745_v58  ;;  %2356 = vmatpush.bf16.msrb.mxu0 %v3682_v62  ;;  %v3670_v58 = vor.u32 %v4015_v38, %v3667_v49  ;;  %v3665_v20 = vld [vmem:[#allocation5 + $0x300] sm:$0xf]  ;;  %2504 = vmatpush.bf16.msrb.mxu3 %v3742_v8 }
 0x3c5   :  { %v5517_v61 = vpop.eup %4095  ;;  %v3666_v57 = vor.u32 %v4016_v63, %v3665_v20 }
 0x3c6   :  { %v2026_v1 = vmul.f32 %v5517_v61, %v5508_v40  ;;  %4097 = vrsqrt.f32 %v5515_v41  ;;  %vm2032_vm13 = vweird.f32 %v5517_v61  ;;  %2405 = vmatpush.bf16.msrb.mxu1 %v3746_v9  ;;  %v4032_v9 = vld [vmem:[#allocation5 + $0x384] sm:$0xf0]  ;;  %2456 = vmatpush.bf16.msrb.mxu2 %v3670_v58  ;;  %vm2041_vm1 = vweird.f32 %v5515_v41 }
 0x3c7   :  { %vm2033_vm15 = vmor %vm2031_vm14, %vm2032_vm13  ;;  %v3730_v40 = vor.u32 %v4032_v9, %v3729_v23 }
 0x3c8   :  { %v2027_v26 = vmul.f32 %v5517_v61, %v2026_v1  ;;  %v4034_v1 = vld [vmem:[#allocation5 + $0x394] sm:$0xf0]  ;;  %2357 = vmatpush.bf16.msrb.mxu0 %v3674_v7 }
 0x3c9   :  { %v3738_v13 = vor.u32 %v4034_v1, %v3737_v56  ;;  %v2046_v1 = vperm.slane %v5172_v15, 5 }
 0x3ca   :  { %v2028_v27 = vmul.f32 0.5, %v2027_v26  ;;  %v4031_v26 = vld [vmem:[#allocation5 + $0x384] sm:$0xf] }
 0x3cb   :  { %v3734_v62 = vor.u32 %v4031_v26, %v3731_v21  ;;  %2406 = vmatpush.bf16.msrb.mxu1 %v3738_v13 }
 0x3cc   :  { %v4098_v33 = vpop.eup %4097  ;;  %v2029_v31 = vsub.f32 1.5, %v2028_v27  ;;  %2358 = vmatpush.bf16.msrb.mxu0 %v3666_v57 }
 0x3cd   :  { %v2036_v53 = vmul.f32 %v4098_v33, %v5515_v41  ;;  %vm2042_vm0 = vweird.f32 %v4098_v33  ;;  %2505 = vmatpush.bf16.msrb.mxu3 %v3734_v62 }
 0x3ce   :  { %v2030_v35 = vmul.f32 %v5517_v61, %v2029_v31  ;;  %vm2043_vm2 = vmor %vm2041_vm1, %vm2042_vm0 }
 0x3cf   :  { %v2037_v48 = vmul.f32 %v4098_v33, %v2036_v53  ;;  %2407 = vmatpush.bf16.msrb.mxu1 %v3730_v40 }
 0x3d0   :  { %v2034_v27 = vsel %vm2033_vm15, %v5517_v61, %v2030_v35 }
 0x3d1   :  { %v2049_v18 = vmul.f32 %v2045_v32, %v2034_v27  ;;  %v2038_v59 = vmul.f32 0.5, %v2037_v48 }
 0x3d3   :  { %v5531_v4 = vperm.slane %v2049_v18, 0  ;;  %v2039_v56 = vsub.f32 1.5, %v2038_v59 }
 0x3d5   :  { %v5536_v8 = vmul.f32 %v5531_v4, %v5481_v29  ;;  %v2040_v31 = vmul.f32 %v4098_v33, %v2039_v56  ;;  %v2088_v49 = vmul.f32 %v5531_v4, %v5447_v45  ;;  %v2090_v32 = vmul.f32 %v5531_v4, %v5456_v46 }
 0x3d6   :  { %v2051_v29 = vmul.f32 %v2049_v18, %v5504_v55  ;;  %v2062_v55 = vmul.f32 %v5531_v4, %v5271_v52  ;;  %v2064_v58 = vmul.f32 %v5531_v4, %v5268_v43  ;;  %v2066_v62 = vmul.f32 %v5531_v4, %v5284_v28 }
 0x3d7   :  { %v2044_v61 = vsel %vm2043_vm2, %v4098_v33, %v2040_v31  ;;  %v2078_v9 = vmul.f32 %v5531_v4, %v5393_v47  ;;  %v2082_v27 = vmul.f32 %v5531_v4, %v5417_v25  ;;  %v2084_v18 = vmul.f32 %v5531_v4, %v5428_v5 }
 0x3d8   :  { %v2050_v38 = vmul.f32 %v2046_v1, %v2044_v61 }
 0x3da   :  { %v2052_v53 = vmul.f32 %v2050_v38, %v5510_v17  ;;  %v5544_v7 = vperm.slane %v2050_v38, 0 }
 0x3dc   :  { %v2055_v13 = vrot.slane %v2052_v53, 4  ;;  %v2093_v41 = vmul.f32 %v5544_v7, %v5499_v36  ;;  %v2089_v21 = vmul.f32 %v5544_v7, %v5478_v42  ;;  %v2091_v45 = vmul.f32 %v5544_v7, %v5486_v39 }
 0x3dd   :  { %v2063_v42 = vmul.f32 %v5544_v7, %v5279_v0  ;;  %v2065_v39 = vmul.f32 %v5544_v7, %v5281_v44  ;;  %v2080_v0 = vmul.f32 %v5531_v4, %v5406_v2  ;;  %v2079_v44 = vmul.f32 %v5544_v7, %v5412_v11 }
 0x3de   :  { %v2056_v26 = vsel %vm695_vm6, %v2051_v29, %v2055_v13  ;;  %v2081_v28 = vmul.f32 %v5544_v7, %v5440_v60  ;;  %v2083_v47 = vmul.f32 %v5544_v7, %v5450_v50  ;;  %v2086_v2 = vmul.f32 %v5531_v4, %v5438_v10 }
 0x3df   :  { %v2057_v33 = vrot.slane %v2056_v26, 6  ;;  %v2085_v5 = vmul.f32 %v5544_v7, %v5460_v22  ;;  %v2087_v50 = vmul.f32 %v5544_v7, %v5470_v34 }
 0x3e1   :  { %v2059_v46 = vsub.f32 %v5172_v15, %v2057_v33  ;;  %v2068_v33 = vmul.f32 %v5531_v4, %v5300_v14 }
 0x3e3   :  { %v2095_v17 = vperm.slane %v2059_v46, 2  ;;  %v2096_v35 = vperm.slane %v2059_v46, 6 }
 0x3e5   :  { %v5559_v36 = vperm.slane %v2095_v17, 2  ;;  %v5561_v20 = vperm.slane %v2096_v35, 2 }
 0x3e7   :  { %v2101_v15 = vadd.f32 %v5559_v36, %v2062_v55  ;;  %v2103_v63 = vadd.f32 %v5559_v36, %v2064_v58  ;;  %v2102_v23 = vadd.f32 %v5561_v20, %v2063_v42  ;;  %v2104_v52 = vadd.f32 %v5561_v20, %v2065_v39 }
 0x3e8   :  { %v2117_v59 = vadd.f32 %v5559_v36, %v2078_v9  ;;  %v2119_v11 = vadd.f32 %v5559_v36, %v2080_v0  ;;  %v2118_v25 = vadd.f32 %v5561_v20, %v2079_v44  ;;  %v2120_v57 = vadd.f32 %v5561_v20, %v2081_v28 }
 0x3e9   :  { %v2168_v48 = vpack.c.bf16 %v2103_v63, %v2101_v15  ;;  %v2169_v43 = vpack.c.bf16 %v2104_v52, %v2102_v23  ;;  %v2121_v40 = vadd.f32 %v5559_v36, %v2082_v27  ;;  %v2123_v60 = vadd.f32 %v5559_v36, %v2084_v18 }
 0x3ea   :  { %v2176_v56 = vpack.c.bf16 %v2119_v11, %v2117_v59  ;;  %v2122_v10 = vadd.f32 %v5561_v20, %v2083_v47  ;;  %v2124_v1 = vadd.f32 %v5561_v20, %v2085_v5  ;;  %v2125_v31 = vadd.f32 %v5559_v36, %v2086_v2 }
 0x3eb   :  { %2359 = vmatmul.bf16.vlgmr.msrb.gmra.mxu0 %v2168_v48  ;;  %2408 = vmatmul.bf16.vlgmr.msrb.gmra.mxu1 %v2169_v43  ;;  %v2177_v61 = vpack.c.bf16 %v2120_v57, %v2118_v25  ;;  %v2178_v38 = vpack.c.bf16 %v2123_v60, %v2121_v40  ;;  %v2127_v22 = vadd.f32 %v5559_v36, %v2088_v49 }
 0x3ec   :  { %2457 = vmatmul.bf16.vlgmr.msrb.gmra.mxu2 %v2168_v48  ;;  %2506 = vmatmul.bf16.vlgmr.msrb.gmra.mxu3 %v2169_v43  ;;  %v2126_v53 = vadd.f32 %v5561_v20, %v2087_v50  ;;  %v2179_v29 = vpack.c.bf16 %v2124_v1, %v2122_v10  ;;  %v2128_v13 = vadd.f32 %v5561_v20, %v2089_v21 }
 0x3ed   :  { %v2129_v26 = vadd.f32 %v5559_v36, %v2090_v32  ;;  %v2131_v34 = vadd.f32 %v5559_v36, %v5536_v8  ;;  %v2180_v46 = vpack.c.bf16 %v2127_v22, %v2125_v31  ;;  %v2130_v17 = vadd.f32 %v5561_v20, %v2091_v45 }
 0x3ee   :  { %v2132_v35 = vadd.f32 %v5561_v20, %v2093_v41  ;;  %v2067_v49 = vmul.f32 %v5544_v7, %v5298_v3  ;;  %v2069_v55 = vmul.f32 %v5544_v7, %v5314_v37  ;;  %v2181_v21 = vpack.c.bf16 %v2128_v13, %v2126_v53 }
 0x3ef   :  { %v2182_v58 = vpack.c.bf16 %v2131_v34, %v2129_v26  ;;  %v2105_v42 = vadd.f32 %v5559_v36, %v2066_v62  ;;  %v2107_v8 = vadd.f32 %v5559_v36, %v2068_v33  ;;  %v2070_v3 = vmul.f32 %v5531_v4, %v5320_v24 }
 0x3f0   :  { %v2183_v32 = vpack.c.bf16 %v2132_v35, %v2130_v17  ;;  %v2106_v14 = vadd.f32 %v5561_v20, %v2067_v49  ;;  %v2108_v39 = vadd.f32 %v5561_v20, %v2069_v55  ;;  %v2072_v37 = vmul.f32 %v5531_v4, %v5345_v6 }
 0x3f1   :  { %v2170_v45 = vpack.c.bf16 %v2107_v8, %v2105_v42  ;;  %v2071_v41 = vmul.f32 %v5544_v7, %v5336_v51  ;;  %v2073_v63 = vmul.f32 %v5544_v7, %v5359_v54  ;;  %v2109_v23 = vadd.f32 %v5559_v36, %v2070_v3  ;;  %v4061_v42 = vld [vmem:[#allocation5 + $0x474] sm:$0xf]  ;;  %v3851_v8 = vld [vmem:[#allocation5 + $0x478] sm:$0xf0] }
 0x3f2   :  { %v2171_v15 = vpack.c.bf16 %v2108_v39, %v2106_v14  ;;  %v2111_v52 = vadd.f32 %v5559_v36, %v2072_v37  ;;  %v2074_v24 = vmul.f32 %v5531_v4, %v5361_v16  ;;  %v2076_v51 = vmul.f32 %v5531_v4, %v5374_v19  ;;  %v5644_v16 = vld [vmem:[#allocation7 + $0x18] sm:$0x77]  ;;  %v4077_v14 = vld [vmem:[#allocation5 + $0x4f4] sm:$0xf] }
 0x3f3   :  { %v2110_v48 = vadd.f32 %v5561_v20, %v2071_v41  ;;  %v2112_v43 = vadd.f32 %v5561_v20, %v2073_v63  ;;  %v2075_v6 = vmul.f32 %v5544_v7, %v5368_v30  ;;  %v2077_v54 = vmul.f32 %v5544_v7, %v5398_v12 }
 0x3f4   :  { %v2172_v62 = vpack.c.bf16 %v2111_v52, %v2109_v23  ;;  %v2113_v0 = vadd.f32 %v5559_v36, %v2074_v24  ;;  %v2115_v44 = vadd.f32 %v5559_v36, %v2076_v51  ;;  %v2185_v30 = vperm.slane %v5644_v16, 0  ;;  %v3849_v52 = vld [vmem:[#allocation5 + $0x470] sm:$0xf] }
 0x3f5   :  { %v2173_v9 = vpack.c.bf16 %v2112_v43, %v2110_v48  ;;  %v2114_v27 = vadd.f32 %v5561_v20, %v2075_v6  ;;  %v2116_v18 = vadd.f32 %v5561_v20, %v2077_v54  ;;  %v2186_v7 = vperm.slane %v5644_v16, 4  ;;  %v4062_v48 = vld [vmem:[#allocation5 + $0x474] sm:$0xf0] }
 0x3f6   :  { %v2174_v28 = vpack.c.bf16 %v2115_v44, %v2113_v0  ;;  %v5647_v19 = vperm.slane %v2185_v30, 0  ;;  %v3850_v43 = vor.u32 %v4062_v48, %v3849_v52  ;;  %v4059_v44 = vld [vmem:[#allocation5 + $0x464] sm:$0xf]  ;;  %v3833_v48 = vld [vmem:[#allocation5 + $0x450] sm:$0xf] }
 0x3f7   :  { %v2175_v47 = vpack.c.bf16 %v2116_v18, %v2114_v27  ;;  %v5653_v2 = vperm.slane %v2186_v7, 0  ;;  %v3843_v27 = vld [vmem:[#allocation5 + $0x468] sm:$0xf0]  ;;  %v4075_v18 = vld [vmem:[#allocation5 + $0x4e4] sm:$0xf] }
 0x3f8   :  { %3031 = vmatpush.bf16.msra.mxu0 %v3850_v43  ;;  %v4058_v43 = vld [vmem:[#allocation5 + $0x454] sm:$0xf0] }
 0x3fb   :  { %2364 = vmatmul.bf16.gmra.mxu0 %v2170_v45  ;;  %2413 = vmatmul.bf16.gmra.mxu1 %v2171_v15 }
 0x3fc   :  { %2462 = vmatmul.bf16.gmra.mxu2 %v2170_v45  ;;  %2511 = vmatmul.bf16.gmra.mxu3 %v2171_v15  ;;  %v3854_v45 = vor.u32 %v4061_v42, %v3851_v8  ;;  %v3915_v15 = vld [vmem:[#allocation5 + $0x4f8] sm:$0xf0] }
 0x3fd   :  { %v3918_v3 = vor.u32 %v4077_v14, %v3915_v15 }
 0x3fe   :  { %3129 = vmatpush.bf16.msra.mxu2 %v3854_v45 }
 0x3ff   :  { %3178 = vmatpush.bf16.msra.mxu3 %v3918_v3 }
 0x40b   :  { %2369 = vmatmul.bf16.gmra.mxu0 %v2172_v62  ;;  %2418 = vmatmul.bf16.gmra.mxu1 %v2173_v9 }
 0x40c   :  { %2467 = vmatmul.bf16.gmra.mxu2 %v2172_v62  ;;  %2516 = vmatmul.bf16.gmra.mxu3 %v2173_v9  ;;  %v3913_v62 = vld [vmem:[#allocation5 + $0x4f0] sm:$0xf]  ;;  %v4078_v9 = vld [vmem:[#allocation5 + $0x4f4] sm:$0xf0] }
 0x40d   :  { %v3914_v24 = vor.u32 %v4078_v9, %v3913_v62  ;;  %v3834_v9 = vor.u32 %v4058_v43, %v3833_v48 }
 0x40f   :  { %3080 = vmatpush.bf16.msra.mxu1 %v3914_v24  ;;  %v3897_v24 = vld [vmem:[#allocation5 + $0x4d0] sm:$0xf] }
 0x41b   :  { %2374 = vmatmul.bf16.gmra.mxu0 %v2174_v28  ;;  %2423 = vmatmul.bf16.gmra.mxu1 %v2175_v47 }
 0x41c   :  { %2472 = vmatmul.bf16.gmra.mxu2 %v2174_v28  ;;  %2521 = vmatmul.bf16.gmra.mxu3 %v2175_v47  ;;  %v3846_v28 = vor.u32 %v4059_v44, %v3843_v27  ;;  %v3907_v47 = vld [vmem:[#allocation5 + $0x4e8] sm:$0xf0]  ;;  %v4074_v44 = vld [vmem:[#allocation5 + $0x4d4] sm:$0xf0] }
 0x41d   :  { %v3910_v30 = vor.u32 %v4075_v18, %v3907_v47 }
 0x41e   :  { %3130 = vmatpush.bf16.msra.mxu2 %v3846_v28 }
 0x41f   :  { %3179 = vmatpush.bf16.msra.mxu3 %v3910_v30 }
 0x42b   :  { %2379 = vmatmul.bf16.gmra.mxu0 %v2176_v56  ;;  %2428 = vmatmul.bf16.gmra.mxu1 %v2177_v61 }
 0x42c   :  { %2477 = vmatmul.bf16.gmra.mxu2 %v2176_v56  ;;  %2526 = vmatmul.bf16.gmra.mxu3 %v2177_v61 }
 0x43b   :  { %2384 = vmatmul.bf16.gmra.mxu0 %v2178_v38  ;;  %2433 = vmatmul.bf16.gmra.mxu1 %v2179_v29 }
 0x43c   :  { %2482 = vmatmul.bf16.gmra.mxu2 %v2178_v38  ;;  %2531 = vmatmul.bf16.gmra.mxu3 %v2179_v29 }
 0x44b   :  { %2389 = vmatmul.bf16.gmra.mxu0 %v2180_v46  ;;  %2438 = vmatmul.bf16.gmra.mxu1 %v2181_v21 }
 0x44c   :  { %2487 = vmatmul.bf16.gmra.mxu2 %v2180_v46  ;;  %2536 = vmatmul.bf16.gmra.mxu3 %v2181_v21 }
 0x45b   :  { %2394 = vmatmul.bf16.gmra.mxu0 %v2182_v58  ;;  %2443 = vmatmul.bf16.gmra.mxu1 %v2183_v32 }
 0x45c   :  { %2492 = vmatmul.bf16.gmra.mxu2 %v2182_v58  ;;  %2541 = vmatmul.bf16.gmra.mxu3 %v2183_v32 }
 0x468   :  { %v2360_v12 = vpop.f32.mrf.mxu0  ;;  %v2409_v4 = vpop.f32.mrf.mxu1 }
 0x469   :  { %v2361_v36 = vadd.f32 %v2360_v12, %v5647_v19 }
 0x46b   :  { %v5651_v20 = vadd.f32 %v2409_v4, %v2361_v36 }
 0x46d   :  { %v5743_v47 = vmax.f32 %v5651_v20, 0.0 }
 0x46f   :  { %v2458_v59 = vpop.f32.mrf.mxu2  ;;  %v2507_v11 = vpop.f32.mrf.mxu3 }
 0x470   :  { %v2459_v25 = vadd.f32 %v2458_v59, %v5653_v2  ;;  %v5656_v5 = vpop.f32.mrf.mxu0  ;;  %v5658_v57 = vpop.f32.mrf.mxu1  ;;  %v3841_v59 = vld [vmem:[#allocation5 + $0x460] sm:$0xf] }
 0x471   :  { %v2363_v8 = vadd.f32 %v5656_v5, %v5647_v19  ;;  %v3898_v5 = vor.u32 %v4074_v44, %v3897_v24 }
 0x472   :  { %v5660_v40 = vadd.f32 %v2507_v11, %v2459_v25  ;;  %v4060_v11 = vld [vmem:[#allocation5 + $0x464] sm:$0xf0] }
 0x473   :  { %v3842_v25 = vor.u32 %v4060_v11, %v3841_v59  ;;  %v2412_v62 = vadd.f32 %v5658_v57, %v2363_v8 }
 0x475   :  { %3032 = vmatpush.bf16.msra.mxu0 %v3842_v25  ;;  %v5738_v18 = vmax.f32 %v2412_v62, 0.0 }
 0x477   :  { %v5662_v60 = vpop.f32.mrf.mxu2  ;;  %v5664_v50 = vpop.f32.mrf.mxu3  ;;  %v2625_v20 = vmul.f32 %v5738_v18, %v5738_v18 }
 0x478   :  { %v2365_v56 = vpop.f32.mrf.mxu0  ;;  %v2414_v10 = vpop.f32.mrf.mxu1  ;;  %v2461_v14 = vadd.f32 %v5662_v60, %v5653_v2 }
 0x479   :  { %v2366_v1 = vadd.f32 %v2365_v56, %v5647_v19  ;;  %v3905_v56 = vld [vmem:[#allocation5 + $0x4e0] sm:$0xf]  ;;  %3033 = vmatpush.bf16.msra.mxu0 %v3834_v9 }
 0x47a   :  { %v2510_v27 = vadd.f32 %v5664_v50, %v2461_v14 }
 0x47b   :  { %v5667_v31 = vadd.f32 %v2414_v10, %v2366_v1  ;;  %v4076_v10 = vld [vmem:[#allocation5 + $0x4e4] sm:$0xf0] }
 0x47c   :  { %v3906_v1 = vor.u32 %v4076_v10, %v3905_v56  ;;  %v5745_v57 = vmax.f32 %v2510_v27, 0.0  ;;  %v4055_v10 = vld [vmem:[#allocation5 + $0x444] sm:$0xf] }
 0x47d   :  { %v5756_v11 = vmax.f32 %v5667_v31, 0.0 }
 0x47e   :  { %3081 = vmatpush.bf16.msra.mxu1 %v3906_v1  ;;  %v3827_v1 = vld [vmem:[#allocation5 + $0x448] sm:$0xf0] }
 0x47f   :  { %v2463_v61 = vpop.f32.mrf.mxu2  ;;  %v2512_v38 = vpop.f32.mrf.mxu3  ;;  %v3830_v31 = vor.u32 %v4055_v10, %v3827_v1  ;;  %v3825_v10 = vld [vmem:[#allocation5 + $0x440] sm:$0xf]  ;;  %v4056_v1 = vld [vmem:[#allocation5 + $0x444] sm:$0xf0] }
 0x480   :  { %v2464_v22 = vadd.f32 %v2463_v61, %v5653_v2  ;;  %v5670_v53 = vpop.f32.mrf.mxu0  ;;  %v5672_v29 = vpop.f32.mrf.mxu1 }
 0x481   :  { %v2368_v60 = vadd.f32 %v5670_v53, %v5647_v19  ;;  %v5753_v53 = vmax.f32 %v5660_v40, 0.0  ;;  %v2623_v40 = vmul.f32 %v5743_v47, %v5743_v47 }
 0x482   :  { %v5674_v13 = vadd.f32 %v2512_v38, %v2464_v22  ;;  %3082 = vmatpush.bf16.msra.mxu1 %v3898_v5 }
 0x483   :  { %v2417_v30 = vadd.f32 %v5672_v29, %v2368_v60  ;;  %v2655_v48 = vadd.f32 %v2625_v20, %v2623_v40  ;;  %v2600_v9 = vadd.f32 %v5745_v57, %v5753_v53 }
 0x487   :  { %v5676_v26 = vpop.f32.mrf.mxu2  ;;  %v5678_v34 = vpop.f32.mrf.mxu3 }
 0x488   :  { %v2370_v33 = vpop.f32.mrf.mxu0  ;;  %v2419_v46 = vpop.f32.mrf.mxu1  ;;  %v2466_v28 = vadd.f32 %v5676_v26, %v5653_v2 }
 0x489   :  { %v2371_v17 = vadd.f32 %v2370_v33, %v5647_v19 }
 0x48a   :  { %v2515_v56 = vadd.f32 %v5678_v34, %v2466_v28 }
 0x48b   :  { %v5681_v35 = vadd.f32 %v2419_v46, %v2371_v17  ;;  %v4057_v46 = vld [vmem:[#allocation5 + $0x454] sm:$0xf]  ;;  %v3835_v17 = vld [vmem:[#allocation5 + $0x458] sm:$0xf0] }
 0x48c   :  { %v5786_v43 = vmax.f32 %v2515_v56, 0.0 }
 0x48f   :  { %v2468_v49 = vpop.f32.mrf.mxu2  ;;  %v2517_v55 = vpop.f32.mrf.mxu3 }
 0x490   :  { %v2469_v21 = vadd.f32 %v2468_v49, %v5653_v2  ;;  %v5684_v58 = vpop.f32.mrf.mxu0  ;;  %v5686_v32 = vpop.f32.mrf.mxu1  ;;  %v4073_v49 = vld [vmem:[#allocation5 + $0x4d4] sm:$0xf] }
 0x491   :  { %v2373_v29 = vadd.f32 %v5684_v58, %v5647_v19  ;;  %v2579_v58 = vadd.f32 %v5738_v18, %v5743_v47 }
 0x492   :  { %v5688_v39 = vadd.f32 %v2517_v55, %v2469_v21  ;;  %v3838_v55 = vor.u32 %v4057_v46, %v3835_v17  ;;  %v3899_v21 = vld [vmem:[#allocation5 + $0x4d8] sm:$0xf0]  ;;  %v4071_v46 = vld [vmem:[#allocation5 + $0x4c4] sm:$0xf]  ;;  %v3891_v17 = vld [vmem:[#allocation5 + $0x4c8] sm:$0xf0] }
 0x493   :  { %v3902_v42 = vor.u32 %v4073_v49, %v3899_v21  ;;  %v2626_v49 = vmul.f32 %v5745_v57, %v5745_v57  ;;  %v5774_v21 = vmax.f32 %v2417_v30, 0.0  ;;  %v3894_v34 = vor.u32 %v4071_v46, %v3891_v17 }
 0x494   :  { %3131 = vmatpush.bf16.msra.mxu2 %v3838_v55  ;;  %v5772_v55 = vmax.f32 %v5674_v13, 0.0  ;;  %v2624_v13 = vmul.f32 %v5753_v53, %v5753_v53  ;;  %v2422_v62 = vadd.f32 %v5686_v32, %v2373_v29  ;;  %v2580_v24 = vadd.f32 %v2579_v58, %v5756_v11 }
 0x495   :  { %3180 = vmatpush.bf16.msra.mxu3 %v3902_v42  ;;  %v2627_v42 = vmul.f32 %v5756_v11, %v5756_v11  ;;  %v2629_v27 = vmul.f32 %v5774_v21, %v5774_v21 }
 0x496   :  { %v2676_v44 = vadd.f32 %v2626_v49, %v2624_v13  ;;  %v2628_v5 = vmul.f32 %v5772_v55, %v5772_v55  ;;  %v2601_v46 = vadd.f32 %v2600_v9, %v5772_v55  ;;  %v5817_v40 = vmax.f32 %v2422_v62, 0.0 }
 0x497   :  { %v5690_v37 = vpop.f32.mrf.mxu2  ;;  %v5692_v41 = vpop.f32.mrf.mxu3  ;;  %v2656_v30 = vadd.f32 %v2655_v48, %v2627_v42 }
 0x498   :  { %v5694_v63 = vpop.f32.mrf.mxu0  ;;  %v5696_v23 = vpop.f32.mrf.mxu1  ;;  %v2471_v8 = vadd.f32 %v5690_v37, %v5653_v2  ;;  %3132 = vmatpush.bf16.msra.mxu2 %v3830_v31  ;;  %v5793_v37 = vmax.f32 %v5681_v35, 0.0  ;;  %v5808_v35 = vmax.f32 %v5688_v39, 0.0  ;;  %v3826_v31 = vor.u32 %v4056_v1, %v3825_v10 }
 0x499   :  { %v2376_v14 = vadd.f32 %v5694_v63, %v5647_v19  ;;  %3181 = vmatpush.bf16.msra.mxu3 %v3894_v34  ;;  %v2581_v39 = vadd.f32 %v2580_v24, %v5774_v21  ;;  %v2677_v49 = vadd.f32 %v2676_v44, %v2628_v5  ;;  %v2657_v34 = vadd.f32 %v2656_v30, %v2629_v27 }
 0x49a   :  { %3034 = vmatpush.bf16.msra.mxu0 %v3826_v31  ;;  %v2633_v62 = vmul.f32 %v5817_v40, %v5817_v40 }
 0x49b   :  { %v2425_v20 = vadd.f32 %v5696_v23, %v2376_v14  ;;  %v2632_v14 = vmul.f32 %v5808_v35, %v5808_v35 }
 0x49d   :  { %v5833_v48 = vmax.f32 %v2425_v20, 0.0 }
 0x49f   :  { %v5698_v51 = vpop.f32.mrf.mxu2  ;;  %v5700_v6 = vpop.f32.mrf.mxu3 }
 0x4a0   :  { %v5702_v54 = vpop.f32.mrf.mxu0  ;;  %v5704_v0 = vpop.f32.mrf.mxu1  ;;  %v2474_v63 = vadd.f32 %v5698_v51, %v5653_v2  ;;  %v2520_v51 = vadd.f32 %v5692_v41, %v2471_v8  ;;  %v2631_v41 = vmul.f32 %v5793_v37, %v5793_v37  ;;  %v2602_v8 = vadd.f32 %v2601_v46, %v5786_v43 }
 0x4a1   :  { %v2378_v32 = vadd.f32 %v5702_v54, %v5647_v19  ;;  %v2630_v54 = vmul.f32 %v5786_v43, %v5786_v43 }
 0x4a2   :  { %v2523_v23 = vadd.f32 %v5700_v6, %v2474_v63  ;;  %v5831_v13 = vmax.f32 %v2520_v51, 0.0  ;;  %v2603_v44 = vadd.f32 %v2602_v8, %v5808_v35 }
 0x4a3   :  { %v2427_v58 = vadd.f32 %v5704_v0, %v2378_v32  ;;  %v2678_v6 = vadd.f32 %v2677_v49, %v2630_v54 }
 0x4a4   :  { %v5840_v9 = vmax.f32 %v2523_v23, 0.0 }
 0x4a5   :  { %v5846_v5 = vmax.f32 %v2427_v58, 0.0 }
 0x4a7   :  { %v5706_v12 = vpop.f32.mrf.mxu2  ;;  %v5708_v4 = vpop.f32.mrf.mxu3 }
 0x4a8   :  { %v5710_v7 = vpop.f32.mrf.mxu0  ;;  %v5712_v36 = vpop.f32.mrf.mxu1  ;;  %v2476_v42 = vadd.f32 %v5706_v12, %v5653_v2  ;;  %v2658_v12 = vadd.f32 %v2657_v34, %v2631_v41 }
 0x4a9   :  { %v2381_v17 = vadd.f32 %v5710_v7, %v5647_v19  ;;  %v2582_v7 = vadd.f32 %v2581_v39, %v5793_v37  ;;  %v2636_v39 = vmul.f32 %v5840_v9, %v5840_v9 }
 0x4aa   :  { %v2525_v27 = vadd.f32 %v5708_v4, %v2476_v42  ;;  %v2659_v46 = vadd.f32 %v2658_v12, %v2633_v62  ;;  %v2604_v4 = vadd.f32 %v2603_v44, %v5831_v13 }
 0x4ab   :  { %v2430_v24 = vadd.f32 %v5712_v36, %v2381_v17  ;;  %v2583_v20 = vadd.f32 %v2582_v7, %v5817_v40  ;;  %v2634_v36 = vmul.f32 %v5831_v13, %v5831_v13  ;;  %v2637_v17 = vmul.f32 %v5846_v5, %v5846_v5 }
 0x4ac   :  { %v5870_v49 = vmax.f32 %v2525_v27, 0.0  ;;  %v2605_v42 = vadd.f32 %v2604_v4, %v5840_v9 }
 0x4ad   :  { %v2584_v31 = vadd.f32 %v2583_v20, %v5833_v48  ;;  %v5865_v41 = vmax.f32 %v2430_v24, 0.0 }
 0x4ae   :  { %v2638_v27 = vmul.f32 %v5870_v49, %v5870_v49 }
 0x4af   :  { %v5714_v61 = vpop.f32.mrf.mxu2  ;;  %v5716_v38 = vpop.f32.mrf.mxu3 }
 0x4b0   :  { %v5718_v22 = vpop.f32.mrf.mxu0  ;;  %v5720_v33 = vpop.f32.mrf.mxu1  ;;  %v2479_v63 = vadd.f32 %v5714_v61, %v5653_v2  ;;  %v2635_v61 = vmul.f32 %v5833_v48, %v5833_v48 }
 0x4b1   :  { %v2383_v0 = vadd.f32 %v5718_v22, %v5647_v19  ;;  %v2679_v22 = vadd.f32 %v2678_v6, %v2632_v14  ;;  %v2585_v14 = vadd.f32 %v2584_v31, %v5846_v5 }
 0x4b2   :  { %v2528_v23 = vadd.f32 %v5716_v38, %v2479_v63 }
 0x4b3   :  { %v2432_v54 = vadd.f32 %v5720_v33, %v2383_v0  ;;  %v2680_v58 = vadd.f32 %v2679_v22, %v2634_v36 }
 0x4b5   :  { %v5878_v6 = vmax.f32 %v2432_v54, 0.0  ;;  %v2681_v62 = vadd.f32 %v2680_v58, %v2636_v39 }
 0x4b7   :  { %v5726_v45 = vpop.f32.mrf.mxu2  ;;  %v5728_v15 = vpop.f32.mrf.mxu3 }
 0x4b8   :  { %v5730_v3 = vpop.f32.mrf.mxu0  ;;  %v5732_v52 = vpop.f32.mrf.mxu1  ;;  %v2481_v8 = vadd.f32 %v5726_v45, %v5653_v2  ;;  %v2606_v45 = vadd.f32 %v2605_v42, %v5870_v49 }
 0x4b9   :  { %v2386_v32 = vadd.f32 %v5730_v3, %v5647_v19 }
 0x4ba   :  { %v2530_v22 = vadd.f32 %v5728_v15, %v2481_v8 }
 0x4bb   :  { %v2435_v34 = vadd.f32 %v5732_v52, %v2386_v32  ;;  %v2639_v52 = vmul.f32 %v5865_v41, %v5865_v41  ;;  %v2586_v32 = vadd.f32 %v2585_v14, %v5865_v41 }
 0x4bd   :  { %v5889_v24 = vmax.f32 %v2435_v34, 0.0 }
 0x4bf   :  { %v5748_v59 = vpop.f32.mrf.mxu2  ;;  %v5750_v50 = vpop.f32.mrf.mxu3  ;;  %v2643_v31 = vmul.f32 %v5889_v24, %v5889_v24 }
 0x4c0   :  { %v5758_v25 = vpop.f32.mrf.mxu0  ;;  %v5760_v26 = vpop.f32.mrf.mxu1  ;;  %v2484_v0 = vadd.f32 %v5748_v59, %v5653_v2 }
 0x4c1   :  { %v2388_v3 = vadd.f32 %v5758_v25, %v5647_v19  ;;  %v2660_v25 = vadd.f32 %v2659_v46, %v2635_v61  ;;  %v2641_v61 = vmul.f32 %v5878_v6, %v5878_v6 }
 0x4c3   :  { %v2437_v38 = vadd.f32 %v5760_v26, %v2388_v3  ;;  %v2661_v12 = vadd.f32 %v2660_v25, %v2637_v17  ;;  %v2533_v3 = vadd.f32 %v5750_v50, %v2484_v0  ;;  %v2682_v17 = vadd.f32 %v2681_v62, %v2638_v27 }
 0x4c5   :  { %v2662_v4 = vadd.f32 %v2661_v12, %v2639_v52  ;;  %v5922_v14 = vmax.f32 %v2533_v3, 0.0 }
 0x4c7   :  { %v5803_v60 = vpop.f32.mrf.mxu2  ;;  %v5805_v28 = vpop.f32.mrf.mxu3  ;;  %v2663_v58 = vadd.f32 %v2662_v4, %v2641_v61  ;;  %v2644_v61 = vmul.f32 %v5922_v14, %v5922_v14 }
 0x4c8   :  { %v2390_v56 = vpop.f32.mrf.mxu0  ;;  %v5812_v29 = vpop.f32.mrf.mxu1  ;;  %v2486_v20 = vadd.f32 %v5803_v60, %v5653_v2  ;;  %v2587_v60 = vadd.f32 %v2586_v32, %v5878_v6 }
 0x4c9   :  { %v2391_v33 = vadd.f32 %v2390_v56, %v5647_v19  ;;  %v5884_v56 = vmax.f32 %v2528_v23, 0.0 }
 0x4ca   :  { %v2535_v34 = vadd.f32 %v5805_v28, %v2486_v20  ;;  %v2588_v50 = vadd.f32 %v2587_v60, %v5889_v24 }
 0x4cb   :  { %v2440_v63 = vadd.f32 %v5812_v29, %v2391_v33  ;;  %v2640_v54 = vmul.f32 %v5884_v56, %v5884_v56  ;;  %v2607_v42 = vadd.f32 %v2606_v45, %v5884_v56 }
 0x4cd   :  { %v5910_v39 = vmax.f32 %v2440_v63, 0.0  ;;  %v2683_v8 = vadd.f32 %v2682_v17, %v2640_v54 }
 0x4cf   :  { %v2488_v30 = vpop.f32.mrf.mxu2  ;;  %v5851_v51 = vpop.f32.mrf.mxu3  ;;  %v2647_v62 = vmul.f32 %v5910_v39, %v5910_v39 }
 0x4d0   :  { %v2392_v10 = vpop.f32.mrf.mxu0  ;;  %v2441_v1 = vpop.f32.mrf.mxu1  ;;  %v2489_v15 = vadd.f32 %v2488_v30, %v5653_v2 }
 0x4d1   :  { %v2393_v7 = vadd.f32 %v2392_v10, %v5647_v19  ;;  %v5900_v10 = vmax.f32 %v2437_v38, 0.0 }
 0x4d2   :  { %v2538_v38 = vadd.f32 %v5851_v51, %v2489_v15 }
 0x4d3   :  { %v2442_v29 = vadd.f32 %v2441_v1, %v2393_v7  ;;  %v5912_v1 = vmax.f32 %v2530_v22, 0.0  ;;  %v2645_v30 = vmul.f32 %v5900_v10, %v5900_v10  ;;  %v2664_v7 = vadd.f32 %v2663_v58, %v2643_v31 }
 0x4d4   :  { %v2589_v28 = vadd.f32 %v2588_v50, %v5900_v10 }
 0x4d5   :  { %v5919_v25 = vmax.f32 %v2442_v29, 0.0  ;;  %v2642_v63 = vmul.f32 %v5912_v1, %v5912_v1  ;;  %v2665_v51 = vadd.f32 %v2664_v7, %v2645_v30  ;;  %v5942_v29 = vmax.f32 %v2538_v38, 0.0 }
 0x4d6   :  { %v2590_v22 = vadd.f32 %v2589_v28, %v5910_v39 }
 0x4d7   :  { %v2490_v44 = vpop.f32.mrf.mxu2  ;;  %v2539_v26 = vpop.f32.mrf.mxu3  ;;  %v2649_v20 = vmul.f32 %v5919_v25, %v5919_v25  ;;  %v2666_v4 = vadd.f32 %v2665_v51, %v2647_v62  ;;  %v2684_v60 = vadd.f32 %v2683_v8, %v2642_v63  ;;  %v2648_v30 = vmul.f32 %v5942_v29, %v5942_v29 }
 0x4d8   :  { %v2395_v59 = vpop.f32.mrf.mxu0  ;;  %v2444_v36 = vpop.f32.mrf.mxu1  ;;  %v2491_v33 = vadd.f32 %v2490_v44, %v5653_v2  ;;  %v5932_v44 = vmax.f32 %v2535_v34, 0.0  ;;  %v2591_v54 = vadd.f32 %v2590_v22, %v5919_v25 }
 0x4d9   :  { %v2396_v46 = vadd.f32 %v2395_v59, %v5647_v19  ;;  %v2667_v17 = vadd.f32 %v2666_v4, %v2649_v20  ;;  %v2685_v58 = vadd.f32 %v2684_v60, %v2644_v61 }
 0x4da   :  { %v2540_v45 = vadd.f32 %v2539_v26, %v2491_v33 }
 0x4db   :  { %v2445_v23 = vadd.f32 %v2444_v36, %v2396_v46  ;;  %v2608_v36 = vadd.f32 %v2607_v42, %v5912_v1 }
 0x4dd   :  { %v5928_v52 = vmax.f32 %v2445_v23, 0.0  ;;  %v2609_v31 = vadd.f32 %v2608_v36, %v5922_v14  ;;  %v5950_v23 = vmax.f32 %v2540_v45, 0.0 }
 0x4df   :  { %v2493_v0 = vpop.f32.mrf.mxu2  ;;  %v2542_v12 = vpop.f32.mrf.mxu3  ;;  %v2651_v3 = vmul.f32 %v5928_v52, %v5928_v52  ;;  %v2592_v34 = vadd.f32 %v2591_v54, %v5928_v52  ;;  %v2610_v50 = vadd.f32 %v2609_v31, %v5932_v44 }
 0x4e0   :  { %v2494_v27 = vadd.f32 %v2493_v0, %v5653_v2  ;;  %v2397_v32 = vpop.f32.mrf.mxu0  ;;  %v2446_v26 = vpop.f32.mrf.mxu1 }
 0x4e1   :  { %v2398_v59 = vadd.f32 %v2397_v32, %v5647_v19  ;;  %v2646_v19 = vmul.f32 %v5932_v44, %v5932_v44  ;;  %v2668_v8 = vadd.f32 %v2667_v17, %v2651_v3  ;;  %v2611_v0 = vadd.f32 %v2610_v50, %v5942_v29 }
 0x4e2   :  { %v2543_v46 = vadd.f32 %v2542_v12, %v2494_v27  ;;  %v2650_v12 = vmul.f32 %v5950_v23, %v5950_v23 }
 0x4e3   :  { %v2447_v15 = vadd.f32 %v2446_v26, %v2398_v59  ;;  %v2686_v62 = vadd.f32 %v2685_v58, %v2646_v19  ;;  %v2612_v22 = vadd.f32 %v2611_v0, %v5950_v23 }
 0x4e4   :  { %v5958_v42 = vmax.f32 %v2543_v46, 0.0 }
 0x4e5   :  { %v5953_v33 = vmax.f32 %v2447_v15, 0.0  ;;  %v2687_v51 = vadd.f32 %v2686_v62, %v2648_v30  ;;  %v4072_v62 = vld [vmem:[#allocation5 + $0x4c4] sm:$0xf0] }
 0x4e6   :  { %v2652_v20 = vmul.f32 %v5958_v42, %v5958_v42  ;;  %v2613_v26 = vadd.f32 %v2612_v22, %v5958_v42 }
 0x4e7   :  { %v2593_v38 = vadd.f32 %v2592_v34, %v5953_v33  ;;  %v2653_v7 = vmul.f32 %v5953_v33, %v5953_v33  ;;  %v2495_v28 = vpop.f32.mrf.mxu2  ;;  %v2544_v32 = vpop.f32.mrf.mxu3  ;;  %v2688_v46 = vadd.f32 %v2687_v51, %v2650_v12 }
 0x4e8   :  { %v2496_v63 = vadd.f32 %v2495_v28, %v5653_v2  ;;  %v3889_v28 = vld [vmem:[#allocation5 + $0x4c0] sm:$0xf] }
 0x4e9   :  { %v2594_v45 = vrot.slane %v2593_v38, 4  ;;  %v2669_v27 = vadd.f32 %v2668_v8, %v2653_v7  ;;  %v2689_v2 = vadd.f32 %v2688_v46, %v2652_v20  ;;  %v3890_v0 = vor.u32 %v4072_v62, %v3889_v28  ;;  %v4054_v28 = vld [vmem:[#allocation5 + $0x434] sm:$0xf0]  ;;  %v3881_v62 = vld [vmem:[#allocation5 + $0x4b0] sm:$0xf] }
 0x4ea   :  { %v2545_v59 = vadd.f32 %v2544_v32, %v2496_v63 }
 0x4eb   :  { %v2595_v36 = vadd.f32 %v2594_v45, %v2593_v38  ;;  %v2670_v61 = vrot.slane %v2669_v27, 4  ;;  %3083 = vmatpush.bf16.msra.mxu1 %v3890_v0  ;;  %v4070_v0 = vld [vmem:[#allocation5 + $0x4b4] sm:$0xf0] }
 0x4ec   :  { %v5971_v4 = vmax.f32 %v2545_v59, 0.0 }
 0x4ed   :  { %v2596_v54 = vrot.slane %v2595_v36, 2  ;;  %v2671_v3 = vadd.f32 %v2670_v61, %v2669_v27 }
 0x4ee   :  { %v2614_v15 = vadd.f32 %v2613_v26, %v5971_v4  ;;  %v2654_v60 = vmul.f32 %v5971_v4, %v5971_v4 }
 0x4ef   :  { %v2597_v31 = vadd.f32 %v2596_v54, %v2595_v36  ;;  %v2672_v19 = vrot.slane %v2671_v3, 2 }
 0x4f0   :  { %v2615_v17 = vrot.slane %v2614_v15, 4  ;;  %v2690_v34 = vadd.f32 %v2689_v2, %v2654_v60 }
 0x4f1   :  { %v2598_v58 = vrot.slane %v2597_v31, 1  ;;  %v2673_v50 = vadd.f32 %v2672_v19, %v2671_v3  ;;  %v4053_v19 = vld [vmem:[#allocation5 + $0x434] sm:$0xf] }
 0x4f2   :  { %v2616_v30 = vadd.f32 %v2615_v17, %v2614_v15  ;;  %v2691_v8 = vrot.slane %v2690_v34, 4  ;;  %v3819_v17 = vld [vmem:[#allocation5 + $0x438] sm:$0xf0] }
 0x4f3   :  { %v2599_v38 = vadd.f32 %v2598_v58, %v2597_v31  ;;  %v2674_v7 = vrot.slane %v2673_v50, 1 }
 0x4f4   :  { %v2617_v12 = vrot.slane %v2616_v30, 2  ;;  %v2692_v63 = vadd.f32 %v2691_v8, %v2690_v34  ;;  %v4069_v34 = vld [vmem:[#allocation5 + $0x4b4] sm:$0xf]  ;;  %v3817_v8 = vld [vmem:[#allocation5 + $0x430] sm:$0xf] }
 0x4f5   :  { %v5976_v45 = vmul.f32 0.0078125, %v2599_v38  ;;  %v2675_v27 = vadd.f32 %v2674_v7, %v2673_v50  ;;  %v3822_v50 = vor.u32 %v4053_v19, %v3819_v17  ;;  %v4049_v19 = vld [vmem:[#allocation5 + $0x414] sm:$0xf]  ;;  %v3803_v17 = vld [vmem:[#allocation5 + $0x418] sm:$0xf0] }
 0x4f6   :  { %v2618_v32 = vadd.f32 %v2617_v12, %v2616_v30  ;;  %v2693_v51 = vrot.slane %v2692_v63, 2  ;;  %v3883_v30 = vld [vmem:[#allocation5 + $0x4b8] sm:$0xf0] }
 0x4f7   :  { %v2697_v22 = vmul.f32 0.0078125, %v2675_v27  ;;  %v2699_v20 = vmul.f32 %v5976_v45, %v5976_v45  ;;  %v3886_v7 = vor.u32 %v4069_v34, %v3883_v30  ;;  %3133 = vmatpush.bf16.msra.mxu2 %v3822_v50  ;;  %v3811_v27 = vld [vmem:[#allocation5 + $0x428] sm:$0xf0]  ;;  %v4065_v34 = vld [vmem:[#allocation5 + $0x494] sm:$0xf]  ;;  %v3806_v30 = vor.u32 %v4049_v19, %v3803_v17 }
 0x4f8   :  { %v2619_v59 = vrot.slane %v2618_v32, 1  ;;  %v2694_v36 = vadd.f32 %v2693_v51, %v2692_v63  ;;  %v4051_v63 = vld [vmem:[#allocation5 + $0x424] sm:$0xf]  ;;  %v3818_v51 = vor.u32 %v4054_v28, %v3817_v8  ;;  %v3867_v8 = vld [vmem:[#allocation5 + $0x498] sm:$0xf0] }
 0x4f9   :  { %v2701_v61 = vsub.f32 %v2697_v22, %v2699_v20  ;;  %3182 = vmatpush.bf16.msra.mxu3 %v3886_v7  ;;  %v3882_v22 = vor.u32 %v4070_v0, %v3881_v62  ;;  %v3814_v20 = vor.u32 %v4051_v63, %v3811_v27  ;;  %v3801_v7 = vld [vmem:[#allocation5 + $0x410] sm:$0xf]  ;;  %v3870_v28 = vor.u32 %v4065_v34, %v3867_v8  ;;  %v4050_v62 = vld [vmem:[#allocation5 + $0x414] sm:$0xf0]  ;;  %v4048_v19 = vld [vmem:[#allocation5 + $0x404] sm:$0xf0] }
 0x4fa   :  { %v2620_v46 = vadd.f32 %v2619_v59, %v2618_v32  ;;  %v2695_v26 = vrot.slane %v2694_v36, 1  ;;  %v4067_v32 = vld [vmem:[#allocation5 + $0x4a4] sm:$0xf]  ;;  %v3875_v59 = vld [vmem:[#allocation5 + $0x4a8] sm:$0xf0]  ;;  %3035 = vmatpush.bf16.msra.mxu0 %v3818_v51 }
 0x4fb   :  { %v5980_v54 = vadd.f32 1e-05, %v2701_v61  ;;  %3084 = vmatpush.bf16.msra.mxu1 %v3882_v22  ;;  %3134 = vmatpush.bf16.msra.mxu2 %v3814_v20  ;;  %v3865_v0 = vld [vmem:[#allocation5 + $0x490] sm:$0xf]  ;;  %v3795_v51 = vld [vmem:[#allocation5 + $0x408] sm:$0xf0]  ;;  %v3802_v20 = vor.u32 %v4050_v62, %v3801_v7 }
 0x4fc   :  { %v5982_v3 = vmul.f32 0.0078125, %v2620_v46  ;;  %v2696_v2 = vadd.f32 %v2695_v26, %v2694_v36  ;;  %v3809_v36 = vld [vmem:[#allocation5 + $0x420] sm:$0xf]  ;;  %v3878_v46 = vor.u32 %v4067_v32, %v3875_v59  ;;  %v4052_v26 = vld [vmem:[#allocation5 + $0x424] sm:$0xf0]  ;;  %v2725_v22 = vperm.slane %v5644_v16, 1 }
 0x4fd   :  { %4099 = vrsqrt.f32 %v5980_v54  ;;  %v4047_v32 = vld [vmem:[#allocation5 + $0x404] sm:$0xf]  ;;  %vm2711_vm4 = vweird.f32 %v5980_v54  ;;  %v3857_v17 = vld [vmem:[#allocation5 + $0x480] sm:$0xf] }
 0x4fe   :  { %v2698_v15 = vmul.f32 0.0078125, %v2696_v2  ;;  %v2700_v60 = vmul.f32 %v5982_v3, %v5982_v3  ;;  %v3873_v2 = vld [vmem:[#allocation5 + $0x4a0] sm:$0xf]  ;;  %3183 = vmatpush.bf16.msra.mxu3 %v3878_v46  ;;  %v3859_v46 = vld [vmem:[#allocation5 + $0x488] sm:$0xf0] }
 0x4ff   :  { %3135 = vmatpush.bf16.msra.mxu2 %v3806_v30 }
 0x500   :  { %v2702_v31 = vsub.f32 %v2698_v15, %v2700_v60  ;;  %v4068_v15 = vld [vmem:[#allocation5 + $0x4a4] sm:$0xf0]  ;;  %v3810_v60 = vor.u32 %v4052_v26, %v3809_v36 }
 0x502   :  { %v5987_v58 = vadd.f32 1e-05, %v2702_v31  ;;  %v3874_v31 = vor.u32 %v4068_v15, %v3873_v2  ;;  %3036 = vmatpush.bf16.msra.mxu0 %v3810_v60  ;;  %v3798_v2 = vor.u32 %v4047_v32, %v3795_v51  ;;  %v3793_v15 = vld [vmem:[#allocation5 + $0x400] sm:$0xf]  ;;  %3184 = vmatpush.bf16.msra.mxu3 %v3870_v28 }
 0x503   :  { %v5989_v38 = vpop.eup %4099  ;;  %v3794_v62 = vor.u32 %v4048_v19, %v3793_v15 }
 0x504   :  { %v2706_v12 = vmul.f32 %v5989_v38, %v5980_v54  ;;  %4101 = vrsqrt.f32 %v5987_v58  ;;  %vm2712_vm3 = vweird.f32 %v5989_v38  ;;  %3085 = vmatpush.bf16.msra.mxu1 %v3874_v31  ;;  %v4064_v31 = vld [vmem:[#allocation5 + $0x484] sm:$0xf0]  ;;  %3136 = vmatpush.bf16.msra.mxu2 %v3798_v2  ;;  %vm2721_vm8 = vweird.f32 %v5987_v58 }
 0x505   :  { %vm2713_vm5 = vmor %vm2711_vm4, %vm2712_vm3  ;;  %v3858_v54 = vor.u32 %v4064_v31, %v3857_v17 }
 0x506   :  { %v2707_v61 = vmul.f32 %v5989_v38, %v2706_v12  ;;  %v4066_v12 = vld [vmem:[#allocation5 + $0x494] sm:$0xf0]  ;;  %3037 = vmatpush.bf16.msra.mxu0 %v3802_v20 }
 0x507   :  { %v3866_v36 = vor.u32 %v4066_v12, %v3865_v0  ;;  %v2726_v12 = vperm.slane %v5644_v16, 5 }
 0x508   :  { %v2708_v50 = vmul.f32 0.5, %v2707_v61  ;;  %v4063_v61 = vld [vmem:[#allocation5 + $0x484] sm:$0xf] }
 0x509   :  { %v3862_v60 = vor.u32 %v4063_v61, %v3859_v46  ;;  %3086 = vmatpush.bf16.msra.mxu1 %v3866_v36 }
 0x50a   :  { %v4102_v63 = vpop.eup %4101  ;;  %v2709_v27 = vsub.f32 1.5, %v2708_v50  ;;  %3038 = vmatpush.bf16.msra.mxu0 %v3794_v62 }
 0x50b   :  { %v2716_v59 = vmul.f32 %v4102_v63, %v5987_v58  ;;  %vm2722_vm7 = vweird.f32 %v4102_v63  ;;  %3185 = vmatpush.bf16.msra.mxu3 %v3862_v60 }
 0x50c   :  { %v2710_v26 = vmul.f32 %v5989_v38, %v2709_v27  ;;  %vm2723_vm9 = vmor %vm2721_vm8, %vm2722_vm7 }
 0x50d   :  { %v2717_v34 = vmul.f32 %v4102_v63, %v2716_v59  ;;  %3087 = vmatpush.bf16.msra.mxu1 %v3858_v54 }
 0x50e   :  { %v2714_v50 = vsel %vm2713_vm5, %v5989_v38, %v2710_v26 }
 0x50f   :  { %v2729_v8 = vmul.f32 %v2725_v22, %v2714_v50  ;;  %v2718_v7 = vmul.f32 0.5, %v2717_v34 }
 0x511   :  { %v6003_v30 = vperm.slane %v2729_v8, 0  ;;  %v2719_v0 = vsub.f32 1.5, %v2718_v7 }
 0x513   :  { %v6008_v28 = vmul.f32 %v6003_v30, %v5953_v33  ;;  %v2720_v27 = vmul.f32 %v4102_v63, %v2719_v0  ;;  %v2768_v51 = vmul.f32 %v6003_v30, %v5919_v25  ;;  %v2770_v22 = vmul.f32 %v6003_v30, %v5928_v52 }
 0x514   :  { %v2731_v33 = vmul.f32 %v2729_v8, %v5976_v45  ;;  %v2742_v45 = vmul.f32 %v6003_v30, %v5743_v47  ;;  %v2744_v2 = vmul.f32 %v6003_v30, %v5738_v18  ;;  %v2746_v60 = vmul.f32 %v6003_v30, %v5756_v11 }
 0x515   :  { %v2724_v38 = vsel %vm2723_vm9, %v4102_v63, %v2720_v27  ;;  %v2758_v31 = vmul.f32 %v6003_v30, %v5865_v41  ;;  %v2762_v50 = vmul.f32 %v6003_v30, %v5889_v24  ;;  %v2764_v8 = vmul.f32 %v6003_v30, %v5900_v10 }
 0x516   :  { %v2730_v32 = vmul.f32 %v2726_v12, %v2724_v38 }
 0x518   :  { %v2732_v59 = vmul.f32 %v2730_v32, %v5982_v3  ;;  %v6016_v20 = vperm.slane %v2730_v32, 0 }
 0x51a   :  { %v2735_v36 = vrot.slane %v2732_v59, 4  ;;  %v2773_v58 = vmul.f32 %v6016_v20, %v5971_v4  ;;  %v2769_v46 = vmul.f32 %v6016_v20, %v5950_v23  ;;  %v2771_v25 = vmul.f32 %v6016_v20, %v5958_v42 }
 0x51b   :  { %v2743_v23 = vmul.f32 %v6016_v20, %v5753_v53  ;;  %v2745_v42 = vmul.f32 %v6016_v20, %v5745_v57  ;;  %v2760_v53 = vmul.f32 %v6003_v30, %v5878_v6  ;;  %v2759_v57 = vmul.f32 %v6016_v20, %v5884_v56 }
 0x51c   :  { %v2736_v61 = vsel %vm695_vm6, %v2731_v33, %v2735_v36  ;;  %v2761_v11 = vmul.f32 %v6016_v20, %v5912_v1  ;;  %v2763_v41 = vmul.f32 %v6016_v20, %v5922_v14  ;;  %v2766_v6 = vmul.f32 %v6003_v30, %v5910_v39 }
 0x51d   :  { %v2737_v63 = vrot.slane %v2736_v61, 6  ;;  %v2765_v10 = vmul.f32 %v6016_v20, %v5932_v44  ;;  %v2767_v14 = vmul.f32 %v6016_v20, %v5942_v29 }
 0x51f   :  { %v2739_v52 = vsub.f32 %v5644_v16, %v2737_v63  ;;  %v2748_v63 = vmul.f32 %v6003_v30, %v5774_v21 }
 0x521   :  { %v2775_v3 = vperm.slane %v2739_v52, 2  ;;  %v2776_v26 = vperm.slane %v2739_v52, 6 }
 0x523   :  { %v6031_v4 = vperm.slane %v2775_v3, 2  ;;  %v6033_v15 = vperm.slane %v2776_v26, 2 }
 0x525   :  { %v2781_v16 = vadd.f32 %v6031_v4, %v2742_v45  ;;  %v2783_v19 = vadd.f32 %v6031_v4, %v2744_v2  ;;  %v2782_v17 = vadd.f32 %v6033_v15, %v2743_v23  ;;  %v2784_v47 = vadd.f32 %v6033_v15, %v2745_v42 }
 0x526   :  { %v2797_v7 = vadd.f32 %v6031_v4, %v2758_v31  ;;  %v2799_v56 = vadd.f32 %v6031_v4, %v2760_v53  ;;  %v2798_v24 = vadd.f32 %v6033_v15, %v2759_v57  ;;  %v2800_v62 = vadd.f32 %v6033_v15, %v2761_v11 }
 0x527   :  { %v2815_v34 = vpack.c.bf16 %v2783_v19, %v2781_v16  ;;  %v2816_v18 = vpack.c.bf16 %v2784_v47, %v2782_v17  ;;  %v2801_v54 = vadd.f32 %v6031_v4, %v2762_v50  ;;  %v2803_v1 = vadd.f32 %v6031_v4, %v2764_v8 }
 0x528   :  { %v2823_v0 = vpack.c.bf16 %v2799_v56, %v2797_v7  ;;  %v2802_v39 = vadd.f32 %v6033_v15, %v2763_v41  ;;  %v2804_v12 = vadd.f32 %v6033_v15, %v2765_v10  ;;  %v2805_v27 = vadd.f32 %v6031_v4, %v2766_v6 }
 0x529   :  { %3039 = vmatmul.bf16.vlgmr.msra.gmra.mxu0 %v2815_v34  ;;  %3088 = vmatmul.bf16.vlgmr.msra.gmra.mxu1 %v2816_v18  ;;  %v2824_v38 = vpack.c.bf16 %v2800_v62, %v2798_v24  ;;  %v2825_v32 = vpack.c.bf16 %v2803_v1, %v2801_v54  ;;  %v2807_v44 = vadd.f32 %v6031_v4, %v2768_v51 }
 0x52a   :  { %3137 = vmatmul.bf16.vlgmr.msra.gmra.mxu2 %v2815_v34  ;;  %3186 = vmatmul.bf16.vlgmr.msra.gmra.mxu3 %v2816_v18  ;;  %v2806_v59 = vadd.f32 %v6033_v15, %v2767_v14  ;;  %v2826_v33 = vpack.c.bf16 %v2804_v12, %v2802_v39  ;;  %v2808_v36 = vadd.f32 %v6033_v15, %v2769_v46 }
 0x52b   :  { %v2809_v61 = vadd.f32 %v6031_v4, %v2770_v22  ;;  %v2811_v29 = vadd.f32 %v6031_v4, %v6008_v28  ;;  %v2827_v52 = vpack.c.bf16 %v2807_v44, %v2805_v27  ;;  %v2810_v3 = vadd.f32 %v6033_v15, %v2771_v25 }
 0x52c   :  { %v2812_v26 = vadd.f32 %v6033_v15, %v2773_v58  ;;  %v2747_v51 = vmul.f32 %v6016_v20, %v5772_v55  ;;  %v2749_v45 = vmul.f32 %v6016_v20, %v5786_v43  ;;  %v2828_v46 = vpack.c.bf16 %v2808_v36, %v2806_v59 }
 0x52d   :  { %v2829_v2 = vpack.c.bf16 %v2811_v29, %v2809_v61  ;;  %v2785_v23 = vadd.f32 %v6031_v4, %v2746_v60  ;;  %v2787_v28 = vadd.f32 %v6031_v4, %v2748_v63  ;;  %v2750_v55 = vmul.f32 %v6003_v30, %v5793_v37 }
 0x52e   :  { %v2830_v22 = vpack.c.bf16 %v2812_v26, %v2810_v3  ;;  %v2786_v21 = vadd.f32 %v6033_v15, %v2747_v51  ;;  %v2788_v42 = vadd.f32 %v6033_v15, %v2749_v45  ;;  %v2752_v43 = vmul.f32 %v6003_v30, %v5817_v40 }
 0x52f   :  { %v2817_v25 = vpack.c.bf16 %v2787_v28, %v2785_v23  ;;  %v2751_v58 = vmul.f32 %v6016_v20, %v5808_v35  ;;  %v2753_v19 = vmul.f32 %v6016_v20, %v5831_v13  ;;  %v2789_v17 = vadd.f32 %v6031_v4, %v2750_v55 }
 0x530   :  { %v2818_v16 = vpack.c.bf16 %v2788_v42, %v2786_v21  ;;  %v2791_v47 = vadd.f32 %v6031_v4, %v2752_v43  ;;  %v2754_v37 = vmul.f32 %v6003_v30, %v5833_v48  ;;  %v2756_v35 = vmul.f32 %v6003_v30, %v5846_v5  ;;  %v2814_v48 = vld [vmem:[#allocation7 + $0x20] sm:$0x77] }
 0x531   :  { %v2790_v34 = vadd.f32 %v6033_v15, %v2751_v58  ;;  %v2792_v18 = vadd.f32 %v6033_v15, %v2753_v19  ;;  %v2755_v40 = vmul.f32 %v6016_v20, %v5840_v9  ;;  %v2757_v13 = vmul.f32 %v6016_v20, %v5870_v49 }
 0x532   :  { %v2819_v60 = vpack.c.bf16 %v2791_v47, %v2789_v17  ;;  %v2793_v53 = vadd.f32 %v6031_v4, %v2754_v37  ;;  %v2795_v57 = vadd.f32 %v6031_v4, %v2756_v35  ;;  %v2865_v9 = vperm.slane %v2814_v48, 0 }
 0x533   :  { %v2820_v31 = vpack.c.bf16 %v2792_v18, %v2790_v34  ;;  %v2794_v50 = vadd.f32 %v6033_v15, %v2755_v40  ;;  %v2796_v8 = vadd.f32 %v6033_v15, %v2757_v13  ;;  %v2866_v20 = vperm.slane %v2814_v48, 4 }
 0x534   :  { %v2821_v11 = vpack.c.bf16 %v2795_v57, %v2793_v53  ;;  %v6116_v5 = vperm.slane %v2865_v9, 0 }
 0x535   :  { %v2822_v41 = vpack.c.bf16 %v2796_v8, %v2794_v50  ;;  %v6119_v6 = vperm.slane %v2866_v20, 0 }
 0x539   :  { %3044 = vmatmul.bf16.gmra.mxu0 %v2817_v25  ;;  %3093 = vmatmul.bf16.gmra.mxu1 %v2818_v16 }
 0x53a   :  { %3142 = vmatmul.bf16.gmra.mxu2 %v2817_v25  ;;  %3191 = vmatmul.bf16.gmra.mxu3 %v2818_v16 }
 0x549   :  { %3049 = vmatmul.bf16.gmra.mxu0 %v2819_v60  ;;  %3098 = vmatmul.bf16.gmra.mxu1 %v2820_v31 }
 0x54a   :  { %3147 = vmatmul.bf16.gmra.mxu2 %v2819_v60  ;;  %3196 = vmatmul.bf16.gmra.mxu3 %v2820_v31 }
 0x559   :  { %3054 = vmatmul.bf16.gmra.mxu0 %v2821_v11  ;;  %3103 = vmatmul.bf16.gmra.mxu1 %v2822_v41 }
 0x55a   :  { %3152 = vmatmul.bf16.gmra.mxu2 %v2821_v11  ;;  %3201 = vmatmul.bf16.gmra.mxu3 %v2822_v41 }
 0x569   :  { %3059 = vmatmul.bf16.gmra.mxu0 %v2823_v0  ;;  %3108 = vmatmul.bf16.gmra.mxu1 %v2824_v38 }
 0x56a   :  { %3157 = vmatmul.bf16.gmra.mxu2 %v2823_v0  ;;  %3206 = vmatmul.bf16.gmra.mxu3 %v2824_v38 }
 0x579   :  { %3064 = vmatmul.bf16.gmra.mxu0 %v2825_v32  ;;  %3113 = vmatmul.bf16.gmra.mxu1 %v2826_v33 }
 0x57a   :  { %3162 = vmatmul.bf16.gmra.mxu2 %v2825_v32  ;;  %3211 = vmatmul.bf16.gmra.mxu3 %v2826_v33 }
 0x589   :  { %3069 = vmatmul.bf16.gmra.mxu0 %v2827_v52  ;;  %3118 = vmatmul.bf16.gmra.mxu1 %v2828_v46 }
 0x58a   :  { %3167 = vmatmul.bf16.gmra.mxu2 %v2827_v52  ;;  %3216 = vmatmul.bf16.gmra.mxu3 %v2828_v46 }
 0x599   :  { %3074 = vmatmul.bf16.gmra.mxu0 %v2829_v2  ;;  %3123 = vmatmul.bf16.gmra.mxu1 %v2830_v22 }
 0x59a   :  { %3172 = vmatmul.bf16.gmra.mxu2 %v2829_v2  ;;  %3221 = vmatmul.bf16.gmra.mxu3 %v2830_v22 }
 0x5a6   :  { %v3040_v49 = vpop.f32.mrf.mxu0  ;;  %v3089_v30 = vpop.f32.mrf.mxu1 }
 0x5a7   :  { %v3041_v4 = vadd.f32 %v3040_v49, %v6116_v5 }
 0x5a9   :  { %v3090_v15 = vadd.f32 %v3089_v30, %v3041_v4 }
 0x5ab   :  { %3227 = vst [vmem:[#allocation8] sm:$0xff] %v3090_v15 }
 0x5ad   :  { %v3138_v7 = vpop.f32.mrf.mxu2  ;;  %v3187_v56 = vpop.f32.mrf.mxu3 }
 0x5ae   :  { %v3139_v24 = vadd.f32 %v3138_v7, %v6119_v6  ;;  %v3042_v10 = vpop.f32.mrf.mxu0  ;;  %v3091_v62 = vpop.f32.mrf.mxu1 }
 0x5af   :  { %v3043_v54 = vadd.f32 %v3042_v10, %v6116_v5 }
 0x5b0   :  { %v3188_v1 = vadd.f32 %v3187_v56, %v3139_v24 }
 0x5b1   :  { %v3092_v14 = vadd.f32 %v3091_v62, %v3043_v54 }
 0x5b2   :  { %3228 = vst [vmem:[#allocation8 + $0x8] sm:$0xff] %v3188_v1 }
 0x5b3   :  { %3229 = vst [vmem:[#allocation8 + $0x10] sm:$0xff] %v3092_v14 }
 0x5b5   :  { %v3140_v0 = vpop.f32.mrf.mxu2  ;;  %v3189_v39 = vpop.f32.mrf.mxu3 }
 0x5b6   :  { %v3141_v12 = vadd.f32 %v3140_v0, %v6119_v6  ;;  %v3045_v27 = vpop.f32.mrf.mxu0  ;;  %v3094_v38 = vpop.f32.mrf.mxu1 }
 0x5b7   :  { %v3046_v32 = vadd.f32 %v3045_v27, %v6116_v5 }
 0x5b8   :  { %v3190_v44 = vadd.f32 %v3189_v39, %v3141_v12 }
 0x5b9   :  { %v3095_v59 = vadd.f32 %v3094_v38, %v3046_v32 }
 0x5ba   :  { %3230 = vst [vmem:[#allocation8 + $0x18] sm:$0xff] %v3190_v44 }
 0x5bb   :  { %3231 = vst [vmem:[#allocation8 + $0x20] sm:$0xff] %v3095_v59 }
 0x5bd   :  { %v3143_v33 = vpop.f32.mrf.mxu2  ;;  %v3192_v36 = vpop.f32.mrf.mxu3 }
 0x5be   :  { %v3144_v61 = vadd.f32 %v3143_v33, %v6119_v6  ;;  %v3047_v29 = vpop.f32.mrf.mxu0  ;;  %v3096_v63 = vpop.f32.mrf.mxu1 }
 0x5bf   :  { %v3048_v52 = vadd.f32 %v3047_v29, %v6116_v5 }
 0x5c0   :  { %v3193_v3 = vadd.f32 %v3192_v36, %v3144_v61 }
 0x5c1   :  { %v3097_v26 = vadd.f32 %v3096_v63, %v3048_v52 }
 0x5c2   :  { %3232 = vst [vmem:[#allocation8 + $0x28] sm:$0xff] %v3193_v3 }
 0x5c3   :  { %3233 = vst [vmem:[#allocation8 + $0x30] sm:$0xff] %v3097_v26 }
 0x5c5   :  { %v3145_v51 = vpop.f32.mrf.mxu2  ;;  %v3194_v45 = vpop.f32.mrf.mxu3 }
 0x5c6   :  { %v3146_v46 = vadd.f32 %v3145_v51, %v6119_v6  ;;  %v3050_v2 = vpop.f32.mrf.mxu0  ;;  %v3099_v22 = vpop.f32.mrf.mxu1 }
 0x5c7   :  { %v3051_v23 = vadd.f32 %v3050_v2, %v6116_v5 }
 0x5c8   :  { %v3195_v28 = vadd.f32 %v3194_v45, %v3146_v46 }
 0x5c9   :  { %v3100_v21 = vadd.f32 %v3099_v22, %v3051_v23 }
 0x5ca   :  { %3234 = vst [vmem:[#allocation8 + $0x38] sm:$0xff] %v3195_v28 }
 0x5cb   :  { %3235 = vst [vmem:[#allocation8 + $0x40] sm:$0xff] %v3100_v21 }
 0x5cd   :  { %v3148_v42 = vpop.f32.mrf.mxu2  ;;  %v3197_v25 = vpop.f32.mrf.mxu3 }
 0x5ce   :  { %v3149_v16 = vadd.f32 %v3148_v42, %v6119_v6  ;;  %v3052_v55 = vpop.f32.mrf.mxu0  ;;  %v3101_v43 = vpop.f32.mrf.mxu1 }
 0x5cf   :  { %v3053_v58 = vadd.f32 %v3052_v55, %v6116_v5 }
 0x5d0   :  { %v3198_v19 = vadd.f32 %v3197_v25, %v3149_v16 }
 0x5d1   :  { %v3102_v17 = vadd.f32 %v3101_v43, %v3053_v58 }
 0x5d2   :  { %3236 = vst [vmem:[#allocation8 + $0x48] sm:$0xff] %v3198_v19 }
 0x5d3   :  { %3237 = vst [vmem:[#allocation8 + $0x50] sm:$0xff] %v3102_v17 }
 0x5d5   :  { %v3150_v47 = vpop.f32.mrf.mxu2  ;;  %v3199_v34 = vpop.f32.mrf.mxu3 }
 0x5d6   :  { %v3151_v18 = vadd.f32 %v3150_v47, %v6119_v6  ;;  %v3055_v60 = vpop.f32.mrf.mxu0  ;;  %v3104_v31 = vpop.f32.mrf.mxu1 }
 0x5d7   :  { %v3056_v37 = vadd.f32 %v3055_v60, %v6116_v5 }
 0x5d8   :  { %v3200_v35 = vadd.f32 %v3199_v34, %v3151_v18 }
 0x5d9   :  { %v3105_v40 = vadd.f32 %v3104_v31, %v3056_v37 }
 0x5da   :  { %3238 = vst [vmem:[#allocation8 + $0x58] sm:$0xff] %v3200_v35 }
 0x5db   :  { %3239 = vst [vmem:[#allocation8 + $0x60] sm:$0xff] %v3105_v40 }
 0x5dd   :  { %v3153_v13 = vpop.f32.mrf.mxu2  ;;  %v3202_v53 = vpop.f32.mrf.mxu3 }
 0x5de   :  { %v3154_v57 = vadd.f32 %v3153_v13, %v6119_v6  ;;  %v3057_v50 = vpop.f32.mrf.mxu0  ;;  %v3106_v8 = vpop.f32.mrf.mxu1 }
 0x5df   :  { %v3058_v11 = vadd.f32 %v3057_v50, %v6116_v5 }
 0x5e0   :  { %v3203_v41 = vadd.f32 %v3202_v53, %v3154_v57 }
 0x5e1   :  { %v3107_v48 = vadd.f32 %v3106_v8, %v3058_v11 }
 0x5e2   :  { %3240 = vst [vmem:[#allocation8 + $0x68] sm:$0xff] %v3203_v41 }
 0x5e3   :  { %3241 = vst [vmem:[#allocation8 + $0x70] sm:$0xff] %v3107_v48 }
 0x5e5   :  { %v3155_v9 = vpop.f32.mrf.mxu2  ;;  %v3204_v49 = vpop.f32.mrf.mxu3 }
 0x5e6   :  { %v3156_v30 = vadd.f32 %v3155_v9, %v6119_v6  ;;  %v3060_v20 = vpop.f32.mrf.mxu0  ;;  %v3109_v4 = vpop.f32.mrf.mxu1 }
 0x5e7   :  { %v3061_v15 = vadd.f32 %v3060_v20, %v6116_v5 }
 0x5e8   :  { %v3205_v7 = vadd.f32 %v3204_v49, %v3156_v30 }
 0x5e9   :  { %v3110_v56 = vadd.f32 %v3109_v4, %v3061_v15 }
 0x5ea   :  { %3242 = vst [vmem:[#allocation8 + $0x78] sm:$0xff] %v3205_v7 }
 0x5eb   :  { %3243 = vst [vmem:[#allocation8 + $0x80] sm:$0xff] %v3110_v56 }
 0x5ed   :  { %v3158_v24 = vpop.f32.mrf.mxu2  ;;  %v3207_v10 = vpop.f32.mrf.mxu3 }
 0x5ee   :  { %v3159_v62 = vadd.f32 %v3158_v24, %v6119_v6  ;;  %v3062_v54 = vpop.f32.mrf.mxu0  ;;  %v3111_v1 = vpop.f32.mrf.mxu1 }
 0x5ef   :  { %v3063_v14 = vadd.f32 %v3062_v54, %v6116_v5 }
 0x5f0   :  { %v3208_v0 = vadd.f32 %v3207_v10, %v3159_v62 }
 0x5f1   :  { %v3112_v39 = vadd.f32 %v3111_v1, %v3063_v14 }
 0x5f2   :  { %3244 = vst [vmem:[#allocation8 + $0x88] sm:$0xff] %v3208_v0 }
 0x5f3   :  { %3245 = vst [vmem:[#allocation8 + $0x90] sm:$0xff] %v3112_v39 }
 0x5f5   :  { %v3160_v12 = vpop.f32.mrf.mxu2  ;;  %v3209_v27 = vpop.f32.mrf.mxu3 }
 0x5f6   :  { %v3161_v38 = vadd.f32 %v3160_v12, %v6119_v6  ;;  %v3065_v32 = vpop.f32.mrf.mxu0  ;;  %v3114_v44 = vpop.f32.mrf.mxu1 }
 0x5f7   :  { %v3066_v59 = vadd.f32 %v3065_v32, %v6116_v5 }
 0x5f8   :  { %v3210_v33 = vadd.f32 %v3209_v27, %v3161_v38 }
 0x5f9   :  { %v3115_v36 = vadd.f32 %v3114_v44, %v3066_v59 }
 0x5fa   :  { %3246 = vst [vmem:[#allocation8 + $0x98] sm:$0xff] %v3210_v33 }
 0x5fb   :  { %3247 = vst [vmem:[#allocation8 + $0xa0] sm:$0xff] %v3115_v36 }
 0x5fd   :  { %v3163_v61 = vpop.f32.mrf.mxu2  ;;  %v3212_v29 = vpop.f32.mrf.mxu3 }
 0x5fe   :  { %v3164_v63 = vadd.f32 %v3163_v61, %v6119_v6  ;;  %v3067_v52 = vpop.f32.mrf.mxu0  ;;  %v3116_v3 = vpop.f32.mrf.mxu1 }
 0x5ff   :  { %v3068_v26 = vadd.f32 %v3067_v52, %v6116_v5 }
 0x600   :  { %v3213_v51 = vadd.f32 %v3212_v29, %v3164_v63 }
 0x601   :  { %v3117_v45 = vadd.f32 %v3116_v3, %v3068_v26 }
 0x602   :  { %3248 = vst [vmem:[#allocation8 + $0xa8] sm:$0xff] %v3213_v51 }
 0x603   :  { %3249 = vst [vmem:[#allocation8 + $0xb0] sm:$0xff] %v3117_v45 }
 0x605   :  { %v3165_v46 = vpop.f32.mrf.mxu2  ;;  %v3214_v2 = vpop.f32.mrf.mxu3 }
 0x606   :  { %v3166_v22 = vadd.f32 %v3165_v46, %v6119_v6  ;;  %v3070_v23 = vpop.f32.mrf.mxu0  ;;  %v3119_v28 = vpop.f32.mrf.mxu1 }
 0x607   :  { %v3071_v21 = vadd.f32 %v3070_v23, %v6116_v5 }
 0x608   :  { %v3215_v42 = vadd.f32 %v3214_v2, %v3166_v22 }
 0x609   :  { %v3120_v25 = vadd.f32 %v3119_v28, %v3071_v21 }
 0x60a   :  { %3250 = vst [vmem:[#allocation8 + $0xb8] sm:$0xff] %v3215_v42 }
 0x60b   :  { %3251 = vst [vmem:[#allocation8 + $0xc0] sm:$0xff] %v3120_v25 }
 0x60d   :  { %v3168_v16 = vpop.f32.mrf.mxu2  ;;  %v3217_v55 = vpop.f32.mrf.mxu3 }
 0x60e   :  { %v3169_v43 = vadd.f32 %v3168_v16, %v6119_v6  ;;  %v3072_v58 = vpop.f32.mrf.mxu0  ;;  %v3121_v19 = vpop.f32.mrf.mxu1 }
 0x60f   :  { %v3073_v17 = vadd.f32 %v3072_v58, %v6116_v5 }
 0x610   :  { %v3218_v47 = vadd.f32 %v3217_v55, %v3169_v43 }
 0x611   :  { %v3122_v34 = vadd.f32 %v3121_v19, %v3073_v17 }
 0x612   :  { %3252 = vst [vmem:[#allocation8 + $0xc8] sm:$0xff] %v3218_v47 }
 0x613   :  { %3253 = vst [vmem:[#allocation8 + $0xd0] sm:$0xff] %v3122_v34 }
 0x615   :  { %v3170_v18 = vpop.f32.mrf.mxu2  ;;  %v3219_v60 = vpop.f32.mrf.mxu3 }
 0x616   :  { %v3171_v31 = vadd.f32 %v3170_v18, %v6119_v6  ;;  %v3075_v37 = vpop.f32.mrf.mxu0  ;;  %v3124_v35 = vpop.f32.mrf.mxu1 }
 0x617   :  { %v3076_v40 = vadd.f32 %v3075_v37, %v6116_v5 }
 0x618   :  { %v3220_v13 = vadd.f32 %v3219_v60, %v3171_v31 }
 0x619   :  { %v3125_v53 = vadd.f32 %v3124_v35, %v3076_v40 }
 0x61a   :  { %3254 = vst [vmem:[#allocation8 + $0xd8] sm:$0xff] %v3220_v13 }
 0x61b   :  { %3255 = vst [vmem:[#allocation8 + $0xe0] sm:$0xff] %v3125_v53 }
 0x61d   :  { %v3173_v57 = vpop.f32.mrf.mxu2  ;;  %v3222_v50 = vpop.f32.mrf.mxu3 }
 0x61e   :  { %v3174_v8 = vadd.f32 %v3173_v57, %v6119_v6  ;;  %v3077_v11 = vpop.f32.mrf.mxu0  ;;  %v3126_v9 = vpop.f32.mrf.mxu1 }
 0x61f   :  { %v3078_v41 = vadd.f32 %v3077_v11, %v6116_v5 }
 0x620   :  { %v3223_v48 = vadd.f32 %v3222_v50, %v3174_v8 }
 0x621   :  { %v3127_v49 = vadd.f32 %v3126_v9, %v3078_v41 }
 0x622   :  { %3256 = vst [vmem:[#allocation8 + $0xe8] sm:$0xff] %v3223_v48 }
 0x623   :  { %3257 = vst [vmem:[#allocation8 + $0xf0] sm:$0xff] %v3127_v49 }
 0x625   :  { %v3175_v30 = vpop.f32.mrf.mxu2  ;;  %v3224_v4 = vpop.f32.mrf.mxu3 }
 0x626   :  { %v3176_v20 = vadd.f32 %v3175_v30, %v6119_v6 }
 0x628   :  { %v3225_v15 = vadd.f32 %v3224_v4, %v3176_v20 }
 0x62a   :  { %3258 = vst [vmem:[#allocation8 + $0xf8] sm:$0xff] %v3225_v15 }
 0x62b   :  { %3271 = dma.vmem_to_hbm [thread:$0]  %s3264_s29, 4096, %s3266_s5, [#allocation4], %s4209_s24, %s4209_s24, %s4210_s25  }
 0x62c   :  { %4203 = dma.done.wait [#allocation4], 4096  }
 0x62d   :  { %4204 = vsyncadd [#allocation4], 4294963200 }
 0x62e   :  { %3276 = vsyncpa [#allocation3], 1 }
 0x62f   :  { %3277 = vsyncpa [#allocation6], 1 }
 0x630   :  { %3278 = vsyncpa [#allocation4], 1 }

</bundles_post_ra>
